<compile_context>
chip_gen: v7x
topology: tpu7x:2x2x1
jax: 0.10.0
libtpu: 0.0.40
codegen_flags: <defaults>
</compile_context>

<pallas_src>
import math

import jax
import jax.numpy as jnp
from jax import lax
from jax.experimental import pallas as pl
from jax.experimental.pallas import tpu as pltpu

# ---------------- model config ----------------
INPUT_DIM = 4
EMBED_DIM = 32
NUM_LAYERS = 2
NUM_HEADS = 4
HEAD_DIM = EMBED_DIM // NUM_HEADS
HIDDEN_DIM = 4 * EMBED_DIM
OUTPUT_DIM = 1
OUT_PAD = 128            # lane-dense padded head output width
B = 2
T = 8
ROWS = B * T
LN_EPS = 1e-5            # PyTorch nn.LayerNorm default
NEG_INF = -1e9


# ---------------- in-kernel helpers ----------------
def _layer_norm(x, gamma, beta):
    # one-pass variance: E[x^2] - mu^2 (two cross-lane reduces total)
    mu = jnp.mean(x, axis=-1, keepdims=True)
    ms = jnp.mean(x * x, axis=-1, keepdims=True)
    var = ms - mu * mu
    return (x - mu) * lax.rsqrt(var + LN_EPS) * gamma + beta


# ---------------- fused kernel ----------------
def fused_forward_kernel(
        x_ref, we_ref, be_ref,
        g1_ref, be1_ref, wq_ref, bq_ref, wk_ref, bk_ref, wv_ref, bv_ref,
        wp_ref, bp_ref, g2_ref, be2_ref, w1_ref, bm1_ref, w2_ref, bm2_ref,
        gf_ref, bf_ref, wh_ref, bh_ref,
        rope_ref, omr_ref, rot_ref, bias_ref, hmask_ref,
        o_ref):
    # loop-invariant tables, loaded once
    rope = rope_ref[...]        # (B*T, E): cos/sin interleaved, tiled over heads/batch
    omr = omr_ref[...]          # (B*T, E): 1 - rope
    rot = rot_ref[...]          # (E, E):   x @ rot == rotate(x)
    bias = bias_ref[...]        # (B*T, B*T): 0 if same-batch & causal else -1e9

    # embedding: (B*T, INPUT_DIM) @ (INPUT_DIM, E)
    x = jnp.dot(x_ref[...], we_ref[...], preferred_element_type=jnp.float32) + be_ref[...]

    for l in range(NUM_LAYERS):          # static unroll over layers
        # ---- attention sublayer (pre-LN) ----
        h = _layer_norm(x, g1_ref[l], be1_ref[l])
        q = jnp.dot(h, wq_ref[l], preferred_element_type=jnp.float32) + bq_ref[l]  # scale folded in
        k = jnp.dot(h, wk_ref[l], preferred_element_type=jnp.float32) + bk_ref[l]
        v = jnp.dot(h, wv_ref[l], preferred_element_type=jnp.float32) + bv_ref[l]

        # RoPE on full q/k (matches module: q*rope + rotate(q)*(1-rope))
        q = q * rope + jnp.dot(q, rot, preferred_element_type=jnp.float32) * omr
        k = k * rope + jnp.dot(k, rot, preferred_element_type=jnp.float32) * omr

        y = None
        for hh in range(NUM_HEADS):      # static unroll; heads live in disjoint columns
            hm = hmask_ref[hh]           # (1, E) selector for this head's columns
            km = k * hm
            vm = v * hm
            # scores over batch-folded rows; head selection happens via km's zeroed cols
            s = lax.dot_general(q, km, (((1,), (1,)), ((), ())),
                                preferred_element_type=jnp.float32) + bias
            m = jnp.max(s, axis=-1, keepdims=True)
            p = jnp.exp(s - m)
            denom = jnp.sum(p, axis=-1, keepdims=True)
            oh = jnp.dot(p, vm, preferred_element_type=jnp.float32)
            oh = oh * pl.reciprocal(denom, approx=True)   # fold 1/sum into the output
            y = oh if y is None else y + oh               # disjoint columns -> sum == concat
        y = jnp.dot(y, wp_ref[l], preferred_element_type=jnp.float32) + bp_ref[l]
        x = x + y

        # ---- MLP sublayer (pre-LN) ----
        h2 = _layer_norm(x, g2_ref[l], be2_ref[l])
        m1 = jnp.dot(h2, w1_ref[l], preferred_element_type=jnp.float32) + bm1_ref[l]
        m1 = 0.5 * m1 * (1.0 + lax.erf(m1 * (1.0 / math.sqrt(2.0))))   # exact GELU
        x = x + jnp.dot(m1, w2_ref[l], preferred_element_type=jnp.float32) + bm2_ref[l]

    # ---- final LN + head + sigmoid (head padded to 128 lanes for dense store) ----
    hf = _layer_norm(x, gf_ref[...], bf_ref[...])
    logits = jnp.dot(hf, wh_ref[...], preferred_element_type=jnp.float32) + bh_ref[...]
    o_ref[...] = jax.nn.sigmoid(logits)


# ---------------- pallas_call wrapper ----------------
def _full_spec(shape):
    nd = len(shape)
    return pl.BlockSpec(shape, lambda i, _nd=nd: (0,) * _nd)


def transformer_forward(x, params, consts):
    x2d = x.reshape(ROWS, INPUT_DIM)
    args = (
        x2d, params["we"], params["be"],
        params["g1"], params["b1"],
        params["wq"], params["bq"], params["wk"], params["bk"],
        params["wv"], params["bv"], params["wp"], params["bp"],
        params["g2"], params["b2"],
        params["w1"], params["bm1"], params["w2"], params["bm2"],
        params["gf"], params["bf"], params["wh"], params["bh"],
        consts["rope"], consts["omr"], consts["rot"], consts["bias"], consts["hmask"],
    )
    out = pl.pallas_call(
        fused_forward_kernel,
        out_shape=jax.ShapeDtypeStruct((ROWS, OUT_PAD), jnp.float32),
        grid=(1,),
        in_specs=[_full_spec(a.shape) for a in args],
        out_specs=_full_spec((ROWS, OUT_PAD)),
        compiler_params=pltpu.CompilerParams(dimension_semantics=("arbitrary",)),
    )(*args)
    return out[:, :OUTPUT_DIM].reshape(B, T, OUTPUT_DIM)


# ---------------- parameter / constant construction (host-side glue) ----------------
def _linear(key, fan_in, fan_out):
    kw, kb = jax.random.split(key)
    bound = 1.0 / math.sqrt(fan_in)
    w = jax.random.uniform(kw, (fan_in, fan_out), jnp.float32, -bound, bound)  # (in, out) = W.T
    b = jax.random.uniform(kb, (1, fan_out), jnp.float32, -bound, bound)
    return w, b


def init_block_params(key):
    k1, k2, k3, k4 = jax.random.split(key, 4)
    wqkv, bqkv = _linear(k1, EMBED_DIM, 3 * EMBED_DIM)   # fused PyTorch-layout weight (in, 3E)
    # PyTorch reshapes qkv output to (B,T,H,3D): fused column h*3D + j holds q_h (j<D),
    # k_h (D<=j<2D), v_h (2D<=j<3D).  Permute to head-contiguous q / k / v blocks.
    base = (jnp.repeat(jnp.arange(NUM_HEADS), HEAD_DIM) * 3 * HEAD_DIM
            + jnp.tile(jnp.arange(HEAD_DIM), NUM_HEADS))
    q_cols, k_cols, v_cols = base, base + HEAD_DIM, base + 2 * HEAD_DIM
    scale = 1.0 / math.sqrt(HEAD_DIM)                    # fold attention scale into Wq/bq
    wq, bq = wqkv[:, q_cols] * scale, bqkv[:, q_cols] * scale
    wk, bk = wqkv[:, k_cols], bqkv[:, k_cols]
    wv, bv = wqkv[:, v_cols], bqkv[:, v_cols]
    wp, bp = _linear(k2, EMBED_DIM, EMBED_DIM)
    w1, bm1 = _linear(k3, EMBED_DIM, HIDDEN_DIM)
    w2, bm2 = _linear(k4, HIDDEN_DIM, EMBED_DIM)
    ones = jnp.ones((1, EMBED_DIM), jnp.float32)
    zeros = jnp.zeros((1, EMBED_DIM), jnp.float32)
    return dict(g1=ones, b1=zeros, wq=wq, bq=bq, wk=wk, bk=bk, wv=wv, bv=bv,
                wp=wp, bp=bp, g2=ones, b2=zeros, w1=w1, bm1=bm1, w2=w2, bm2=bm2)


def init_params(key):
    keys = jax.random.split(key, 2 + NUM_LAYERS)
    ke, kh = keys[0], keys[1]
    we, be = _linear(ke, INPUT_DIM, EMBED_DIM)
    blocks = [init_block_params(k) for k in keys[2:]]
    stacked = {name: jnp.stack([blk[name] for blk in blocks]) for name in blocks[0]}
    gf = jnp.ones((1, EMBED_DIM), jnp.float32)
    bf = jnp.zeros((1, EMBED_DIM), jnp.float32)
    wh, bh = _linear(kh, EMBED_DIM, OUTPUT_DIM)
    # pad the head to 128 output lanes so the kernel's final store is unmasked/lane-dense
    wh_pad = jnp.zeros((EMBED_DIM, OUT_PAD), jnp.float32).at[:, :OUTPUT_DIM].set(wh)
    bh_pad = jnp.zeros((1, OUT_PAD), jnp.float32).at[:, :OUTPUT_DIM].set(bh)
    return dict(we=we, be=be, gf=gf, bf=bf, wh=wh_pad, bh=bh_pad, **stacked)


def make_consts():
    # per-head RoPE table (T, D): even cols = cos, odd cols = sin, tiled over heads & batch
    pos = jnp.arange(T, dtype=jnp.float32)
    denom = 10000.0 ** (jnp.arange(0, HEAD_DIM, 2, dtype=jnp.float32) / HEAD_DIM)
    angles = pos[:, None] / denom
    rope_head = jnp.zeros((T, HEAD_DIM), jnp.float32)
    rope_head = rope_head.at[:, 0::2].set(jnp.cos(angles))
    rope_head = rope_head.at[:, 1::2].set(jnp.sin(angles))
    rope = jnp.tile(rope_head, (B, NUM_HEADS))           # (B*T, E)
    omr = 1.0 - rope

    # rotate(x) == x @ rot : even cols = -x[odd], odd cols = x[even]  (heads are 8-wide,
    # even-aligned blocks, so the global pairwise pattern equals the per-head one)
    rot = jnp.zeros((EMBED_DIM, EMBED_DIM), jnp.float32)
    ev = jnp.arange(0, EMBED_DIM, 2)
    rot = rot.at[ev + 1, ev].set(-1.0)
    rot = rot.at[ev, ev + 1].set(1.0)

    # additive attention bias over batch-folded rows: 0 if same batch element & causal
    idx = jnp.arange(ROWS)
    bidx, tidx = idx // T, idx % T
    valid = (bidx[:, None] == bidx[None, :]) & (tidx[None, :] <= tidx[:, None])
    bias = jnp.where(valid, 0.0, NEG_INF).astype(jnp.float32)

    # per-head column selector masks over the embed dim, shape (H, 1, E)
    cols = jnp.arange(EMBED_DIM)
    hmask = (cols[None, :] // HEAD_DIM == jnp.arange(NUM_HEADS)[:, None]).astype(jnp.float32)
    hmask = hmask[:, None, :]

    return dict(rope=rope, omr=omr, rot=rot, bias=bias, hmask=hmask)


if __name__ == "__main__":
    key = jax.random.PRNGKey(0)
    kx, kp = jax.random.split(key)

    x = jax.random.normal(kx, (B, T, INPUT_DIM), jnp.float32)
    params = init_params(kp)
    consts = make_consts()

    out = transformer_forward(x, params, consts)
    out = jax.block_until_ready(out)

    assert out.shape == (B, T, OUTPUT_DIM)
    assert bool(jnp.all(jnp.isfinite(out)))
    print("KERNEL_OK")
</pallas_src>

<mosaic_0001>
module attributes {stable_mosaic.version = 11 : i64} {
  func.func @fused_forward_kernel(%arg0: i32, %arg1: memref<16x4xf32, #tpu.memory_space<vmem>>, %arg2: memref<4x32xf32, #tpu.memory_space<vmem>>, %arg3: memref<1x32xf32, #tpu.memory_space<vmem>>, %arg4: memref<2x1x32xf32, #tpu.memory_space<vmem>>, %arg5: memref<2x1x32xf32, #tpu.memory_space<vmem>>, %arg6: memref<2x32x32xf32, #tpu.memory_space<vmem>>, %arg7: memref<2x1x32xf32, #tpu.memory_space<vmem>>, %arg8: memref<2x32x32xf32, #tpu.memory_space<vmem>>, %arg9: memref<2x1x32xf32, #tpu.memory_space<vmem>>, %arg10: memref<2x32x32xf32, #tpu.memory_space<vmem>>, %arg11: memref<2x1x32xf32, #tpu.memory_space<vmem>>, %arg12: memref<2x32x32xf32, #tpu.memory_space<vmem>>, %arg13: memref<2x1x32xf32, #tpu.memory_space<vmem>>, %arg14: memref<2x1x32xf32, #tpu.memory_space<vmem>>, %arg15: memref<2x1x32xf32, #tpu.memory_space<vmem>>, %arg16: memref<2x32x128xf32, #tpu.memory_space<vmem>>, %arg17: memref<2x1x128xf32, #tpu.memory_space<vmem>>, %arg18: memref<2x128x32xf32, #tpu.memory_space<vmem>>, %arg19: memref<2x1x32xf32, #tpu.memory_space<vmem>>, %arg20: memref<1x32xf32, #tpu.memory_space<vmem>>, %arg21: memref<1x32xf32, #tpu.memory_space<vmem>>, %arg22: memref<32x128xf32, #tpu.memory_space<vmem>>, %arg23: memref<1x128xf32, #tpu.memory_space<vmem>>, %arg24: memref<16x32xf32, #tpu.memory_space<vmem>>, %arg25: memref<16x32xf32, #tpu.memory_space<vmem>>, %arg26: memref<32x32xf32, #tpu.memory_space<vmem>>, %arg27: memref<16x16xf32, #tpu.memory_space<vmem>>, %arg28: memref<4x1x32xf32, #tpu.memory_space<vmem>>, %arg29: memref<16x128xf32, #tpu.memory_space<vmem>>) attributes {dimension_semantics = [#tpu.dimension_semantics<arbitrary>], iteration_bounds = array<i64: 1>, scalar_prefetch = 0 : i64, scratch_operands = 0 : i64, tpu.core_type = #tpu.core_type<tc>, window_params = [{pipeline_mode = #tpu.pipeline_mode<synchronous>, transform_indices = @transform_0, window_bounds = array<i64: 16, 4>}, {pipeline_mode = #tpu.pipeline_mode<synchronous>, transform_indices = @transform_1, window_bounds = array<i64: 4, 32>}, {pipeline_mode = #tpu.pipeline_mode<synchronous>, transform_indices = @transform_2, window_bounds = array<i64: 1, 32>}, {pipeline_mode = #tpu.pipeline_mode<synchronous>, transform_indices = @transform_3, window_bounds = array<i64: 2, 1, 32>}, {pipeline_mode = #tpu.pipeline_mode<synchronous>, transform_indices = @transform_4, window_bounds = array<i64: 2, 1, 32>}, {pipeline_mode = #tpu.pipeline_mode<synchronous>, transform_indices = @transform_5, window_bounds = array<i64: 2, 32, 32>}, {pipeline_mode = #tpu.pipeline_mode<synchronous>, transform_indices = @transform_6, window_bounds = array<i64: 2, 1, 32>}, {pipeline_mode = #tpu.pipeline_mode<synchronous>, transform_indices = @transform_7, window_bounds = array<i64: 2, 32, 32>}, {pipeline_mode = #tpu.pipeline_mode<synchronous>, transform_indices = @transform_8, window_bounds = array<i64: 2, 1, 32>}, {pipeline_mode = #tpu.pipeline_mode<synchronous>, transform_indices = @transform_9, window_bounds = array<i64: 2, 32, 32>}, {pipeline_mode = #tpu.pipeline_mode<synchronous>, transform_indices = @transform_10, window_bounds = array<i64: 2, 1, 32>}, {pipeline_mode = #tpu.pipeline_mode<synchronous>, transform_indices = @transform_11, window_bounds = array<i64: 2, 32, 32>}, {pipeline_mode = #tpu.pipeline_mode<synchronous>, transform_indices = @transform_12, window_bounds = array<i64: 2, 1, 32>}, {pipeline_mode = #tpu.pipeline_mode<synchronous>, transform_indices = @transform_13, window_bounds = array<i64: 2, 1, 32>}, {pipeline_mode = #tpu.pipeline_mode<synchronous>, transform_indices = @transform_14, window_bounds = array<i64: 2, 1, 32>}, {pipeline_mode = #tpu.pipeline_mode<synchronous>, transform_indices = @transform_15, window_bounds = array<i64: 2, 32, 128>}, {pipeline_mode = #tpu.pipeline_mode<synchronous>, transform_indices = @transform_16, window_bounds = array<i64: 2, 1, 128>}, {pipeline_mode = #tpu.pipeline_mode<synchronous>, transform_indices = @transform_17, window_bounds = array<i64: 2, 128, 32>}, {pipeline_mode = #tpu.pipeline_mode<synchronous>, transform_indices = @transform_18, window_bounds = array<i64: 2, 1, 32>}, {pipeline_mode = #tpu.pipeline_mode<synchronous>, transform_indices = @transform_19, window_bounds = array<i64: 1, 32>}, {pipeline_mode = #tpu.pipeline_mode<synchronous>, transform_indices = @transform_20, window_bounds = array<i64: 1, 32>}, {pipeline_mode = #tpu.pipeline_mode<synchronous>, transform_indices = @transform_21, window_bounds = array<i64: 32, 128>}, {pipeline_mode = #tpu.pipeline_mode<synchronous>, transform_indices = @transform_22, window_bounds = array<i64: 1, 128>}, {pipeline_mode = #tpu.pipeline_mode<synchronous>, transform_indices = @transform_23, window_bounds = array<i64: 16, 32>}, {pipeline_mode = #tpu.pipeline_mode<synchronous>, transform_indices = @transform_24, window_bounds = array<i64: 16, 32>}, {pipeline_mode = #tpu.pipeline_mode<synchronous>, transform_indices = @transform_25, window_bounds = array<i64: 32, 32>}, {pipeline_mode = #tpu.pipeline_mode<synchronous>, transform_indices = @transform_26, window_bounds = array<i64: 16, 16>}, {pipeline_mode = #tpu.pipeline_mode<synchronous>, transform_indices = @transform_27, window_bounds = array<i64: 4, 1, 32>}, {pipeline_mode = #tpu.pipeline_mode<synchronous>, transform_indices = @transform_28, window_bounds = array<i64: 16, 128>}]} {
    %c0 = arith.constant 0 : index
    %c0_0 = arith.constant 0 : index
    %0 = vector.load %arg24[%c0, %c0_0] : memref<16x32xf32, #tpu.memory_space<vmem>>, vector<16x32xf32>
    %c0_1 = arith.constant 0 : index
    %c0_2 = arith.constant 0 : index
    %1 = vector.load %arg25[%c0_1, %c0_2] : memref<16x32xf32, #tpu.memory_space<vmem>>, vector<16x32xf32>
    %c0_3 = arith.constant 0 : index
    %c0_4 = arith.constant 0 : index
    %2 = vector.load %arg26[%c0_3, %c0_4] : memref<32x32xf32, #tpu.memory_space<vmem>>, vector<32x32xf32>
    %c0_5 = arith.constant 0 : index
    %c0_6 = arith.constant 0 : index
    %3 = vector.load %arg27[%c0_5, %c0_6] : memref<16x16xf32, #tpu.memory_space<vmem>>, vector<16x16xf32>
    %c0_7 = arith.constant 0 : index
    %c0_8 = arith.constant 0 : index
    %4 = vector.load %arg1[%c0_7, %c0_8] : memref<16x4xf32, #tpu.memory_space<vmem>>, vector<16x4xf32>
    %c0_9 = arith.constant 0 : index
    %c0_10 = arith.constant 0 : index
    %5 = vector.load %arg2[%c0_9, %c0_10] : memref<4x32xf32, #tpu.memory_space<vmem>>, vector<4x32xf32>
    %cst = arith.constant dense<0.000000e+00> : vector<16x32xf32>
    %6 = tpu.matmul %4, %5, %cst {dimension_numbers = #tpu.dot_dimension_numbers<[1], [0], [0], [1], [0, 0, 1, 1], [], []>} : vector<16x4xf32>, vector<4x32xf32>, vector<16x32xf32> -> vector<16x32xf32>
    %c0_11 = arith.constant 0 : index
    %c0_12 = arith.constant 0 : index
    %7 = vector.load %arg3[%c0_11, %c0_12] : memref<1x32xf32, #tpu.memory_space<vmem>>, vector<1x32xf32>
    %8 = vector.broadcast %7 : vector<1x32xf32> to vector<16x32xf32>
    %9 = arith.addf %6, %8 : vector<16x32xf32>
    %c0_13 = arith.constant 0 : index
    %c0_14 = arith.constant 0 : index
    %c0_15 = arith.constant 0 : index
    %10 = vector.load %arg4[%c0_13, %c0_14, %c0_15] : memref<2x1x32xf32, #tpu.memory_space<vmem>>, vector<1x1x32xf32>
    %11 = vector.shape_cast %10 : vector<1x1x32xf32> to vector<1x32xf32>
    %c0_16 = arith.constant 0 : index
    %c0_17 = arith.constant 0 : index
    %c0_18 = arith.constant 0 : index
    %12 = vector.load %arg5[%c0_16, %c0_17, %c0_18] : memref<2x1x32xf32, #tpu.memory_space<vmem>>, vector<1x1x32xf32>
    %13 = vector.shape_cast %12 : vector<1x1x32xf32> to vector<1x32xf32>
    %cst_19 = arith.constant dense<0.000000e+00> : vector<16xf32>
    %14 = vector.multi_reduction <add>, %9, %cst_19 [1] : vector<16x32xf32> to vector<16xf32>
    %15 = vector.shape_cast %14 : vector<16xf32> to vector<16x1xf32>
    %cst_20 = arith.constant 3.200000e+01 : f32
    %16 = vector.broadcast %cst_20 : f32 to vector<16x1xf32>
    %17 = arith.divf %15, %16 : vector<16x1xf32>
    %18 = arith.mulf %9, %9 : vector<16x32xf32>
    %cst_21 = arith.constant dense<0.000000e+00> : vector<16xf32>
    %19 = vector.multi_reduction <add>, %18, %cst_21 [1] : vector<16x32xf32> to vector<16xf32>
    %20 = vector.shape_cast %19 : vector<16xf32> to vector<16x1xf32>
    %cst_22 = arith.constant 3.200000e+01 : f32
    %21 = vector.broadcast %cst_22 : f32 to vector<16x1xf32>
    %22 = arith.divf %20, %21 : vector<16x1xf32>
    %23 = arith.mulf %17, %17 : vector<16x1xf32>
    %24 = arith.subf %22, %23 : vector<16x1xf32>
    %25 = vector.broadcast %17 : vector<16x1xf32> to vector<16x32xf32>
    %26 = arith.subf %9, %25 : vector<16x32xf32>
    %cst_23 = arith.constant 9.99999974E-6 : f32
    %27 = vector.broadcast %cst_23 : f32 to vector<16x1xf32>
    %28 = arith.addf %24, %27 : vector<16x1xf32>
    %29 = math.rsqrt %28 : vector<16x1xf32>
    %30 = vector.broadcast %29 : vector<16x1xf32> to vector<16x32xf32>
    %31 = arith.mulf %26, %30 : vector<16x32xf32>
    %32 = vector.broadcast %11 : vector<1x32xf32> to vector<16x32xf32>
    %33 = arith.mulf %31, %32 : vector<16x32xf32>
    %34 = vector.broadcast %13 : vector<1x32xf32> to vector<16x32xf32>
    %35 = arith.addf %33, %34 : vector<16x32xf32>
    %c0_24 = arith.constant 0 : index
    %c0_25 = arith.constant 0 : index
    %c0_26 = arith.constant 0 : index
    %36 = vector.load %arg6[%c0_24, %c0_25, %c0_26] : memref<2x32x32xf32, #tpu.memory_space<vmem>>, vector<1x32x32xf32>
    %37 = vector.shape_cast %36 : vector<1x32x32xf32> to vector<32x32xf32>
    %cst_27 = arith.constant dense<0.000000e+00> : vector<16x32xf32>
    %38 = tpu.matmul %35, %37, %cst_27 {dimension_numbers = #tpu.dot_dimension_numbers<[1], [0], [0], [1], [0, 0, 1, 1], [], []>} : vector<16x32xf32>, vector<32x32xf32>, vector<16x32xf32> -> vector<16x32xf32>
    %c0_28 = arith.constant 0 : index
    %c0_29 = arith.constant 0 : index
    %c0_30 = arith.constant 0 : index
    %39 = vector.load %arg7[%c0_28, %c0_29, %c0_30] : memref<2x1x32xf32, #tpu.memory_space<vmem>>, vector<1x1x32xf32>
    %40 = vector.shape_cast %39 : vector<1x1x32xf32> to vector<1x32xf32>
    %41 = vector.broadcast %40 : vector<1x32xf32> to vector<16x32xf32>
    %42 = arith.addf %38, %41 : vector<16x32xf32>
    %c0_31 = arith.constant 0 : index
    %c0_32 = arith.constant 0 : index
    %c0_33 = arith.constant 0 : index
    %43 = vector.load %arg8[%c0_31, %c0_32, %c0_33] : memref<2x32x32xf32, #tpu.memory_space<vmem>>, vector<1x32x32xf32>
    %44 = vector.shape_cast %43 : vector<1x32x32xf32> to vector<32x32xf32>
    %cst_34 = arith.constant dense<0.000000e+00> : vector<16x32xf32>
    %45 = tpu.matmul %35, %44, %cst_34 {dimension_numbers = #tpu.dot_dimension_numbers<[1], [0], [0], [1], [0, 0, 1, 1], [], []>} : vector<16x32xf32>, vector<32x32xf32>, vector<16x32xf32> -> vector<16x32xf32>
    %c0_35 = arith.constant 0 : index
    %c0_36 = arith.constant 0 : index
    %c0_37 = arith.constant 0 : index
    %46 = vector.load %arg9[%c0_35, %c0_36, %c0_37] : memref<2x1x32xf32, #tpu.memory_space<vmem>>, vector<1x1x32xf32>
    %47 = vector.shape_cast %46 : vector<1x1x32xf32> to vector<1x32xf32>
    %48 = vector.broadcast %47 : vector<1x32xf32> to vector<16x32xf32>
    %49 = arith.addf %45, %48 : vector<16x32xf32>
    %c0_38 = arith.constant 0 : index
    %c0_39 = arith.constant 0 : index
    %c0_40 = arith.constant 0 : index
    %50 = vector.load %arg10[%c0_38, %c0_39, %c0_40] : memref<2x32x32xf32, #tpu.memory_space<vmem>>, vector<1x32x32xf32>
    %51 = vector.shape_cast %50 : vector<1x32x32xf32> to vector<32x32xf32>
    %cst_41 = arith.constant dense<0.000000e+00> : vector<16x32xf32>
    %52 = tpu.matmul %35, %51, %cst_41 {dimension_numbers = #tpu.dot_dimension_numbers<[1], [0], [0], [1], [0, 0, 1, 1], [], []>} : vector<16x32xf32>, vector<32x32xf32>, vector<16x32xf32> -> vector<16x32xf32>
    %c0_42 = arith.constant 0 : index
    %c0_43 = arith.constant 0 : index
    %c0_44 = arith.constant 0 : index
    %53 = vector.load %arg11[%c0_42, %c0_43, %c0_44] : memref<2x1x32xf32, #tpu.memory_space<vmem>>, vector<1x1x32xf32>
    %54 = vector.shape_cast %53 : vector<1x1x32xf32> to vector<1x32xf32>
    %55 = vector.broadcast %54 : vector<1x32xf32> to vector<16x32xf32>
    %56 = arith.addf %52, %55 : vector<16x32xf32>
    %57 = arith.mulf %42, %0 : vector<16x32xf32>
    %cst_45 = arith.constant dense<0.000000e+00> : vector<16x32xf32>
    %58 = tpu.matmul %42, %2, %cst_45 {dimension_numbers = #tpu.dot_dimension_numbers<[1], [0], [0], [1], [0, 0, 1, 1], [], []>} : vector<16x32xf32>, vector<32x32xf32>, vector<16x32xf32> -> vector<16x32xf32>
    %59 = arith.mulf %58, %1 : vector<16x32xf32>
    %60 = arith.addf %57, %59 : vector<16x32xf32>
    %61 = arith.mulf %49, %0 : vector<16x32xf32>
    %cst_46 = arith.constant dense<0.000000e+00> : vector<16x32xf32>
    %62 = tpu.matmul %49, %2, %cst_46 {dimension_numbers = #tpu.dot_dimension_numbers<[1], [0], [0], [1], [0, 0, 1, 1], [], []>} : vector<16x32xf32>, vector<32x32xf32>, vector<16x32xf32> -> vector<16x32xf32>
    %63 = arith.mulf %62, %1 : vector<16x32xf32>
    %64 = arith.addf %61, %63 : vector<16x32xf32>
    %c0_47 = arith.constant 0 : index
    %c0_48 = arith.constant 0 : index
    %c0_49 = arith.constant 0 : index
    %65 = vector.load %arg28[%c0_47, %c0_48, %c0_49] : memref<4x1x32xf32, #tpu.memory_space<vmem>>, vector<1x1x32xf32>
    %66 = vector.shape_cast %65 : vector<1x1x32xf32> to vector<1x32xf32>
    %67 = vector.broadcast %66 : vector<1x32xf32> to vector<16x32xf32>
    %68 = arith.mulf %64, %67 : vector<16x32xf32>
    %69 = vector.broadcast %66 : vector<1x32xf32> to vector<16x32xf32>
    %70 = arith.mulf %56, %69 : vector<16x32xf32>
    %cst_50 = arith.constant dense<0.000000e+00> : vector<16x16xf32>
    %71 = tpu.matmul %60, %68, %cst_50 {dimension_numbers = #tpu.dot_dimension_numbers<[1], [1], [0], [0], [0, 0, 1, 0], [], []>} : vector<16x32xf32>, vector<16x32xf32>, vector<16x16xf32> -> vector<16x16xf32>
    %72 = arith.addf %71, %3 : vector<16x16xf32>
    %cst_51 = arith.constant dense<0xFF800000> : vector<16xf32>
    %73 = vector.multi_reduction <maximumf>, %72, %cst_51 [1] : vector<16x16xf32> to vector<16xf32>
    %74 = vector.shape_cast %73 : vector<16xf32> to vector<16x1xf32>
    %75 = vector.broadcast %74 : vector<16x1xf32> to vector<16x16xf32>
    %76 = arith.subf %72, %75 : vector<16x16xf32>
    %77 = math.exp %76 : vector<16x16xf32>
    %cst_52 = arith.constant dense<0.000000e+00> : vector<16xf32>
    %78 = vector.multi_reduction <add>, %77, %cst_52 [1] : vector<16x16xf32> to vector<16xf32>
    %79 = vector.shape_cast %78 : vector<16xf32> to vector<16x1xf32>
    %cst_53 = arith.constant dense<0.000000e+00> : vector<16x32xf32>
    %80 = tpu.matmul %77, %70, %cst_53 {dimension_numbers = #tpu.dot_dimension_numbers<[1], [0], [0], [1], [0, 0, 1, 1], [], []>} : vector<16x16xf32>, vector<16x32xf32>, vector<16x32xf32> -> vector<16x32xf32>
    %81 = tpu.reciprocal %79 {approx = true} : vector<16x1xf32> -> vector<16x1xf32>
    %82 = vector.broadcast %81 : vector<16x1xf32> to vector<16x32xf32>
    %83 = arith.mulf %80, %82 : vector<16x32xf32>
    %c1 = arith.constant 1 : index
    %c0_54 = arith.constant 0 : index
    %c0_55 = arith.constant 0 : index
    %84 = vector.load %arg28[%c1, %c0_54, %c0_55] : memref<4x1x32xf32, #tpu.memory_space<vmem>>, vector<1x1x32xf32>
    %85 = vector.shape_cast %84 : vector<1x1x32xf32> to vector<1x32xf32>
    %86 = vector.broadcast %85 : vector<1x32xf32> to vector<16x32xf32>
    %87 = arith.mulf %64, %86 : vector<16x32xf32>
    %88 = vector.broadcast %85 : vector<1x32xf32> to vector<16x32xf32>
    %89 = arith.mulf %56, %88 : vector<16x32xf32>
    %cst_56 = arith.constant dense<0.000000e+00> : vector<16x16xf32>
    %90 = tpu.matmul %60, %87, %cst_56 {dimension_numbers = #tpu.dot_dimension_numbers<[1], [1], [0], [0], [0, 0, 1, 0], [], []>} : vector<16x32xf32>, vector<16x32xf32>, vector<16x16xf32> -> vector<16x16xf32>
    %91 = arith.addf %90, %3 : vector<16x16xf32>
    %cst_57 = arith.constant dense<0xFF800000> : vector<16xf32>
    %92 = vector.multi_reduction <maximumf>, %91, %cst_57 [1] : vector<16x16xf32> to vector<16xf32>
    %93 = vector.shape_cast %92 : vector<16xf32> to vector<16x1xf32>
    %94 = vector.broadcast %93 : vector<16x1xf32> to vector<16x16xf32>
    %95 = arith.subf %91, %94 : vector<16x16xf32>
    %96 = math.exp %95 : vector<16x16xf32>
    %cst_58 = arith.constant dense<0.000000e+00> : vector<16xf32>
    %97 = vector.multi_reduction <add>, %96, %cst_58 [1] : vector<16x16xf32> to vector<16xf32>
    %98 = vector.shape_cast %97 : vector<16xf32> to vector<16x1xf32>
    %cst_59 = arith.constant dense<0.000000e+00> : vector<16x32xf32>
    %99 = tpu.matmul %96, %89, %cst_59 {dimension_numbers = #tpu.dot_dimension_numbers<[1], [0], [0], [1], [0, 0, 1, 1], [], []>} : vector<16x16xf32>, vector<16x32xf32>, vector<16x32xf32> -> vector<16x32xf32>
    %100 = tpu.reciprocal %98 {approx = true} : vector<16x1xf32> -> vector<16x1xf32>
    %101 = vector.broadcast %100 : vector<16x1xf32> to vector<16x32xf32>
    %102 = arith.mulf %99, %101 : vector<16x32xf32>
    %103 = arith.addf %83, %102 : vector<16x32xf32>
    %c2 = arith.constant 2 : index
    %c0_60 = arith.constant 0 : index
    %c0_61 = arith.constant 0 : index
    %104 = vector.load %arg28[%c2, %c0_60, %c0_61] : memref<4x1x32xf32, #tpu.memory_space<vmem>>, vector<1x1x32xf32>
    %105 = vector.shape_cast %104 : vector<1x1x32xf32> to vector<1x32xf32>
    %106 = vector.broadcast %105 : vector<1x32xf32> to vector<16x32xf32>
    %107 = arith.mulf %64, %106 : vector<16x32xf32>
    %108 = vector.broadcast %105 : vector<1x32xf32> to vector<16x32xf32>
    %109 = arith.mulf %56, %108 : vector<16x32xf32>
    %cst_62 = arith.constant dense<0.000000e+00> : vector<16x16xf32>
    %110 = tpu.matmul %60, %107, %cst_62 {dimension_numbers = #tpu.dot_dimension_numbers<[1], [1], [0], [0], [0, 0, 1, 0], [], []>} : vector<16x32xf32>, vector<16x32xf32>, vector<16x16xf32> -> vector<16x16xf32>
    %111 = arith.addf %110, %3 : vector<16x16xf32>
    %cst_63 = arith.constant dense<0xFF800000> : vector<16xf32>
    %112 = vector.multi_reduction <maximumf>, %111, %cst_63 [1] : vector<16x16xf32> to vector<16xf32>
    %113 = vector.shape_cast %112 : vector<16xf32> to vector<16x1xf32>
    %114 = vector.broadcast %113 : vector<16x1xf32> to vector<16x16xf32>
    %115 = arith.subf %111, %114 : vector<16x16xf32>
    %116 = math.exp %115 : vector<16x16xf32>
    %cst_64 = arith.constant dense<0.000000e+00> : vector<16xf32>
    %117 = vector.multi_reduction <add>, %116, %cst_64 [1] : vector<16x16xf32> to vector<16xf32>
    %118 = vector.shape_cast %117 : vector<16xf32> to vector<16x1xf32>
    %cst_65 = arith.constant dense<0.000000e+00> : vector<16x32xf32>
    %119 = tpu.matmul %116, %109, %cst_65 {dimension_numbers = #tpu.dot_dimension_numbers<[1], [0], [0], [1], [0, 0, 1, 1], [], []>} : vector<16x16xf32>, vector<16x32xf32>, vector<16x32xf32> -> vector<16x32xf32>
    %120 = tpu.reciprocal %118 {approx = true} : vector<16x1xf32> -> vector<16x1xf32>
    %121 = vector.broadcast %120 : vector<16x1xf32> to vector<16x32xf32>
    %122 = arith.mulf %119, %121 : vector<16x32xf32>
    %123 = arith.addf %103, %122 : vector<16x32xf32>
    %c3 = arith.constant 3 : index
    %c0_66 = arith.constant 0 : index
    %c0_67 = arith.constant 0 : index
    %124 = vector.load %arg28[%c3, %c0_66, %c0_67] : memref<4x1x32xf32, #tpu.memory_space<vmem>>, vector<1x1x32xf32>
    %125 = vector.shape_cast %124 : vector<1x1x32xf32> to vector<1x32xf32>
    %126 = vector.broadcast %125 : vector<1x32xf32> to vector<16x32xf32>
    %127 = arith.mulf %64, %126 : vector<16x32xf32>
    %128 = vector.broadcast %125 : vector<1x32xf32> to vector<16x32xf32>
    %129 = arith.mulf %56, %128 : vector<16x32xf32>
    %cst_68 = arith.constant dense<0.000000e+00> : vector<16x16xf32>
    %130 = tpu.matmul %60, %127, %cst_68 {dimension_numbers = #tpu.dot_dimension_numbers<[1], [1], [0], [0], [0, 0, 1, 0], [], []>} : vector<16x32xf32>, vector<16x32xf32>, vector<16x16xf32> -> vector<16x16xf32>
    %131 = arith.addf %130, %3 : vector<16x16xf32>
    %cst_69 = arith.constant dense<0xFF800000> : vector<16xf32>
    %132 = vector.multi_reduction <maximumf>, %131, %cst_69 [1] : vector<16x16xf32> to vector<16xf32>
    %133 = vector.shape_cast %132 : vector<16xf32> to vector<16x1xf32>
    %134 = vector.broadcast %133 : vector<16x1xf32> to vector<16x16xf32>
    %135 = arith.subf %131, %134 : vector<16x16xf32>
    %136 = math.exp %135 : vector<16x16xf32>
    %cst_70 = arith.constant dense<0.000000e+00> : vector<16xf32>
    %137 = vector.multi_reduction <add>, %136, %cst_70 [1] : vector<16x16xf32> to vector<16xf32>
    %138 = vector.shape_cast %137 : vector<16xf32> to vector<16x1xf32>
    %cst_71 = arith.constant dense<0.000000e+00> : vector<16x32xf32>
    %139 = tpu.matmul %136, %129, %cst_71 {dimension_numbers = #tpu.dot_dimension_numbers<[1], [0], [0], [1], [0, 0, 1, 1], [], []>} : vector<16x16xf32>, vector<16x32xf32>, vector<16x32xf32> -> vector<16x32xf32>
    %140 = tpu.reciprocal %138 {approx = true} : vector<16x1xf32> -> vector<16x1xf32>
    %141 = vector.broadcast %140 : vector<16x1xf32> to vector<16x32xf32>
    %142 = arith.mulf %139, %141 : vector<16x32xf32>
    %143 = arith.addf %123, %142 : vector<16x32xf32>
    %c0_72 = arith.constant 0 : index
    %c0_73 = arith.constant 0 : index
    %c0_74 = arith.constant 0 : index
    %144 = vector.load %arg12[%c0_72, %c0_73, %c0_74] : memref<2x32x32xf32, #tpu.memory_space<vmem>>, vector<1x32x32xf32>
    %145 = vector.shape_cast %144 : vector<1x32x32xf32> to vector<32x32xf32>
    %cst_75 = arith.constant dense<0.000000e+00> : vector<16x32xf32>
    %146 = tpu.matmul %143, %145, %cst_75 {dimension_numbers = #tpu.dot_dimension_numbers<[1], [0], [0], [1], [0, 0, 1, 1], [], []>} : vector<16x32xf32>, vector<32x32xf32>, vector<16x32xf32> -> vector<16x32xf32>
    %c0_76 = arith.constant 0 : index
    %c0_77 = arith.constant 0 : index
    %c0_78 = arith.constant 0 : index
    %147 = vector.load %arg13[%c0_76, %c0_77, %c0_78] : memref<2x1x32xf32, #tpu.memory_space<vmem>>, vector<1x1x32xf32>
    %148 = vector.shape_cast %147 : vector<1x1x32xf32> to vector<1x32xf32>
    %149 = vector.broadcast %148 : vector<1x32xf32> to vector<16x32xf32>
    %150 = arith.addf %146, %149 : vector<16x32xf32>
    %151 = arith.addf %9, %150 : vector<16x32xf32>
    %c0_79 = arith.constant 0 : index
    %c0_80 = arith.constant 0 : index
    %c0_81 = arith.constant 0 : index
    %152 = vector.load %arg14[%c0_79, %c0_80, %c0_81] : memref<2x1x32xf32, #tpu.memory_space<vmem>>, vector<1x1x32xf32>
    %153 = vector.shape_cast %152 : vector<1x1x32xf32> to vector<1x32xf32>
    %c0_82 = arith.constant 0 : index
    %c0_83 = arith.constant 0 : index
    %c0_84 = arith.constant 0 : index
    %154 = vector.load %arg15[%c0_82, %c0_83, %c0_84] : memref<2x1x32xf32, #tpu.memory_space<vmem>>, vector<1x1x32xf32>
    %155 = vector.shape_cast %154 : vector<1x1x32xf32> to vector<1x32xf32>
    %cst_85 = arith.constant dense<0.000000e+00> : vector<16xf32>
    %156 = vector.multi_reduction <add>, %151, %cst_85 [1] : vector<16x32xf32> to vector<16xf32>
    %157 = vector.shape_cast %156 : vector<16xf32> to vector<16x1xf32>
    %cst_86 = arith.constant 3.200000e+01 : f32
    %158 = vector.broadcast %cst_86 : f32 to vector<16x1xf32>
    %159 = arith.divf %157, %158 : vector<16x1xf32>
    %160 = arith.mulf %151, %151 : vector<16x32xf32>
    %cst_87 = arith.constant dense<0.000000e+00> : vector<16xf32>
    %161 = vector.multi_reduction <add>, %160, %cst_87 [1] : vector<16x32xf32> to vector<16xf32>
    %162 = vector.shape_cast %161 : vector<16xf32> to vector<16x1xf32>
    %cst_88 = arith.constant 3.200000e+01 : f32
    %163 = vector.broadcast %cst_88 : f32 to vector<16x1xf32>
    %164 = arith.divf %162, %163 : vector<16x1xf32>
    %165 = arith.mulf %159, %159 : vector<16x1xf32>
    %166 = arith.subf %164, %165 : vector<16x1xf32>
    %167 = vector.broadcast %159 : vector<16x1xf32> to vector<16x32xf32>
    %168 = arith.subf %151, %167 : vector<16x32xf32>
    %cst_89 = arith.constant 9.99999974E-6 : f32
    %169 = vector.broadcast %cst_89 : f32 to vector<16x1xf32>
    %170 = arith.addf %166, %169 : vector<16x1xf32>
    %171 = math.rsqrt %170 : vector<16x1xf32>
    %172 = vector.broadcast %171 : vector<16x1xf32> to vector<16x32xf32>
    %173 = arith.mulf %168, %172 : vector<16x32xf32>
    %174 = vector.broadcast %153 : vector<1x32xf32> to vector<16x32xf32>
    %175 = arith.mulf %173, %174 : vector<16x32xf32>
    %176 = vector.broadcast %155 : vector<1x32xf32> to vector<16x32xf32>
    %177 = arith.addf %175, %176 : vector<16x32xf32>
    %c0_90 = arith.constant 0 : index
    %c0_91 = arith.constant 0 : index
    %c0_92 = arith.constant 0 : index
    %178 = vector.load %arg16[%c0_90, %c0_91, %c0_92] : memref<2x32x128xf32, #tpu.memory_space<vmem>>, vector<1x32x128xf32>
    %179 = vector.shape_cast %178 : vector<1x32x128xf32> to vector<32x128xf32>
    %cst_93 = arith.constant dense<0.000000e+00> : vector<16x128xf32>
    %180 = tpu.matmul %177, %179, %cst_93 {dimension_numbers = #tpu.dot_dimension_numbers<[1], [0], [0], [1], [0, 0, 1, 1], [], []>} : vector<16x32xf32>, vector<32x128xf32>, vector<16x128xf32> -> vector<16x128xf32>
    %c0_94 = arith.constant 0 : index
    %c0_95 = arith.constant 0 : index
    %c0_96 = arith.constant 0 : index
    %181 = vector.load %arg17[%c0_94, %c0_95, %c0_96] : memref<2x1x128xf32, #tpu.memory_space<vmem>>, vector<1x1x128xf32>
    %182 = vector.shape_cast %181 : vector<1x1x128xf32> to vector<1x128xf32>
    %183 = vector.broadcast %182 : vector<1x128xf32> to vector<16x128xf32>
    %184 = arith.addf %180, %183 : vector<16x128xf32>
    %cst_97 = arith.constant 5.000000e-01 : f32
    %185 = vector.broadcast %cst_97 : f32 to vector<16x128xf32>
    %186 = arith.mulf %185, %184 : vector<16x128xf32>
    %cst_98 = arith.constant 0.707106769 : f32
    %187 = vector.broadcast %cst_98 : f32 to vector<16x128xf32>
    %188 = arith.mulf %184, %187 : vector<16x128xf32>
    %189 = math.erf %188 : vector<16x128xf32>
    %cst_99 = arith.constant 1.000000e+00 : f32
    %190 = vector.broadcast %cst_99 : f32 to vector<16x128xf32>
    %191 = arith.addf %190, %189 : vector<16x128xf32>
    %192 = arith.mulf %186, %191 : vector<16x128xf32>
    %c0_100 = arith.constant 0 : index
    %c0_101 = arith.constant 0 : index
    %c0_102 = arith.constant 0 : index
    %193 = vector.load %arg18[%c0_100, %c0_101, %c0_102] : memref<2x128x32xf32, #tpu.memory_space<vmem>>, vector<1x128x32xf32>
    %194 = vector.shape_cast %193 : vector<1x128x32xf32> to vector<128x32xf32>
    %cst_103 = arith.constant dense<0.000000e+00> : vector<16x32xf32>
    %195 = tpu.matmul %192, %194, %cst_103 {dimension_numbers = #tpu.dot_dimension_numbers<[1], [0], [0], [1], [0, 0, 1, 1], [], []>} : vector<16x128xf32>, vector<128x32xf32>, vector<16x32xf32> -> vector<16x32xf32>
    %196 = arith.addf %151, %195 : vector<16x32xf32>
    %c0_104 = arith.constant 0 : index
    %c0_105 = arith.constant 0 : index
    %c0_106 = arith.constant 0 : index
    %197 = vector.load %arg19[%c0_104, %c0_105, %c0_106] : memref<2x1x32xf32, #tpu.memory_space<vmem>>, vector<1x1x32xf32>
    %198 = vector.shape_cast %197 : vector<1x1x32xf32> to vector<1x32xf32>
    %199 = vector.broadcast %198 : vector<1x32xf32> to vector<16x32xf32>
    %200 = arith.addf %196, %199 : vector<16x32xf32>
    %c1_107 = arith.constant 1 : index
    %c0_108 = arith.constant 0 : index
    %c0_109 = arith.constant 0 : index
    %201 = vector.load %arg4[%c1_107, %c0_108, %c0_109] : memref<2x1x32xf32, #tpu.memory_space<vmem>>, vector<1x1x32xf32>
    %202 = vector.shape_cast %201 : vector<1x1x32xf32> to vector<1x32xf32>
    %c1_110 = arith.constant 1 : index
    %c0_111 = arith.constant 0 : index
    %c0_112 = arith.constant 0 : index
    %203 = vector.load %arg5[%c1_110, %c0_111, %c0_112] : memref<2x1x32xf32, #tpu.memory_space<vmem>>, vector<1x1x32xf32>
    %204 = vector.shape_cast %203 : vector<1x1x32xf32> to vector<1x32xf32>
    %cst_113 = arith.constant dense<0.000000e+00> : vector<16xf32>
    %205 = vector.multi_reduction <add>, %200, %cst_113 [1] : vector<16x32xf32> to vector<16xf32>
    %206 = vector.shape_cast %205 : vector<16xf32> to vector<16x1xf32>
    %cst_114 = arith.constant 3.200000e+01 : f32
    %207 = vector.broadcast %cst_114 : f32 to vector<16x1xf32>
    %208 = arith.divf %206, %207 : vector<16x1xf32>
    %209 = arith.mulf %200, %200 : vector<16x32xf32>
    %cst_115 = arith.constant dense<0.000000e+00> : vector<16xf32>
    %210 = vector.multi_reduction <add>, %209, %cst_115 [1] : vector<16x32xf32> to vector<16xf32>
    %211 = vector.shape_cast %210 : vector<16xf32> to vector<16x1xf32>
    %cst_116 = arith.constant 3.200000e+01 : f32
    %212 = vector.broadcast %cst_116 : f32 to vector<16x1xf32>
    %213 = arith.divf %211, %212 : vector<16x1xf32>
    %214 = arith.mulf %208, %208 : vector<16x1xf32>
    %215 = arith.subf %213, %214 : vector<16x1xf32>
    %216 = vector.broadcast %208 : vector<16x1xf32> to vector<16x32xf32>
    %217 = arith.subf %200, %216 : vector<16x32xf32>
    %cst_117 = arith.constant 9.99999974E-6 : f32
    %218 = vector.broadcast %cst_117 : f32 to vector<16x1xf32>
    %219 = arith.addf %215, %218 : vector<16x1xf32>
    %220 = math.rsqrt %219 : vector<16x1xf32>
    %221 = vector.broadcast %220 : vector<16x1xf32> to vector<16x32xf32>
    %222 = arith.mulf %217, %221 : vector<16x32xf32>
    %223 = vector.broadcast %202 : vector<1x32xf32> to vector<16x32xf32>
    %224 = arith.mulf %222, %223 : vector<16x32xf32>
    %225 = vector.broadcast %204 : vector<1x32xf32> to vector<16x32xf32>
    %226 = arith.addf %224, %225 : vector<16x32xf32>
    %c1_118 = arith.constant 1 : index
    %c0_119 = arith.constant 0 : index
    %c0_120 = arith.constant 0 : index
    %227 = vector.load %arg6[%c1_118, %c0_119, %c0_120] : memref<2x32x32xf32, #tpu.memory_space<vmem>>, vector<1x32x32xf32>
    %228 = vector.shape_cast %227 : vector<1x32x32xf32> to vector<32x32xf32>
    %cst_121 = arith.constant dense<0.000000e+00> : vector<16x32xf32>
    %229 = tpu.matmul %226, %228, %cst_121 {dimension_numbers = #tpu.dot_dimension_numbers<[1], [0], [0], [1], [0, 0, 1, 1], [], []>} : vector<16x32xf32>, vector<32x32xf32>, vector<16x32xf32> -> vector<16x32xf32>
    %c1_122 = arith.constant 1 : index
    %c0_123 = arith.constant 0 : index
    %c0_124 = arith.constant 0 : index
    %230 = vector.load %arg7[%c1_122, %c0_123, %c0_124] : memref<2x1x32xf32, #tpu.memory_space<vmem>>, vector<1x1x32xf32>
    %231 = vector.shape_cast %230 : vector<1x1x32xf32> to vector<1x32xf32>
    %232 = vector.broadcast %231 : vector<1x32xf32> to vector<16x32xf32>
    %233 = arith.addf %229, %232 : vector<16x32xf32>
    %c1_125 = arith.constant 1 : index
    %c0_126 = arith.constant 0 : index
    %c0_127 = arith.constant 0 : index
    %234 = vector.load %arg8[%c1_125, %c0_126, %c0_127] : memref<2x32x32xf32, #tpu.memory_space<vmem>>, vector<1x32x32xf32>
    %235 = vector.shape_cast %234 : vector<1x32x32xf32> to vector<32x32xf32>
    %cst_128 = arith.constant dense<0.000000e+00> : vector<16x32xf32>
    %236 = tpu.matmul %226, %235, %cst_128 {dimension_numbers = #tpu.dot_dimension_numbers<[1], [0], [0], [1], [0, 0, 1, 1], [], []>} : vector<16x32xf32>, vector<32x32xf32>, vector<16x32xf32> -> vector<16x32xf32>
    %c1_129 = arith.constant 1 : index
    %c0_130 = arith.constant 0 : index
    %c0_131 = arith.constant 0 : index
    %237 = vector.load %arg9[%c1_129, %c0_130, %c0_131] : memref<2x1x32xf32, #tpu.memory_space<vmem>>, vector<1x1x32xf32>
    %238 = vector.shape_cast %237 : vector<1x1x32xf32> to vector<1x32xf32>
    %239 = vector.broadcast %238 : vector<1x32xf32> to vector<16x32xf32>
    %240 = arith.addf %236, %239 : vector<16x32xf32>
    %c1_132 = arith.constant 1 : index
    %c0_133 = arith.constant 0 : index
    %c0_134 = arith.constant 0 : index
    %241 = vector.load %arg10[%c1_132, %c0_133, %c0_134] : memref<2x32x32xf32, #tpu.memory_space<vmem>>, vector<1x32x32xf32>
    %242 = vector.shape_cast %241 : vector<1x32x32xf32> to vector<32x32xf32>
    %cst_135 = arith.constant dense<0.000000e+00> : vector<16x32xf32>
    %243 = tpu.matmul %226, %242, %cst_135 {dimension_numbers = #tpu.dot_dimension_numbers<[1], [0], [0], [1], [0, 0, 1, 1], [], []>} : vector<16x32xf32>, vector<32x32xf32>, vector<16x32xf32> -> vector<16x32xf32>
    %c1_136 = arith.constant 1 : index
    %c0_137 = arith.constant 0 : index
    %c0_138 = arith.constant 0 : index
    %244 = vector.load %arg11[%c1_136, %c0_137, %c0_138] : memref<2x1x32xf32, #tpu.memory_space<vmem>>, vector<1x1x32xf32>
    %245 = vector.shape_cast %244 : vector<1x1x32xf32> to vector<1x32xf32>
    %246 = vector.broadcast %245 : vector<1x32xf32> to vector<16x32xf32>
    %247 = arith.addf %243, %246 : vector<16x32xf32>
    %248 = arith.mulf %233, %0 : vector<16x32xf32>
    %cst_139 = arith.constant dense<0.000000e+00> : vector<16x32xf32>
    %249 = tpu.matmul %233, %2, %cst_139 {dimension_numbers = #tpu.dot_dimension_numbers<[1], [0], [0], [1], [0, 0, 1, 1], [], []>} : vector<16x32xf32>, vector<32x32xf32>, vector<16x32xf32> -> vector<16x32xf32>
    %250 = arith.mulf %249, %1 : vector<16x32xf32>
    %251 = arith.addf %248, %250 : vector<16x32xf32>
    %252 = arith.mulf %240, %0 : vector<16x32xf32>
    %cst_140 = arith.constant dense<0.000000e+00> : vector<16x32xf32>
    %253 = tpu.matmul %240, %2, %cst_140 {dimension_numbers = #tpu.dot_dimension_numbers<[1], [0], [0], [1], [0, 0, 1, 1], [], []>} : vector<16x32xf32>, vector<32x32xf32>, vector<16x32xf32> -> vector<16x32xf32>
    %254 = arith.mulf %253, %1 : vector<16x32xf32>
    %255 = arith.addf %252, %254 : vector<16x32xf32>
    %c0_141 = arith.constant 0 : index
    %c0_142 = arith.constant 0 : index
    %c0_143 = arith.constant 0 : index
    %256 = vector.load %arg28[%c0_141, %c0_142, %c0_143] : memref<4x1x32xf32, #tpu.memory_space<vmem>>, vector<1x1x32xf32>
    %257 = vector.shape_cast %256 : vector<1x1x32xf32> to vector<1x32xf32>
    %258 = vector.broadcast %257 : vector<1x32xf32> to vector<16x32xf32>
    %259 = arith.mulf %255, %258 : vector<16x32xf32>
    %260 = vector.broadcast %257 : vector<1x32xf32> to vector<16x32xf32>
    %261 = arith.mulf %247, %260 : vector<16x32xf32>
    %cst_144 = arith.constant dense<0.000000e+00> : vector<16x16xf32>
    %262 = tpu.matmul %251, %259, %cst_144 {dimension_numbers = #tpu.dot_dimension_numbers<[1], [1], [0], [0], [0, 0, 1, 0], [], []>} : vector<16x32xf32>, vector<16x32xf32>, vector<16x16xf32> -> vector<16x16xf32>
    %263 = arith.addf %262, %3 : vector<16x16xf32>
    %cst_145 = arith.constant dense<0xFF800000> : vector<16xf32>
    %264 = vector.multi_reduction <maximumf>, %263, %cst_145 [1] : vector<16x16xf32> to vector<16xf32>
    %265 = vector.shape_cast %264 : vector<16xf32> to vector<16x1xf32>
    %266 = vector.broadcast %265 : vector<16x1xf32> to vector<16x16xf32>
    %267 = arith.subf %263, %266 : vector<16x16xf32>
    %268 = math.exp %267 : vector<16x16xf32>
    %cst_146 = arith.constant dense<0.000000e+00> : vector<16xf32>
    %269 = vector.multi_reduction <add>, %268, %cst_146 [1] : vector<16x16xf32> to vector<16xf32>
    %270 = vector.shape_cast %269 : vector<16xf32> to vector<16x1xf32>
    %cst_147 = arith.constant dense<0.000000e+00> : vector<16x32xf32>
    %271 = tpu.matmul %268, %261, %cst_147 {dimension_numbers = #tpu.dot_dimension_numbers<[1], [0], [0], [1], [0, 0, 1, 1], [], []>} : vector<16x16xf32>, vector<16x32xf32>, vector<16x32xf32> -> vector<16x32xf32>
    %272 = tpu.reciprocal %270 {approx = true} : vector<16x1xf32> -> vector<16x1xf32>
    %273 = vector.broadcast %272 : vector<16x1xf32> to vector<16x32xf32>
    %274 = arith.mulf %271, %273 : vector<16x32xf32>
    %c1_148 = arith.constant 1 : index
    %c0_149 = arith.constant 0 : index
    %c0_150 = arith.constant 0 : index
    %275 = vector.load %arg28[%c1_148, %c0_149, %c0_150] : memref<4x1x32xf32, #tpu.memory_space<vmem>>, vector<1x1x32xf32>
    %276 = vector.shape_cast %275 : vector<1x1x32xf32> to vector<1x32xf32>
    %277 = vector.broadcast %276 : vector<1x32xf32> to vector<16x32xf32>
    %278 = arith.mulf %255, %277 : vector<16x32xf32>
    %279 = vector.broadcast %276 : vector<1x32xf32> to vector<16x32xf32>
    %280 = arith.mulf %247, %279 : vector<16x32xf32>
    %cst_151 = arith.constant dense<0.000000e+00> : vector<16x16xf32>
    %281 = tpu.matmul %251, %278, %cst_151 {dimension_numbers = #tpu.dot_dimension_numbers<[1], [1], [0], [0], [0, 0, 1, 0], [], []>} : vector<16x32xf32>, vector<16x32xf32>, vector<16x16xf32> -> vector<16x16xf32>
    %282 = arith.addf %281, %3 : vector<16x16xf32>
    %cst_152 = arith.constant dense<0xFF800000> : vector<16xf32>
    %283 = vector.multi_reduction <maximumf>, %282, %cst_152 [1] : vector<16x16xf32> to vector<16xf32>
    %284 = vector.shape_cast %283 : vector<16xf32> to vector<16x1xf32>
    %285 = vector.broadcast %284 : vector<16x1xf32> to vector<16x16xf32>
    %286 = arith.subf %282, %285 : vector<16x16xf32>
    %287 = math.exp %286 : vector<16x16xf32>
    %cst_153 = arith.constant dense<0.000000e+00> : vector<16xf32>
    %288 = vector.multi_reduction <add>, %287, %cst_153 [1] : vector<16x16xf32> to vector<16xf32>
    %289 = vector.shape_cast %288 : vector<16xf32> to vector<16x1xf32>
    %cst_154 = arith.constant dense<0.000000e+00> : vector<16x32xf32>
    %290 = tpu.matmul %287, %280, %cst_154 {dimension_numbers = #tpu.dot_dimension_numbers<[1], [0], [0], [1], [0, 0, 1, 1], [], []>} : vector<16x16xf32>, vector<16x32xf32>, vector<16x32xf32> -> vector<16x32xf32>
    %291 = tpu.reciprocal %289 {approx = true} : vector<16x1xf32> -> vector<16x1xf32>
    %292 = vector.broadcast %291 : vector<16x1xf32> to vector<16x32xf32>
    %293 = arith.mulf %290, %292 : vector<16x32xf32>
    %294 = arith.addf %274, %293 : vector<16x32xf32>
    %c2_155 = arith.constant 2 : index
    %c0_156 = arith.constant 0 : index
    %c0_157 = arith.constant 0 : index
    %295 = vector.load %arg28[%c2_155, %c0_156, %c0_157] : memref<4x1x32xf32, #tpu.memory_space<vmem>>, vector<1x1x32xf32>
    %296 = vector.shape_cast %295 : vector<1x1x32xf32> to vector<1x32xf32>
    %297 = vector.broadcast %296 : vector<1x32xf32> to vector<16x32xf32>
    %298 = arith.mulf %255, %297 : vector<16x32xf32>
    %299 = vector.broadcast %296 : vector<1x32xf32> to vector<16x32xf32>
    %300 = arith.mulf %247, %299 : vector<16x32xf32>
    %cst_158 = arith.constant dense<0.000000e+00> : vector<16x16xf32>
    %301 = tpu.matmul %251, %298, %cst_158 {dimension_numbers = #tpu.dot_dimension_numbers<[1], [1], [0], [0], [0, 0, 1, 0], [], []>} : vector<16x32xf32>, vector<16x32xf32>, vector<16x16xf32> -> vector<16x16xf32>
    %302 = arith.addf %301, %3 : vector<16x16xf32>
    %cst_159 = arith.constant dense<0xFF800000> : vector<16xf32>
    %303 = vector.multi_reduction <maximumf>, %302, %cst_159 [1] : vector<16x16xf32> to vector<16xf32>
    %304 = vector.shape_cast %303 : vector<16xf32> to vector<16x1xf32>
    %305 = vector.broadcast %304 : vector<16x1xf32> to vector<16x16xf32>
    %306 = arith.subf %302, %305 : vector<16x16xf32>
    %307 = math.exp %306 : vector<16x16xf32>
    %cst_160 = arith.constant dense<0.000000e+00> : vector<16xf32>
    %308 = vector.multi_reduction <add>, %307, %cst_160 [1] : vector<16x16xf32> to vector<16xf32>
    %309 = vector.shape_cast %308 : vector<16xf32> to vector<16x1xf32>
    %cst_161 = arith.constant dense<0.000000e+00> : vector<16x32xf32>
    %310 = tpu.matmul %307, %300, %cst_161 {dimension_numbers = #tpu.dot_dimension_numbers<[1], [0], [0], [1], [0, 0, 1, 1], [], []>} : vector<16x16xf32>, vector<16x32xf32>, vector<16x32xf32> -> vector<16x32xf32>
    %311 = tpu.reciprocal %309 {approx = true} : vector<16x1xf32> -> vector<16x1xf32>
    %312 = vector.broadcast %311 : vector<16x1xf32> to vector<16x32xf32>
    %313 = arith.mulf %310, %312 : vector<16x32xf32>
    %314 = arith.addf %294, %313 : vector<16x32xf32>
    %c3_162 = arith.constant 3 : index
    %c0_163 = arith.constant 0 : index
    %c0_164 = arith.constant 0 : index
    %315 = vector.load %arg28[%c3_162, %c0_163, %c0_164] : memref<4x1x32xf32, #tpu.memory_space<vmem>>, vector<1x1x32xf32>
    %316 = vector.shape_cast %315 : vector<1x1x32xf32> to vector<1x32xf32>
    %317 = vector.broadcast %316 : vector<1x32xf32> to vector<16x32xf32>
    %318 = arith.mulf %255, %317 : vector<16x32xf32>
    %319 = vector.broadcast %316 : vector<1x32xf32> to vector<16x32xf32>
    %320 = arith.mulf %247, %319 : vector<16x32xf32>
    %cst_165 = arith.constant dense<0.000000e+00> : vector<16x16xf32>
    %321 = tpu.matmul %251, %318, %cst_165 {dimension_numbers = #tpu.dot_dimension_numbers<[1], [1], [0], [0], [0, 0, 1, 0], [], []>} : vector<16x32xf32>, vector<16x32xf32>, vector<16x16xf32> -> vector<16x16xf32>
    %322 = arith.addf %321, %3 : vector<16x16xf32>
    %cst_166 = arith.constant dense<0xFF800000> : vector<16xf32>
    %323 = vector.multi_reduction <maximumf>, %322, %cst_166 [1] : vector<16x16xf32> to vector<16xf32>
    %324 = vector.shape_cast %323 : vector<16xf32> to vector<16x1xf32>
    %325 = vector.broadcast %324 : vector<16x1xf32> to vector<16x16xf32>
    %326 = arith.subf %322, %325 : vector<16x16xf32>
    %327 = math.exp %326 : vector<16x16xf32>
    %cst_167 = arith.constant dense<0.000000e+00> : vector<16xf32>
    %328 = vector.multi_reduction <add>, %327, %cst_167 [1] : vector<16x16xf32> to vector<16xf32>
    %329 = vector.shape_cast %328 : vector<16xf32> to vector<16x1xf32>
    %cst_168 = arith.constant dense<0.000000e+00> : vector<16x32xf32>
    %330 = tpu.matmul %327, %320, %cst_168 {dimension_numbers = #tpu.dot_dimension_numbers<[1], [0], [0], [1], [0, 0, 1, 1], [], []>} : vector<16x16xf32>, vector<16x32xf32>, vector<16x32xf32> -> vector<16x32xf32>
    %331 = tpu.reciprocal %329 {approx = true} : vector<16x1xf32> -> vector<16x1xf32>
    %332 = vector.broadcast %331 : vector<16x1xf32> to vector<16x32xf32>
    %333 = arith.mulf %330, %332 : vector<16x32xf32>
    %334 = arith.addf %314, %333 : vector<16x32xf32>
    %c1_169 = arith.constant 1 : index
    %c0_170 = arith.constant 0 : index
    %c0_171 = arith.constant 0 : index
    %335 = vector.load %arg12[%c1_169, %c0_170, %c0_171] : memref<2x32x32xf32, #tpu.memory_space<vmem>>, vector<1x32x32xf32>
    %336 = vector.shape_cast %335 : vector<1x32x32xf32> to vector<32x32xf32>
    %cst_172 = arith.constant dense<0.000000e+00> : vector<16x32xf32>
    %337 = tpu.matmul %334, %336, %cst_172 {dimension_numbers = #tpu.dot_dimension_numbers<[1], [0], [0], [1], [0, 0, 1, 1], [], []>} : vector<16x32xf32>, vector<32x32xf32>, vector<16x32xf32> -> vector<16x32xf32>
    %c1_173 = arith.constant 1 : index
    %c0_174 = arith.constant 0 : index
    %c0_175 = arith.constant 0 : index
    %338 = vector.load %arg13[%c1_173, %c0_174, %c0_175] : memref<2x1x32xf32, #tpu.memory_space<vmem>>, vector<1x1x32xf32>
    %339 = vector.shape_cast %338 : vector<1x1x32xf32> to vector<1x32xf32>
    %340 = vector.broadcast %339 : vector<1x32xf32> to vector<16x32xf32>
    %341 = arith.addf %337, %340 : vector<16x32xf32>
    %342 = arith.addf %200, %341 : vector<16x32xf32>
    %c1_176 = arith.constant 1 : index
    %c0_177 = arith.constant 0 : index
    %c0_178 = arith.constant 0 : index
    %343 = vector.load %arg14[%c1_176, %c0_177, %c0_178] : memref<2x1x32xf32, #tpu.memory_space<vmem>>, vector<1x1x32xf32>
    %344 = vector.shape_cast %343 : vector<1x1x32xf32> to vector<1x32xf32>
    %c1_179 = arith.constant 1 : index
    %c0_180 = arith.constant 0 : index
    %c0_181 = arith.constant 0 : index
    %345 = vector.load %arg15[%c1_179, %c0_180, %c0_181] : memref<2x1x32xf32, #tpu.memory_space<vmem>>, vector<1x1x32xf32>
    %346 = vector.shape_cast %345 : vector<1x1x32xf32> to vector<1x32xf32>
    %cst_182 = arith.constant dense<0.000000e+00> : vector<16xf32>
    %347 = vector.multi_reduction <add>, %342, %cst_182 [1] : vector<16x32xf32> to vector<16xf32>
    %348 = vector.shape_cast %347 : vector<16xf32> to vector<16x1xf32>
    %cst_183 = arith.constant 3.200000e+01 : f32
    %349 = vector.broadcast %cst_183 : f32 to vector<16x1xf32>
    %350 = arith.divf %348, %349 : vector<16x1xf32>
    %351 = arith.mulf %342, %342 : vector<16x32xf32>
    %cst_184 = arith.constant dense<0.000000e+00> : vector<16xf32>
    %352 = vector.multi_reduction <add>, %351, %cst_184 [1] : vector<16x32xf32> to vector<16xf32>
    %353 = vector.shape_cast %352 : vector<16xf32> to vector<16x1xf32>
    %cst_185 = arith.constant 3.200000e+01 : f32
    %354 = vector.broadcast %cst_185 : f32 to vector<16x1xf32>
    %355 = arith.divf %353, %354 : vector<16x1xf32>
    %356 = arith.mulf %350, %350 : vector<16x1xf32>
    %357 = arith.subf %355, %356 : vector<16x1xf32>
    %358 = vector.broadcast %350 : vector<16x1xf32> to vector<16x32xf32>
    %359 = arith.subf %342, %358 : vector<16x32xf32>
    %cst_186 = arith.constant 9.99999974E-6 : f32
    %360 = vector.broadcast %cst_186 : f32 to vector<16x1xf32>
    %361 = arith.addf %357, %360 : vector<16x1xf32>
    %362 = math.rsqrt %361 : vector<16x1xf32>
    %363 = vector.broadcast %362 : vector<16x1xf32> to vector<16x32xf32>
    %364 = arith.mulf %359, %363 : vector<16x32xf32>
    %365 = vector.broadcast %344 : vector<1x32xf32> to vector<16x32xf32>
    %366 = arith.mulf %364, %365 : vector<16x32xf32>
    %367 = vector.broadcast %346 : vector<1x32xf32> to vector<16x32xf32>
    %368 = arith.addf %366, %367 : vector<16x32xf32>
    %c1_187 = arith.constant 1 : index
    %c0_188 = arith.constant 0 : index
    %c0_189 = arith.constant 0 : index
    %369 = vector.load %arg16[%c1_187, %c0_188, %c0_189] : memref<2x32x128xf32, #tpu.memory_space<vmem>>, vector<1x32x128xf32>
    %370 = vector.shape_cast %369 : vector<1x32x128xf32> to vector<32x128xf32>
    %cst_190 = arith.constant dense<0.000000e+00> : vector<16x128xf32>
    %371 = tpu.matmul %368, %370, %cst_190 {dimension_numbers = #tpu.dot_dimension_numbers<[1], [0], [0], [1], [0, 0, 1, 1], [], []>} : vector<16x32xf32>, vector<32x128xf32>, vector<16x128xf32> -> vector<16x128xf32>
    %c1_191 = arith.constant 1 : index
    %c0_192 = arith.constant 0 : index
    %c0_193 = arith.constant 0 : index
    %372 = vector.load %arg17[%c1_191, %c0_192, %c0_193] : memref<2x1x128xf32, #tpu.memory_space<vmem>>, vector<1x1x128xf32>
    %373 = vector.shape_cast %372 : vector<1x1x128xf32> to vector<1x128xf32>
    %374 = vector.broadcast %373 : vector<1x128xf32> to vector<16x128xf32>
    %375 = arith.addf %371, %374 : vector<16x128xf32>
    %cst_194 = arith.constant 5.000000e-01 : f32
    %376 = vector.broadcast %cst_194 : f32 to vector<16x128xf32>
    %377 = arith.mulf %376, %375 : vector<16x128xf32>
    %cst_195 = arith.constant 0.707106769 : f32
    %378 = vector.broadcast %cst_195 : f32 to vector<16x128xf32>
    %379 = arith.mulf %375, %378 : vector<16x128xf32>
    %380 = math.erf %379 : vector<16x128xf32>
    %cst_196 = arith.constant 1.000000e+00 : f32
    %381 = vector.broadcast %cst_196 : f32 to vector<16x128xf32>
    %382 = arith.addf %381, %380 : vector<16x128xf32>
    %383 = arith.mulf %377, %382 : vector<16x128xf32>
    %c1_197 = arith.constant 1 : index
    %c0_198 = arith.constant 0 : index
    %c0_199 = arith.constant 0 : index
    %384 = vector.load %arg18[%c1_197, %c0_198, %c0_199] : memref<2x128x32xf32, #tpu.memory_space<vmem>>, vector<1x128x32xf32>
    %385 = vector.shape_cast %384 : vector<1x128x32xf32> to vector<128x32xf32>
    %cst_200 = arith.constant dense<0.000000e+00> : vector<16x32xf32>
    %386 = tpu.matmul %383, %385, %cst_200 {dimension_numbers = #tpu.dot_dimension_numbers<[1], [0], [0], [1], [0, 0, 1, 1], [], []>} : vector<16x128xf32>, vector<128x32xf32>, vector<16x32xf32> -> vector<16x32xf32>
    %387 = arith.addf %342, %386 : vector<16x32xf32>
    %c1_201 = arith.constant 1 : index
    %c0_202 = arith.constant 0 : index
    %c0_203 = arith.constant 0 : index
    %388 = vector.load %arg19[%c1_201, %c0_202, %c0_203] : memref<2x1x32xf32, #tpu.memory_space<vmem>>, vector<1x1x32xf32>
    %389 = vector.shape_cast %388 : vector<1x1x32xf32> to vector<1x32xf32>
    %390 = vector.broadcast %389 : vector<1x32xf32> to vector<16x32xf32>
    %391 = arith.addf %387, %390 : vector<16x32xf32>
    %c0_204 = arith.constant 0 : index
    %c0_205 = arith.constant 0 : index
    %392 = vector.load %arg20[%c0_204, %c0_205] : memref<1x32xf32, #tpu.memory_space<vmem>>, vector<1x32xf32>
    %c0_206 = arith.constant 0 : index
    %c0_207 = arith.constant 0 : index
    %393 = vector.load %arg21[%c0_206, %c0_207] : memref<1x32xf32, #tpu.memory_space<vmem>>, vector<1x32xf32>
    %cst_208 = arith.constant dense<0.000000e+00> : vector<16xf32>
    %394 = vector.multi_reduction <add>, %391, %cst_208 [1] : vector<16x32xf32> to vector<16xf32>
    %395 = vector.shape_cast %394 : vector<16xf32> to vector<16x1xf32>
    %cst_209 = arith.constant 3.200000e+01 : f32
    %396 = vector.broadcast %cst_209 : f32 to vector<16x1xf32>
    %397 = arith.divf %395, %396 : vector<16x1xf32>
    %398 = arith.mulf %391, %391 : vector<16x32xf32>
    %cst_210 = arith.constant dense<0.000000e+00> : vector<16xf32>
    %399 = vector.multi_reduction <add>, %398, %cst_210 [1] : vector<16x32xf32> to vector<16xf32>
    %400 = vector.shape_cast %399 : vector<16xf32> to vector<16x1xf32>
    %cst_211 = arith.constant 3.200000e+01 : f32
    %401 = vector.broadcast %cst_211 : f32 to vector<16x1xf32>
    %402 = arith.divf %400, %401 : vector<16x1xf32>
    %403 = arith.mulf %397, %397 : vector<16x1xf32>
    %404 = arith.subf %402, %403 : vector<16x1xf32>
    %405 = vector.broadcast %397 : vector<16x1xf32> to vector<16x32xf32>
    %406 = arith.subf %391, %405 : vector<16x32xf32>
    %cst_212 = arith.constant 9.99999974E-6 : f32
    %407 = vector.broadcast %cst_212 : f32 to vector<16x1xf32>
    %408 = arith.addf %404, %407 : vector<16x1xf32>
    %409 = math.rsqrt %408 : vector<16x1xf32>
    %410 = vector.broadcast %409 : vector<16x1xf32> to vector<16x32xf32>
    %411 = arith.mulf %406, %410 : vector<16x32xf32>
    %412 = vector.broadcast %392 : vector<1x32xf32> to vector<16x32xf32>
    %413 = arith.mulf %411, %412 : vector<16x32xf32>
    %414 = vector.broadcast %393 : vector<1x32xf32> to vector<16x32xf32>
    %415 = arith.addf %413, %414 : vector<16x32xf32>
    %c0_213 = arith.constant 0 : index
    %c0_214 = arith.constant 0 : index
    %416 = vector.load %arg22[%c0_213, %c0_214] : memref<32x128xf32, #tpu.memory_space<vmem>>, vector<32x128xf32>
    %cst_215 = arith.constant dense<0.000000e+00> : vector<16x128xf32>
    %417 = tpu.matmul %415, %416, %cst_215 {dimension_numbers = #tpu.dot_dimension_numbers<[1], [0], [0], [1], [0, 0, 1, 1], [], []>} : vector<16x32xf32>, vector<32x128xf32>, vector<16x128xf32> -> vector<16x128xf32>
    %c0_216 = arith.constant 0 : index
    %c0_217 = arith.constant 0 : index
    %418 = vector.load %arg23[%c0_216, %c0_217] : memref<1x128xf32, #tpu.memory_space<vmem>>, vector<1x128xf32>
    %419 = vector.broadcast %418 : vector<1x128xf32> to vector<16x128xf32>
    %420 = arith.addf %417, %419 : vector<16x128xf32>
    %421 = arith.negf %420 : vector<16x128xf32>
    %422 = math.exp %421 : vector<16x128xf32>
    %cst_218 = arith.constant 1.000000e+00 : f32
    %423 = vector.broadcast %cst_218 : f32 to vector<16x128xf32>
    %424 = arith.addf %423, %422 : vector<16x128xf32>
    %425 = arith.divf %423, %424 : vector<16x128xf32>
    %c0_219 = arith.constant 0 : index
    %c0_220 = arith.constant 0 : index
    %426 = vector.load %arg29[%c0_219, %c0_220] : memref<16x128xf32, #tpu.memory_space<vmem>>, vector<16x128xf32>
    tpu.vector_store %arg29[%c0_219, %c0_220], %425 {strides = array<i32>} : memref<16x128xf32, #tpu.memory_space<vmem>>, vector<16x128xf32>,
    return
  }
  func.func @transform_0(%arg0: i32) -> (i32, i32) {
    %c0_i32 = arith.constant 0 : i32
    %c0_i32_0 = arith.constant 0 : i32
    %c0_i32_1 = arith.constant 0 : i32
    return %c0_i32, %c0_i32_0 : i32, i32
  }
  func.func @transform_1(%arg0: i32) -> (i32, i32) {
    %c0_i32 = arith.constant 0 : i32
    %c0_i32_0 = arith.constant 0 : i32
    %c0_i32_1 = arith.constant 0 : i32
    return %c0_i32, %c0_i32_0 : i32, i32
  }
  func.func @transform_2(%arg0: i32) -> (i32, i32) {
    %c0_i32 = arith.constant 0 : i32
    %c0_i32_0 = arith.constant 0 : i32
    %c0_i32_1 = arith.constant 0 : i32
    return %c0_i32, %c0_i32_0 : i32, i32
  }
  func.func @transform_3(%arg0: i32) -> (i32, i32, i32) {
    %c0_i32 = arith.constant 0 : i32
    %c0_i32_0 = arith.constant 0 : i32
    %c0_i32_1 = arith.constant 0 : i32
    %c0_i32_2 = arith.constant 0 : i32
    return %c0_i32, %c0_i32_0, %c0_i32_1 : i32, i32, i32
  }
  func.func @transform_4(%arg0: i32) -> (i32, i32, i32) {
    %c0_i32 = arith.constant 0 : i32
    %c0_i32_0 = arith.constant 0 : i32
    %c0_i32_1 = arith.constant 0 : i32
    %c0_i32_2 = arith.constant 0 : i32
    return %c0_i32, %c0_i32_0, %c0_i32_1 : i32, i32, i32
  }
  func.func @transform_5(%arg0: i32) -> (i32, i32, i32) {
    %c0_i32 = arith.constant 0 : i32
    %c0_i32_0 = arith.constant 0 : i32
    %c0_i32_1 = arith.constant 0 : i32
    %c0_i32_2 = arith.constant 0 : i32
    return %c0_i32, %c0_i32_0, %c0_i32_1 : i32, i32, i32
  }
  func.func @transform_6(%arg0: i32) -> (i32, i32, i32) {
    %c0_i32 = arith.constant 0 : i32
    %c0_i32_0 = arith.constant 0 : i32
    %c0_i32_1 = arith.constant 0 : i32
    %c0_i32_2 = arith.constant 0 : i32
    return %c0_i32, %c0_i32_0, %c0_i32_1 : i32, i32, i32
  }
  func.func @transform_7(%arg0: i32) -> (i32, i32, i32) {
    %c0_i32 = arith.constant 0 : i32
    %c0_i32_0 = arith.constant 0 : i32
    %c0_i32_1 = arith.constant 0 : i32
    %c0_i32_2 = arith.constant 0 : i32
    return %c0_i32, %c0_i32_0, %c0_i32_1 : i32, i32, i32
  }
  func.func @transform_8(%arg0: i32) -> (i32, i32, i32) {
    %c0_i32 = arith.constant 0 : i32
    %c0_i32_0 = arith.constant 0 : i32
    %c0_i32_1 = arith.constant 0 : i32
    %c0_i32_2 = arith.constant 0 : i32
    return %c0_i32, %c0_i32_0, %c0_i32_1 : i32, i32, i32
  }
  func.func @transform_9(%arg0: i32) -> (i32, i32, i32) {
    %c0_i32 = arith.constant 0 : i32
    %c0_i32_0 = arith.constant 0 : i32
    %c0_i32_1 = arith.constant 0 : i32
    %c0_i32_2 = arith.constant 0 : i32
    return %c0_i32, %c0_i32_0, %c0_i32_1 : i32, i32, i32
  }
  func.func @transform_10(%arg0: i32) -> (i32, i32, i32) {
    %c0_i32 = arith.constant 0 : i32
    %c0_i32_0 = arith.constant 0 : i32
    %c0_i32_1 = arith.constant 0 : i32
    %c0_i32_2 = arith.constant 0 : i32
    return %c0_i32, %c0_i32_0, %c0_i32_1 : i32, i32, i32
  }
  func.func @transform_11(%arg0: i32) -> (i32, i32, i32) {
    %c0_i32 = arith.constant 0 : i32
    %c0_i32_0 = arith.constant 0 : i32
    %c0_i32_1 = arith.constant 0 : i32
    %c0_i32_2 = arith.constant 0 : i32
    return %c0_i32, %c0_i32_0, %c0_i32_1 : i32, i32, i32
  }
  func.func @transform_12(%arg0: i32) -> (i32, i32, i32) {
    %c0_i32 = arith.constant 0 : i32
    %c0_i32_0 = arith.constant 0 : i32
    %c0_i32_1 = arith.constant 0 : i32
    %c0_i32_2 = arith.constant 0 : i32
    return %c0_i32, %c0_i32_0, %c0_i32_1 : i32, i32, i32
  }
  func.func @transform_13(%arg0: i32) -> (i32, i32, i32) {
    %c0_i32 = arith.constant 0 : i32
    %c0_i32_0 = arith.constant 0 : i32
    %c0_i32_1 = arith.constant 0 : i32
    %c0_i32_2 = arith.constant 0 : i32
    return %c0_i32, %c0_i32_0, %c0_i32_1 : i32, i32, i32
  }
  func.func @transform_14(%arg0: i32) -> (i32, i32, i32) {
    %c0_i32 = arith.constant 0 : i32
    %c0_i32_0 = arith.constant 0 : i32
    %c0_i32_1 = arith.constant 0 : i32
    %c0_i32_2 = arith.constant 0 : i32
    return %c0_i32, %c0_i32_0, %c0_i32_1 : i32, i32, i32
  }
  func.func @transform_15(%arg0: i32) -> (i32, i32, i32) {
    %c0_i32 = arith.constant 0 : i32
    %c0_i32_0 = arith.constant 0 : i32
    %c0_i32_1 = arith.constant 0 : i32
    %c0_i32_2 = arith.constant 0 : i32
    return %c0_i32, %c0_i32_0, %c0_i32_1 : i32, i32, i32
  }
  func.func @transform_16(%arg0: i32) -> (i32, i32, i32) {
    %c0_i32 = arith.constant 0 : i32
    %c0_i32_0 = arith.constant 0 : i32
    %c0_i32_1 = arith.constant 0 : i32
    %c0_i32_2 = arith.constant 0 : i32
    return %c0_i32, %c0_i32_0, %c0_i32_1 : i32, i32, i32
  }
  func.func @transform_17(%arg0: i32) -> (i32, i32, i32) {
    %c0_i32 = arith.constant 0 : i32
    %c0_i32_0 = arith.constant 0 : i32
    %c0_i32_1 = arith.constant 0 : i32
    %c0_i32_2 = arith.constant 0 : i32
    return %c0_i32, %c0_i32_0, %c0_i32_1 : i32, i32, i32
  }
  func.func @transform_18(%arg0: i32) -> (i32, i32, i32) {
    %c0_i32 = arith.constant 0 : i32
    %c0_i32_0 = arith.constant 0 : i32
    %c0_i32_1 = arith.constant 0 : i32
    %c0_i32_2 = arith.constant 0 : i32
    return %c0_i32, %c0_i32_0, %c0_i32_1 : i32, i32, i32
  }
  func.func @transform_19(%arg0: i32) -> (i32, i32) {
    %c0_i32 = arith.constant 0 : i32
    %c0_i32_0 = arith.constant 0 : i32
    %c0_i32_1 = arith.constant 0 : i32
    return %c0_i32, %c0_i32_0 : i32, i32
  }
  func.func @transform_20(%arg0: i32) -> (i32, i32) {
    %c0_i32 = arith.constant 0 : i32
    %c0_i32_0 = arith.constant 0 : i32
    %c0_i32_1 = arith.constant 0 : i32
    return %c0_i32, %c0_i32_0 : i32, i32
  }
  func.func @transform_21(%arg0: i32) -> (i32, i32) {
    %c0_i32 = arith.constant 0 : i32
    %c0_i32_0 = arith.constant 0 : i32
    %c0_i32_1 = arith.constant 0 : i32
    return %c0_i32, %c0_i32_0 : i32, i32
  }
  func.func @transform_22(%arg0: i32) -> (i32, i32) {
    %c0_i32 = arith.constant 0 : i32
    %c0_i32_0 = arith.constant 0 : i32
    %c0_i32_1 = arith.constant 0 : i32
    return %c0_i32, %c0_i32_0 : i32, i32
  }
  func.func @transform_23(%arg0: i32) -> (i32, i32) {
    %c0_i32 = arith.constant 0 : i32
    %c0_i32_0 = arith.constant 0 : i32
    %c0_i32_1 = arith.constant 0 : i32
    return %c0_i32, %c0_i32_0 : i32, i32
  }
  func.func @transform_24(%arg0: i32) -> (i32, i32) {
    %c0_i32 = arith.constant 0 : i32
    %c0_i32_0 = arith.constant 0 : i32
    %c0_i32_1 = arith.constant 0 : i32
    return %c0_i32, %c0_i32_0 : i32, i32
  }
  func.func @transform_25(%arg0: i32) -> (i32, i32) {
    %c0_i32 = arith.constant 0 : i32
    %c0_i32_0 = arith.constant 0 : i32
    %c0_i32_1 = arith.constant 0 : i32
    return %c0_i32, %c0_i32_0 : i32, i32
  }
  func.func @transform_26(%arg0: i32) -> (i32, i32) {
    %c0_i32 = arith.constant 0 : i32
    %c0_i32_0 = arith.constant 0 : i32
    %c0_i32_1 = arith.constant 0 : i32
    return %c0_i32, %c0_i32_0 : i32, i32
  }
  func.func @transform_27(%arg0: i32) -> (i32, i32, i32) {
    %c0_i32 = arith.constant 0 : i32
    %c0_i32_0 = arith.constant 0 : i32
    %c0_i32_1 = arith.constant 0 : i32
    %c0_i32_2 = arith.constant 0 : i32
    return %c0_i32, %c0_i32_0, %c0_i32_1 : i32, i32, i32
  }
  func.func @transform_28(%arg0: i32) -> (i32, i32) {
    %c0_i32 = arith.constant 0 : i32
    %c0_i32_0 = arith.constant 0 : i32
    %c0_i32_1 = arith.constant 0 : i32
    return %c0_i32, %c0_i32_0 : i32, i32
  }
}

</mosaic_0001>

<bundles_post_ra>
// kernel: tpu_custom_call.1
= control target key start
LH: loop header
LB: loop body
LE: loop exit
PB: predicated region body
PF: predicated region fallthrough
CT: control target
= control target key end

     0   :  { %s6412_s0 = inlined_call_operand.vmem [shape: f32[16,4], index: 0, kind: input, shape index: {}]   ;;  %s6413_s1 = inlined_call_operand.vmem [shape: f32[4,32], index: 1, kind: input, shape index: {}]   ;;  %s6414_s2 = inlined_call_operand.hbm [shape: f32[1,32], index: 2, kind: input, shape index: {}]   ;;  %s6415_s3 = inlined_call_operand.vmem [shape: f32[2,1,32], index: 3, kind: input, shape index: {}]   ;;  %s6416_s4 = inlined_call_operand.hbm [shape: f32[2,1,32], index: 4, kind: input, shape index: {}]   ;;  %s6417_s5 = inlined_call_operand.vmem [shape: f32[2,32,32], index: 5, kind: input, shape index: {}]   ;;  %s6418_s6 = inlined_call_operand.hbm [shape: f32[2,1,32], index: 6, kind: input, shape index: {}]   ;;  %s6419_s7 = inlined_call_operand.vmem [shape: f32[2,32,32], index: 7, kind: input, shape index: {}]   ;;  %s6420_s8 = inlined_call_operand.hbm [shape: f32[2,1,32], index: 8, kind: input, shape index: {}]   ;;  %s6421_s9 = inlined_call_operand.vmem [shape: f32[2,32,32], index: 9, kind: input, shape index: {}]   ;;  %s6422_s10 = inlined_call_operand.hbm [shape: f32[2,1,32], index: 10, kind: input, shape index: {}]   ;;  %s6423_s11 = inlined_call_operand.vmem [shape: f32[2,32,32], index: 11, kind: input, shape index: {}]   ;;  %s6424_s12 = inlined_call_operand.hbm [shape: f32[2,1,32], index: 12, kind: input, shape index: {}]   ;;  %s6425_s13 = inlined_call_operand.hbm [shape: f32[2,1,32], index: 13, kind: input, shape index: {}]   ;;  %s6426_s14 = inlined_call_operand.hbm [shape: f32[2,1,32], index: 14, kind: input, shape index: {}]   ;;  %s6427_s15 = inlined_call_operand.vmem [shape: f32[2,32,128], index: 15, kind: input, shape index: {}]   ;;  %s6428_s16 = inlined_call_operand.hbm [shape: f32[2,1,128], index: 16, kind: input, shape index: {}]   ;;  %s6429_s17 = inlined_call_operand.vmem [shape: f32[2,128,32], index: 17, kind: input, shape index: {}]   ;;  %s6430_s18 = inlined_call_operand.hbm [shape: f32[2,1,32], index: 18, kind: input, shape index: {}]   ;;  %s6431_s19 = inlined_call_operand.hbm [shape: f32[1,32], index: 19, kind: input, shape index: {}]   ;;  %s6432_s20 = inlined_call_operand.hbm [shape: f32[1,32], index: 20, kind: input, shape index: {}]   ;;  %s6433_s21 = inlined_call_operand.hbm [shape: f32[32,128], index: 21, kind: input, shape index: {}]   ;;  %s6434_s22 = inlined_call_operand.hbm [shape: f32[1,128], index: 22, kind: input, shape index: {}]   ;;  %s6435_s23 = inlined_call_operand.hbm [shape: f32[16,32], index: 23, kind: input, shape index: {}]   ;;  %s6436_s24 = inlined_call_operand.hbm [shape: f32[16,32], index: 24, kind: input, shape index: {}]   ;;  %s6437_s25 = inlined_call_operand.vmem [shape: f32[32,32], index: 25, kind: input, shape index: {}]   ;;  %s6438_s26 = inlined_call_operand.vmem [shape: f32[16,16], index: 26, kind: input, shape index: {}]   ;;  %s6439_s27 = inlined_call_operand.hbm [shape: f32[4,1,32], index: 27, kind: input, shape index: {}]   ;;  %s6440_s28 = inlined_call_operand.hbm [shape: f32[16,128], index: 28, kind: output, shape index: {}]  }
   0x1   :  { %6456 = sst [smem:[#allocation40_spill]] %s6412_s0 }
   0x2   :  { %6457 = sst [smem:[#allocation41_spill]] %s6413_s1 }
   0x3   :  { %6458 = sst [smem:[#allocation42_spill]] %s6414_s2 }
   0x4   :  { %6459 = sst [smem:[#allocation43_spill]] %s6415_s3 }
   0x5   :  { %6460 = sst [smem:[#allocation44_spill]] %s6416_s4 }
   0x6   :  { %6461 = sst [smem:[#allocation45_spill]] %s6417_s5 }
   0x7   :  { %6462 = sst [smem:[#allocation46_spill]] %s6418_s6 }
   0x8   :  { %6463 = sst [smem:[#allocation47_spill]] %s6419_s7 }
   0x9   :  { %6464 = sst [smem:[#allocation48_spill]] %s6420_s8 }
   0xa   :  { %6465 = sst [smem:[#allocation49_spill]] %s6421_s9 }
   0xb   :  { %6466 = sst [smem:[#allocation50_spill]] %s6422_s10 }
   0xc   :  { %6467 = sst [smem:[#allocation51_spill]] %s6423_s11 }
   0xd   :  { %6468 = sst [smem:[#allocation52_spill]] %s6424_s12 }
   0xe   :  { %6469 = sst [smem:[#allocation53_spill]] %s6427_s15 }
   0xf   :  { %6470 = sst [smem:[#allocation54_spill]] %s6429_s17 }
  0x10   :  { %6471 = sst [smem:[#allocation55_spill]] %s6440_s28 }
  0x11   :  { %33 = vsyncpa [#allocation3], 0 }
  0x12   :  { %34 = vsyncpa [#allocation6], 0 }
  0x13   :  { %35 = vsyncpa [#allocation9], 0 }
  0x14   :  { %36 = vsyncpa [#allocation12], 0 }
  0x15   :  { %37 = vsyncpa [#allocation15], 0 }
  0x16   :  { %38 = vsyncpa [#allocation18], 0 }
  0x17   :  { %39 = vsyncpa [#allocation21], 0 }
  0x18   :  { %40 = vsyncpa [#allocation24], 0 }
  0x19   :  { %41 = vsyncpa [#allocation27], 0 }
  0x1a   :  { %42 = vsyncpa [#allocation4], 0  ;;  %s5336_s8 = smov [#allocation5]   ;;  %s6472_s3 = sld [smem:[#allocation44_spill]] }
  0x1b   :  { %s64_s5 = sshll.u32 %s5336_s8, 4  ;;  %s65_s5 = int_to_ptr.vmem [resolvable:$true] %s64_s5 }
  0x20   :  { %s4920_s6 = scalar_lea.hbm %s6472_s3, 32 }
  0x21   :  { %p4921_p0 = scmp.ne.s32.totalorder %s6472_s3, %s4920_s6  ;;  %p4924_p1 = scmp.lt.u32.totalorder %s4920_s6, %s6472_s3 }
  0x23   :  { %p4926_p2 = pnand %p4924_p1, %p4921_p0 }
  0x25   :  { %4929 = shalt.err (!%p4926_p2)
}
  0x26   :  { %s4930_s2 = scalar_lea.vmem %s65_s5, 32  ;;  %p4935_p4 = scmp.lt.s32.totalorder %s65_s5, %s65_s5 }
  0x27   :  { %p4931_p3 = scmp.ne.s32.totalorder %s65_s5, %s4930_s2  ;;  %p4936_p5 = scmp.lt.s32.totalorder %s4930_s2, %s4930_s2 }
  0x29   :  { %p4937_p6 = por %p4936_p5, %p4935_p4 }
  0x2b   :  { %p4938_p7 = pnand %p4937_p6, %p4931_p3 }
  0x2d   :  { %4941 = shalt.err (!%p4938_p7)
}
  0x2e   :  { %s5337_s7 = smov 16   ;;  %s5338_s12 = smov 1  }
  0x2f   :  { %70 = dma.hbm_to_vmem [thread:$0]  %s6472_s3, 32, %s65_s5, [#allocation6], %s5337_s7, %s5337_s7, %s5338_s12  }
  0x30   :  { %s5339_s8 = smov [#allocation8]   ;;  %s5340_s30 = smov [#allocation11]  }
  0x31   :  { %s92_s9 = sshll.u32 %s5339_s8, 4  ;;  %s120_s6 = sshll.u32 %s5340_s30, 4  ;;  %s93_s9 = int_to_ptr.vmem [resolvable:$true] %s92_s9  ;;  %s121_s6 = int_to_ptr.vmem [resolvable:$true] %s120_s6 }
  0x32   :  { %s6473_s11 = sld [smem:[#allocation48_spill]] }
  0x38   :  { %s4942_s29 = scalar_lea.hbm %s6473_s11, 32 }
  0x39   :  { %p4943_p8 = scmp.ne.s32.totalorder %s6473_s11, %s4942_s29  ;;  %p4946_p9 = scmp.lt.u32.totalorder %s4942_s29, %s6473_s11 }
  0x3b   :  { %p4948_p10 = pnand %p4946_p9, %p4943_p8 }
  0x3d   :  { %4951 = shalt.err (!%p4948_p10)
}
  0x3e   :  { %s4952_s5 = scalar_lea.vmem %s93_s9, 32  ;;  %p4957_p12 = scmp.lt.s32.totalorder %s93_s9, %s93_s9 }
  0x3f   :  { %p4953_p11 = scmp.ne.s32.totalorder %s93_s9, %s4952_s5  ;;  %p4958_p13 = scmp.lt.s32.totalorder %s4952_s5, %s4952_s5 }
  0x41   :  { %p4959_p0 = por %p4958_p13, %p4957_p12 }
  0x43   :  { %p4960_p1 = pnand %p4959_p0, %p4953_p11 }
  0x45   :  { %4963 = shalt.err (!%p4960_p1)
}
  0x46   :  { %98 = dma.hbm_to_vmem [thread:$0]  %s6473_s11, 32, %s93_s9, [#allocation9], %s5337_s7, %s5337_s7, %s5338_s12  }
  0x47   :  { %s6474_s17 = sld [smem:[#allocation52_spill]] }
  0x4d   :  { %s4964_s4 = scalar_lea.hbm %s6474_s17, 32 }
  0x4e   :  { %p4965_p2 = scmp.ne.s32.totalorder %s6474_s17, %s4964_s4  ;;  %p4968_p3 = scmp.lt.u32.totalorder %s4964_s4, %s6474_s17 }
  0x50   :  { %p4970_p4 = pnand %p4968_p3, %p4965_p2 }
  0x52   :  { %4973 = shalt.err (!%p4970_p4)
}
  0x53   :  { %s4974_s29 = scalar_lea.vmem %s121_s6, 32  ;;  %p4979_p6 = scmp.lt.s32.totalorder %s121_s6, %s121_s6 }
  0x54   :  { %p4975_p5 = scmp.ne.s32.totalorder %s121_s6, %s4974_s29  ;;  %p4980_p7 = scmp.lt.s32.totalorder %s4974_s29, %s4974_s29 }
  0x56   :  { %p4981_p8 = por %p4980_p7, %p4979_p6 }
  0x58   :  { %p4982_p9 = pnand %p4981_p8, %p4975_p5 }
  0x5a   :  { %4985 = shalt.err (!%p4982_p9)
}
  0x5b   :  { %126 = dma.hbm_to_vmem [thread:$0]  %s6474_s17, 32, %s121_s6, [#allocation12], %s5337_s7, %s5337_s7, %s5338_s12  }
  0x5c   :  { %s5341_s2 = smov [#allocation14]   ;;  %s5342_s3 = smov [#allocation17]  }
  0x5d   :  { %s144_s5 = sshll.u32 %s5341_s2, 4  ;;  %s172_s1 = sshll.u32 %s5342_s3, 4  ;;  %s145_s5 = int_to_ptr.vmem [resolvable:$true] %s144_s5  ;;  %s173_s1 = int_to_ptr.vmem [resolvable:$true] %s172_s1 }
  0x5e   :  { %s4986_s4 = scalar_lea.hbm %s6426_s14, 32 }
  0x5f   :  { %p4987_p10 = scmp.ne.s32.totalorder %s6426_s14, %s4986_s4  ;;  %p4990_p11 = scmp.lt.u32.totalorder %s4986_s4, %s6426_s14 }
  0x61   :  { %p4992_p12 = pnand %p4990_p11, %p4987_p10 }
  0x63   :  { %4995 = shalt.err (!%p4992_p12)
}
  0x64   :  { %s4996_s6 = scalar_lea.vmem %s145_s5, 32  ;;  %p5001_p0 = scmp.lt.s32.totalorder %s145_s5, %s145_s5 }
  0x65   :  { %p4997_p13 = scmp.ne.s32.totalorder %s145_s5, %s4996_s6  ;;  %p5002_p1 = scmp.lt.s32.totalorder %s4996_s6, %s4996_s6 }
  0x67   :  { %p5003_p2 = por %p5002_p1, %p5001_p0 }
  0x69   :  { %p5004_p3 = pnand %p5003_p2, %p4997_p13 }
  0x6b   :  { %5007 = shalt.err (!%p5004_p3)
}
  0x6c   :  { %150 = dma.hbm_to_vmem [thread:$0]  %s6426_s14, 32, %s145_s5, [#allocation15], %s5337_s7, %s5337_s7, %s5338_s12  }
  0x6d   :  { %s5008_s2 = scalar_lea.hbm %s6430_s18, 32 }
  0x6e   :  { %p5009_p4 = scmp.ne.s32.totalorder %s6430_s18, %s5008_s2  ;;  %p5012_p5 = scmp.lt.u32.totalorder %s5008_s2, %s6430_s18 }
  0x70   :  { %p5014_p6 = pnand %p5012_p5, %p5009_p4 }
  0x72   :  { %5017 = shalt.err (!%p5014_p6)
}
  0x73   :  { %s5018_s8 = scalar_lea.vmem %s173_s1, 32  ;;  %p5023_p8 = scmp.lt.s32.totalorder %s173_s1, %s173_s1 }
  0x74   :  { %p5019_p7 = scmp.ne.s32.totalorder %s173_s1, %s5018_s8  ;;  %p5024_p9 = scmp.lt.s32.totalorder %s5018_s8, %s5018_s8 }
  0x76   :  { %p5025_p10 = por %p5024_p9, %p5023_p8 }
  0x78   :  { %p5026_p11 = pnand %p5025_p10, %p5019_p7 }
  0x7a   :  { %5029 = shalt.err (!%p5026_p11)
}
  0x7b   :  { %178 = dma.hbm_to_vmem [thread:$0]  %s6430_s18, 32, %s173_s1, [#allocation18], %s5337_s7, %s5337_s7, %s5338_s12  }
  0x7c   :  { %s5343_s30 = smov [#allocation20]   ;;  %s5344_s0 = smov [#allocation23]  }
  0x7d   :  { %s195_s10 = sshll.u32 %s5343_s30, 4  ;;  %s217_s6 = sshll.u32 %s5344_s0, 4  ;;  %s196_s10 = int_to_ptr.vmem [resolvable:$true] %s195_s10  ;;  %s218_s6 = int_to_ptr.vmem [resolvable:$true] %s217_s6 }
  0x7e   :  { %s5030_s9 = scalar_lea.hbm %s6432_s20, 16 }
  0x7f   :  { %p5031_p12 = scmp.ne.s32.totalorder %s6432_s20, %s5030_s9  ;;  %p5034_p13 = scmp.lt.u32.totalorder %s5030_s9, %s6432_s20 }
  0x81   :  { %p5036_p0 = pnand %p5034_p13, %p5031_p12 }
  0x83   :  { %5039 = shalt.err (!%p5036_p0)
}
  0x84   :  { %s5040_s18 = scalar_lea.vmem %s196_s10, 16  ;;  %s5044_s1 = scalar_lea.vmem %s196_s10, 32 }
  0x85   :  { %p5041_p1 = scmp.ne.s32.totalorder %s196_s10, %s5040_s18  ;;  %p5045_p2 = scmp.lt.s32.totalorder %s196_s10, %s196_s10 }
  0x86   :  { %p5046_p3 = scmp.lt.s32.totalorder %s5044_s1, %s5040_s18 }
  0x88   :  { %p5047_p4 = por %p5046_p3, %p5045_p2 }
  0x8a   :  { %p5048_p5 = pnand %p5047_p4, %p5041_p1 }
  0x8c   :  { %5051 = shalt.err (!%p5048_p5)
}
  0x8d   :  { %198 = dma.hbm_to_vmem [thread:$0]  %s6432_s20, 16, %s196_s10, [#allocation21]  }
  0x8e   :  { %s5052_s5 = scalar_lea.hbm %s6434_s22, 16 }
  0x8f   :  { %p5053_p6 = scmp.ne.s32.totalorder %s6434_s22, %s5052_s5  ;;  %p5056_p7 = scmp.lt.u32.totalorder %s5052_s5, %s6434_s22 }
  0x91   :  { %p5058_p8 = pnand %p5056_p7, %p5053_p6 }
  0x93   :  { %5061 = shalt.err (!%p5058_p8)
}
  0x94   :  { %s5062_s9 = scalar_lea.vmem %s218_s6, 16  ;;  %s5066_s11 = scalar_lea.vmem %s218_s6, 32 }
  0x95   :  { %p5063_p9 = scmp.ne.s32.totalorder %s218_s6, %s5062_s9  ;;  %p5067_p10 = scmp.lt.s32.totalorder %s218_s6, %s218_s6 }
  0x96   :  { %p5068_p11 = scmp.lt.s32.totalorder %s5066_s11, %s5062_s9 }
  0x98   :  { %p5069_p12 = por %p5068_p11, %p5067_p10 }
  0x9a   :  { %p5070_p13 = pnand %p5069_p12, %p5063_p9 }
  0x9c   :  { %5073 = shalt.err (!%p5070_p13)
}
  0x9d   :  { %220 = dma.hbm_to_vmem [thread:$0]  %s6434_s22, 16, %s218_s6, [#allocation24]  }
  0x9e   :  { %s5345_s2 = smov [#allocation26]   ;;  %s5346_s28 = smov [#allocation2]  }
  0x9f   :  { %s238_s3 = sshll.u32 %s5345_s2, 4  ;;  %s53_s18 = sshll.u32 %s5346_s28, 4  ;;  %s239_s3 = int_to_ptr.vmem [resolvable:$true] %s238_s3  ;;  %s54_s18 = int_to_ptr.vmem [resolvable:$true] %s53_s18 }
  0xa0   :  { %s5074_s4 = scalar_lea.hbm %s6436_s24, 256 }
  0xa1   :  { %p5075_p0 = scmp.ne.s32.totalorder %s6436_s24, %s5074_s4  ;;  %p5078_p1 = scmp.lt.u32.totalorder %s5074_s4, %s6436_s24 }
  0xa3   :  { %p5080_p2 = pnand %p5078_p1, %p5075_p0 }
  0xa5   :  { %5083 = shalt.err (!%p5080_p2)
}
  0xa6   :  { %s5084_s22 = scalar_lea.vmem %s239_s3, 256  ;;  %p5089_p4 = scmp.lt.s32.totalorder %s239_s3, %s239_s3 }
  0xa7   :  { %p5085_p3 = scmp.ne.s32.totalorder %s239_s3, %s5084_s22  ;;  %p5090_p5 = scmp.lt.s32.totalorder %s5084_s22, %s5084_s22 }
  0xa9   :  { %p5091_p6 = por %p5090_p5, %p5089_p4 }
  0xab   :  { %p5092_p7 = pnand %p5091_p6, %p5085_p3 }
  0xad   :  { %5095 = shalt.err (!%p5092_p7)
}
  0xae   :  { %s5347_s6 = smov 128   ;;  %s5348_s0 = smov 8  }
  0xaf   :  { %244 = dma.hbm_to_vmem [thread:$0]  %s6436_s24, 256, %s239_s3, [#allocation27], %s5347_s6, %s5347_s6, %s5348_s0  }
  0xb0   :  { %s6475_s20 = sld [smem:[#allocation42_spill]] }
  0xb6   :  { %s5096_s10 = scalar_lea.hbm %s6475_s20, 16 }
  0xb7   :  { %p5097_p8 = scmp.ne.s32.totalorder %s6475_s20, %s5096_s10  ;;  %p5100_p9 = scmp.lt.u32.totalorder %s5096_s10, %s6475_s20 }
  0xb9   :  { %p5102_p10 = pnand %p5100_p9, %p5097_p8 }
  0xbb   :  { %5105 = shalt.err (!%p5102_p10)
}
  0xbc   :  { %s5106_s4 = scalar_lea.vmem %s54_s18, 16  ;;  %s5110_s8 = scalar_lea.vmem %s54_s18, 32 }
  0xbd   :  { %p5107_p11 = scmp.ne.s32.totalorder %s54_s18, %s5106_s4  ;;  %p5111_p12 = scmp.lt.s32.totalorder %s54_s18, %s54_s18 }
  0xbe   :  { %p5112_p13 = scmp.lt.s32.totalorder %s5110_s8, %s5106_s4 }
  0xc0   :  { %p5113_p0 = por %p5112_p13, %p5111_p12 }
  0xc2   :  { %p5114_p1 = pnand %p5113_p0, %p5107_p11 }
  0xc4   :  { %5117 = shalt.err (!%p5114_p1)
}
  0xc5   :  { %56 = dma.hbm_to_vmem [thread:$0]  %s6475_s20, 16, %s54_s18, [#allocation3]  }
  0xc6   :  { %s5349_s14 = smov [#allocation7]   ;;  %s5350_s30 = smov [#allocation10]  }
  0xc7   :  { %s78_s5 = sshll.u32 %s5349_s14, 4  ;;  %s106_s22 = sshll.u32 %s5350_s30, 4  ;;  %s79_s5 = int_to_ptr.vmem [resolvable:$true] %s78_s5  ;;  %s107_s22 = int_to_ptr.vmem [resolvable:$true] %s106_s22 }
  0xc8   :  { %s6476_s9 = sld [smem:[#allocation46_spill]] }
  0xce   :  { %s5118_s11 = scalar_lea.hbm %s6476_s9, 32 }
  0xcf   :  { %p5119_p2 = scmp.ne.s32.totalorder %s6476_s9, %s5118_s11  ;;  %p5122_p3 = scmp.lt.u32.totalorder %s5118_s11, %s6476_s9 }
  0xd1   :  { %p5124_p4 = pnand %p5122_p3, %p5119_p2 }
  0xd3   :  { %5127 = shalt.err (!%p5124_p4)
}
  0xd4   :  { %s5128_s18 = scalar_lea.vmem %s79_s5, 32  ;;  %p5133_p6 = scmp.lt.s32.totalorder %s79_s5, %s79_s5 }
  0xd5   :  { %p5129_p5 = scmp.ne.s32.totalorder %s79_s5, %s5128_s18  ;;  %p5134_p7 = scmp.lt.s32.totalorder %s5128_s18, %s5128_s18 }
  0xd7   :  { %p5135_p8 = por %p5134_p7, %p5133_p6 }
  0xd9   :  { %p5136_p9 = pnand %p5135_p8, %p5129_p5 }
  0xdb   :  { %5139 = shalt.err (!%p5136_p9)
}
  0xdc   :  { %84 = dma.hbm_to_vmem [thread:$0]  %s6476_s9, 32, %s79_s5, [#allocation6], %s5337_s7, %s5337_s7, %s5338_s12  }
  0xdd   :  { %s6477_s24 = sld [smem:[#allocation50_spill]] }
  0xe3   :  { %s5140_s3 = scalar_lea.hbm %s6477_s24, 32 }
  0xe4   :  { %p5141_p10 = scmp.ne.s32.totalorder %s6477_s24, %s5140_s3  ;;  %p5144_p11 = scmp.lt.u32.totalorder %s5140_s3, %s6477_s24 }
  0xe6   :  { %p5146_p12 = pnand %p5144_p11, %p5141_p10 }
  0xe8   :  { %5149 = shalt.err (!%p5146_p12)
}
  0xe9   :  { %s5150_s11 = scalar_lea.vmem %s107_s22, 32  ;;  %p5155_p0 = scmp.lt.s32.totalorder %s107_s22, %s107_s22 }
  0xea   :  { %p5151_p13 = scmp.ne.s32.totalorder %s107_s22, %s5150_s11  ;;  %p5156_p1 = scmp.lt.s32.totalorder %s5150_s11, %s5150_s11 }
  0xec   :  { %p5157_p2 = por %p5156_p1, %p5155_p0 }
  0xee   :  { %p5158_p3 = pnand %p5157_p2, %p5151_p13 }
  0xf0   :  { %5161 = shalt.err (!%p5158_p3)
}
  0xf1   :  { %112 = dma.hbm_to_vmem [thread:$0]  %s6477_s24, 32, %s107_s22, [#allocation9], %s5337_s7, %s5337_s7, %s5338_s12  }
  0xf2   :  { %s5351_s10 = smov [#allocation13]   ;;  %s5352_s28 = smov [#allocation16]  }
  0xf3   :  { %s132_s2 = sshll.u32 %s5351_s10, 4  ;;  %s158_s1 = sshll.u32 %s5352_s28, 4  ;;  %s133_s2 = int_to_ptr.vmem [resolvable:$true] %s132_s2  ;;  %s159_s1 = int_to_ptr.vmem [resolvable:$true] %s158_s1 }
  0xf4   :  { %s5162_s15 = scalar_lea.hbm %s6425_s13, 32 }
  0xf5   :  { %p5163_p4 = scmp.ne.s32.totalorder %s6425_s13, %s5162_s15  ;;  %p5166_p5 = scmp.lt.u32.totalorder %s5162_s15, %s6425_s13 }
  0xf7   :  { %p5168_p6 = pnand %p5166_p5, %p5163_p4 }
  0xf9   :  { %5171 = shalt.err (!%p5168_p6)
}
  0xfa   :  { %s5172_s22 = scalar_lea.vmem %s133_s2, 32  ;;  %p5177_p8 = scmp.lt.s32.totalorder %s133_s2, %s133_s2 }
  0xfb   :  { %p5173_p7 = scmp.ne.s32.totalorder %s133_s2, %s5172_s22  ;;  %p5178_p9 = scmp.lt.s32.totalorder %s5172_s22, %s5172_s22 }
  0xfd   :  { %p5179_p10 = por %p5178_p9, %p5177_p8 }
  0xff   :  { %p5180_p11 = pnand %p5179_p10, %p5173_p7 }
 0x101   :  { %5183 = shalt.err (!%p5180_p11)
}
 0x102   :  { %138 = dma.hbm_to_vmem [thread:$0]  %s6425_s13, 32, %s133_s2, [#allocation12], %s5337_s7, %s5337_s7, %s5338_s12  }
 0x103   :  { %s5184_s11 = scalar_lea.hbm %s6428_s16, 32 }
 0x104   :  { %p5185_p12 = scmp.ne.s32.totalorder %s6428_s16, %s5184_s11  ;;  %p5188_p13 = scmp.lt.u32.totalorder %s5184_s11, %s6428_s16 }
 0x106   :  { %p5190_p0 = pnand %p5188_p13, %p5185_p12 }
 0x108   :  { %5193 = shalt.err (!%p5190_p0)
}
 0x109   :  { %s5194_s18 = scalar_lea.vmem %s159_s1, 32  ;;  %p5199_p2 = scmp.lt.s32.totalorder %s159_s1, %s159_s1 }
 0x10a   :  { %p5195_p1 = scmp.ne.s32.totalorder %s159_s1, %s5194_s18  ;;  %p5200_p3 = scmp.lt.s32.totalorder %s5194_s18, %s5194_s18 }
 0x10c   :  { %p5201_p4 = por %p5200_p3, %p5199_p2 }
 0x10e   :  { %p5202_p5 = pnand %p5201_p4, %p5195_p1 }
 0x110   :  { %5205 = shalt.err (!%p5202_p5)
}
 0x111   :  { %164 = dma.hbm_to_vmem [thread:$0]  %s6428_s16, 32, %s159_s1, [#allocation15], %s5337_s7, %s5337_s7, %s5338_s12  }
 0x112   :  { %s5353_s20 = smov [#allocation19]   ;;  %s5354_s4 = smov [#allocation22]  }
 0x113   :  { %s185_s15 = sshll.u32 %s5353_s20, 4  ;;  %s204_s8 = sshll.u32 %s5354_s4, 4  ;;  %s186_s15 = int_to_ptr.vmem [resolvable:$true] %s185_s15  ;;  %s205_s8 = int_to_ptr.vmem [resolvable:$true] %s204_s8 }
 0x114   :  { %s5206_s22 = scalar_lea.hbm %s6431_s19, 16 }
 0x115   :  { %p5207_p6 = scmp.ne.s32.totalorder %s6431_s19, %s5206_s22  ;;  %p5210_p7 = scmp.lt.u32.totalorder %s5206_s22, %s6431_s19 }
 0x117   :  { %p5212_p8 = pnand %p5210_p7, %p5207_p6 }
 0x119   :  { %5215 = shalt.err (!%p5212_p8)
}
 0x11a   :  { %s5216_s16 = scalar_lea.vmem %s186_s15, 16  ;;  %s5220_s1 = scalar_lea.vmem %s186_s15, 32 }
 0x11b   :  { %p5217_p9 = scmp.ne.s32.totalorder %s186_s15, %s5216_s16  ;;  %p5221_p10 = scmp.lt.s32.totalorder %s186_s15, %s186_s15 }
 0x11c   :  { %p5222_p11 = scmp.lt.s32.totalorder %s5220_s1, %s5216_s16 }
 0x11e   :  { %p5223_p12 = por %p5222_p11, %p5221_p10 }
 0x120   :  { %p5224_p13 = pnand %p5223_p12, %p5217_p9 }
 0x122   :  { %5227 = shalt.err (!%p5224_p13)
}
 0x123   :  { %188 = dma.hbm_to_vmem [thread:$0]  %s6431_s19, 16, %s186_s15, [#allocation18]  }
 0x124   :  { %s5228_s28 = scalar_lea.hbm %s6433_s21, 512 }
 0x125   :  { %p5229_p0 = scmp.ne.s32.totalorder %s6433_s21, %s5228_s28  ;;  %p5232_p1 = scmp.lt.u32.totalorder %s5228_s28, %s6433_s21 }
 0x127   :  { %p5234_p2 = pnand %p5232_p1, %p5229_p0 }
 0x129   :  { %5237 = shalt.err (!%p5234_p2)
}
 0x12a   :  { %s5238_s4 = scalar_lea.vmem %s205_s8, 512  ;;  %p5243_p4 = scmp.lt.s32.totalorder %s205_s8, %s205_s8 }
 0x12b   :  { %p5239_p3 = scmp.ne.s32.totalorder %s205_s8, %s5238_s4  ;;  %p5244_p5 = scmp.lt.s32.totalorder %s5238_s4, %s5238_s4 }
 0x12d   :  { %p5245_p6 = por %p5244_p5, %p5243_p4 }
 0x12f   :  { %p5246_p7 = pnand %p5245_p6, %p5239_p3 }
 0x131   :  { %5249 = shalt.err (!%p5246_p7)
}
 0x132   :  { %210 = dma.hbm_to_vmem [thread:$0]  %s6433_s21, 512, %s205_s8, [#allocation21], %s5347_s6, %s5347_s6, %s5348_s0  }
 0x133   :  { %s5355_s3 = smov [#allocation25]   ;;  %s5356_s22 = smov [#allocation28]  }
 0x134   :  { %s226_s14 = sshll.u32 %s5355_s3, 4  ;;  %s254_s24 = sshll.u32 %s5356_s22, 4  ;;  %s227_s14 = int_to_ptr.vmem [resolvable:$true] %s226_s14  ;;  %s255_s24 = int_to_ptr.vmem [resolvable:$true] %s254_s24 }
 0x135   :  { %s5250_s29 = scalar_lea.hbm %s6435_s23, 256 }
 0x136   :  { %p5251_p8 = scmp.ne.s32.totalorder %s6435_s23, %s5250_s29  ;;  %p5254_p9 = scmp.lt.u32.totalorder %s5250_s29, %s6435_s23 }
 0x138   :  { %p5256_p10 = pnand %p5254_p9, %p5251_p8 }
 0x13a   :  { %5259 = shalt.err (!%p5256_p10)
}
 0x13b   :  { %s5260_s21 = scalar_lea.vmem %s227_s14, 256  ;;  %p5265_p12 = scmp.lt.s32.totalorder %s227_s14, %s227_s14 }
 0x13c   :  { %p5261_p11 = scmp.ne.s32.totalorder %s227_s14, %s5260_s21  ;;  %p5266_p13 = scmp.lt.s32.totalorder %s5260_s21, %s5260_s21 }
 0x13e   :  { %p5267_p0 = por %p5266_p13, %p5265_p12 }
 0x140   :  { %p5268_p1 = pnand %p5267_p0, %p5261_p11 }
 0x142   :  { %5271 = shalt.err (!%p5268_p1)
}
 0x143   :  { %232 = dma.hbm_to_vmem [thread:$0]  %s6435_s23, 256, %s227_s14, [#allocation24], %s5347_s6, %s5347_s6, %s5348_s0  }
 0x144   :  { %s5272_s18 = scalar_lea.hbm %s6439_s27, 64 }
 0x145   :  { %p5273_p2 = scmp.ne.s32.totalorder %s6439_s27, %s5272_s18  ;;  %p5276_p3 = scmp.lt.u32.totalorder %s5272_s18, %s6439_s27 }
 0x147   :  { %p5278_p4 = pnand %p5276_p3, %p5273_p2 }
 0x149   :  { %5281 = shalt.err (!%p5278_p4)
}
 0x14a   :  { %s5282_s19 = scalar_lea.vmem %s255_s24, 64  ;;  %p5287_p6 = scmp.lt.s32.totalorder %s255_s24, %s255_s24 }
 0x14b   :  { %p5283_p5 = scmp.ne.s32.totalorder %s255_s24, %s5282_s19  ;;  %p5288_p7 = scmp.lt.s32.totalorder %s5282_s19, %s5282_s19 }
 0x14d   :  { %p5289_p8 = por %p5288_p7, %p5287_p6 }
 0x14f   :  { %p5290_p9 = pnand %p5289_p8, %p5283_p5 }
 0x151   :  { %5293 = shalt.err (!%p5290_p9)
}
 0x152   :  { %260 = dma.hbm_to_vmem [thread:$0]  %s6439_s27, 64, %s255_s24, [#allocation27], %s5337_s7, %s5337_s7, %s5338_s12  }
 0x153   :  { %5316 = dma.done.wait [#allocation3], 16  }
 0x154   :  { %5317 = vsyncadd [#allocation3], 4294967280 }
 0x155   :  { %5318 = dma.done.wait [#allocation6], 64  }
 0x156   :  { %5319 = vsyncadd [#allocation6], 4294967232 }
 0x157   :  { %5320 = dma.done.wait [#allocation9], 64  }
 0x158   :  { %5321 = vsyncadd [#allocation9], 4294967232 }
 0x159   :  { %5322 = dma.done.wait [#allocation12], 64  }
 0x15a   :  { %5323 = vsyncadd [#allocation12], 4294967232 }
 0x15b   :  { %5324 = dma.done.wait [#allocation15], 64  }
 0x15c   :  { %5325 = vsyncadd [#allocation15], 4294967232 }
 0x15d   :  { %5326 = dma.done.wait [#allocation18], 48  }
 0x15e   :  { %5327 = vsyncadd [#allocation18], 4294967248 }
 0x15f   :  { %5328 = dma.done.wait [#allocation21], 528  }
 0x160   :  { %5329 = vsyncadd [#allocation21], 4294966768 }
 0x161   :  { %5330 = dma.done.wait [#allocation24], 272  }
 0x162   :  { %5331 = vsyncadd [#allocation24], 4294967024 }
 0x163   :  { %5332 = dma.done.wait [#allocation27], 320  }
 0x164   :  { %5333 = vsyncadd [#allocation27], 4294966976  ;;  %vm339_vm0 = vcmask 1043456   ;;  %vm332_vm1 = vcmask 31744   ;;  %s6478_s12 = sld [smem:[#allocation41_spill]]  ;;  %s6479_s22 = sld [smem:[#allocation40_spill]] }
 0x165   :  { %v3839_v3 = vld [vmem:[#allocation2] ss:$0 sm:$0xff]  ;;  %vm420_vm2 = vcmask 261120   ;;  %s6480_s16 = sld [smem:[#allocation45_spill]]  ;;  %s6481_s8 = sld [smem:[#allocation49_spill]]  ;;  %v316_v29 = vld [vmem:[%s6437_s25] sm:$0xff] }
 0x166   :  { %s6482_s7 = sld [smem:[#allocation47_spill]]  ;;  %v317_v30 = vld [vmem:[%s6437_s25 + $0x8] sm:$0xff]  ;;  %s6483_s1 = sld [smem:[#allocation43_spill]]  ;;  %v318_v61 = vld [vmem:[%s6437_s25 + $0x10] sm:$0xff]  ;;  %v319_v62 = vld [vmem:[%s6437_s25 + $0x18] sm:$0xff]  ;;  %vm1004_vm4 = vcmask 130048  }
 0x167   :  { %v5805_v31 = vpack.c.bf16 %v317_v30, %v316_v29  ;;  %v3844_v50 = vld [vmem:[#allocation5] ss:$0 sm:$0xff]  ;;  %v5834_v63 = vpack.c.bf16 %v319_v62, %v318_v61  ;;  %vm5896_vm3 = vmpackc.low %vm420_vm2, %vm420_vm2  ;;  %s6486_s15 = sld [smem:[#allocation51_spill]]  ;;  %s6487_s29 = sld [smem:[#allocation53_spill]]  ;;  %v4919_v62 = vld [vmem:[%s6438_s26] sm:$0xff] }
 0x168   :  { %s6488_s25 = sld [smem:[#allocation54_spill]] }
 0x16a   :  { %v324_v0 = vld [vmem:[%s6478_s12] sm:$0xf]  ;;  %v323_v2 = vld [vmem:[%s6479_s22 + $0x8] sm:$0xff] }
 0x16b   :  { %v322_v1 = vld [vmem:[%s6479_s22] sm:$0xff]  ;;  %4180 = vmatprep.subr.msk.mxu0 %vm339_vm0, %v324_v0  ;;  %v469_v15 = vld [vmem:[%s6480_s16 + $0x8] sm:$0xff]  ;;  %v470_v19 = vld [vmem:[%s6480_s16 + $0x10] sm:$0xff] }
 0x16c   :  { %4182 = vmatprep.mubr.msk.f32.mxu0 %vm332_vm1, %v322_v1  ;;  %4181 = vmatpush3.msk.msra.mxu0 %vm339_vm0, %v324_v0  ;;  %v468_v14 = vld [vmem:[%s6480_s16] sm:$0xff]  ;;  %v647_v18 = vld [vmem:[%s6481_s8 + $0x8] sm:$0xff]  ;;  %v471_v20 = vld [vmem:[%s6480_s16 + $0x18] sm:$0xff] }
 0x16d   :  { %4183 = vmatmul.mubr.msk.f32.vlgmr.msra.gmra.mrb[0].mxu0 %vm332_vm1, %v323_v2  ;;  %v646_v16 = vld [vmem:[%s6481_s8] sm:$0xff]  ;;  %v4532_v17 = vpack.c.bf16 %v469_v15, %v468_v14  ;;  %v4536_v22 = vpack.c.bf16 %v471_v20, %v470_v19  ;;  %v648_v23 = vld [vmem:[%s6481_s8 + $0x10] sm:$0xff]  ;;  %v649_v24 = vld [vmem:[%s6481_s8 + $0x18] sm:$0xff] }
 0x16e   :  { %v4548_v21 = vpack.c.bf16 %v647_v18, %v646_v16  ;;  %v4552_v25 = vpack.c.bf16 %v649_v24, %v648_v23  ;;  %v560_v26 = vld [vmem:[%s6482_s7] sm:$0xff]  ;;  %v561_v27 = vld [vmem:[%s6482_s7 + $0x8] sm:$0xff]  ;;  %v562_v56 = vld [vmem:[%s6482_s7 + $0x10] sm:$0xff] }
 0x16f   :  { %4533 = vmatprep.subr.bf16.mxu0 %v4532_v17  ;;  %v4540_v28 = vpack.c.bf16 %v561_v27, %v560_v26  ;;  %v3843_v48 = vld [vmem:[%s6483_s1] ss:$0 sm:$0xff]  ;;  %v563_v57 = vld [vmem:[%s6482_s7 + $0x18] sm:$0xff]  ;;  %v3851_v0 = vld [vmem:[#allocation10] ss:$0 sm:$0xff] }
 0x170   :  { %4535 = vmatpush3.bf16.msra.mxu0 %v4532_v17  ;;  %4549 = vmatprep.subr.bf16.mxu1 %v4548_v21  ;;  %v4544_v60 = vpack.c.bf16 %v563_v57, %v562_v56  ;;  %v3845_v1 = vld [vmem:[#allocation7] ss:$0 sm:$0xff]  ;;  %v5840_v2 = vld [vmem:[#allocation28 + $0x1] ss:$0 sm:$0xff]  ;;  %v5846_v14 = vld [vmem:[#allocation28 + $0x3] ss:$0 sm:$0xff] }
 0x171   :  { %4551 = vmatpush3.bf16.msra.mxu1 %v4548_v21  ;;  %4537 = vmatprep.subr.bf16.mxu0 %v4536_v22  ;;  %v3848_v27 = vld [vmem:[#allocation8] ss:$0 sm:$0xff] }
 0x172   :  { %4553 = vmatprep.subr.bf16.mxu1 %v4552_v25 }
 0x174   :  { %4539 = vmatpush3.bf16.msra.mxu0 %v4536_v22 }
 0x175   :  { %4555 = vmatpush3.bf16.msra.mxu1 %v4552_v25  ;;  %4541 = vmatprep.subr.bf16.mxu0 %v4540_v28 }
 0x176   :  { %4565 = vmatprep.subr.bf16.mxu1 %v5805_v31 }
 0x240   :  { %v4184_v4 = vpop.f32.mrb[0].mxu0 }
 0x241   :  { %v409_v5 = vpop.f32.mrb[1].mxu0  ;;  %v5755_v6 = vadd.f32 %v4184_v4, %v3839_v3 }
 0x242   :  { %v5757_v7 = vadd.f32 %v3839_v3, %v409_v5  ;;  %v5842_v5 = vld [vmem:[#allocation28] ss:$0 sm:$0xff] }
 0x243   :  { %v431_v11 = vmul.f32 %v5755_v6, %v5755_v6  ;;  %v424_v12 = vsel %vm420_vm2, %v5755_v6, 0.0 }
 0x244   :  { %v421_v8 = vsel %vm420_vm2, %v5757_v7, 0.0  ;;  %v430_v9 = vmul.f32 %v5757_v7, %v5757_v7 }
 0x245   :  { %422 = vadd.xlane.f32.xlu0 %v421_v8  ;;  %v435_v13 = vsel %vm420_vm2, %v431_v11, 0.0  ;;  %v5844_v8 = vld [vmem:[#allocation28 + $0x2] ss:$0 sm:$0xff] }
 0x246   :  { %v432_v10 = vsel %vm420_vm2, %v430_v9, 0.0 }
 0x247   :  { %433 = vadd.xlane.f32.xlu1 %v432_v10 }
 0x249   :  { %425 = vadd.xlane.f32.xlu0 %v424_v12 }
 0x24b   :  { %436 = vadd.xlane.f32.xlu1 %v435_v13 }
 0x2d2   :  { %v423_v32 = vpop.xlane.xlu0 %422 }
 0x2d3   :  { %v428_v33 = vmul.f32 0.03125, %v423_v32 }
 0x2d4   :  { %v434_v34 = vpop.xlane.xlu1 %433 }
 0x2d5   :  { %v440_v35 = vmul.f32 %v428_v33, %v428_v33  ;;  %v438_v36 = vmul.f32 0.03125, %v434_v34  ;;  %v444_v46 = vsub.f32 %v5757_v7, %v428_v33  ;;  %v5864_v34 = vld [vmem:[#allocation25 + $0x8] sm:$0xff] }
 0x2d6   :  { %v426_v37 = vpop.xlane.xlu0 %425 }
 0x2d7   :  { %v442_v38 = vsub.f32 %v438_v36, %v440_v35  ;;  %v429_v39 = vmul.f32 0.03125, %v426_v37  ;;  %v5866_v35 = vld [vmem:[#allocation26 + $0x8] sm:$0xff]  ;;  %v5868_v36 = vld [vmem:[#allocation25] sm:$0xff]  ;;  %v5870_v37 = vld [vmem:[#allocation26] sm:$0xff] }
 0x2d8   :  { %v437_v40 = vpop.xlane.xlu1 %436 }
 0x2d9   :  { %v446_v41 = vadd.f32 1e-05, %v442_v38  ;;  %v441_v42 = vmul.f32 %v429_v39, %v429_v39  ;;  %v439_v43 = vmul.f32 0.03125, %v437_v40  ;;  %v445_v51 = vsub.f32 %v5755_v6, %v429_v39 }
 0x2db   :  { %4818 = vrsqrt.f32 %v446_v41  ;;  %v443_v44 = vsub.f32 %v439_v43, %v441_v42 }
 0x2dd   :  { %v447_v45 = vadd.f32 1e-05, %v443_v44 }
 0x2df   :  { %4820 = vrsqrt.f32 %v447_v45 }
 0x2e5   :  { %v4819_v47 = vpop.eup %4818 }
 0x2e6   :  { %v450_v49 = vmul.f32 %v4819_v47, %v444_v46 }
 0x2e8   :  { %v458_v52 = vmul.f32 %v3843_v48, %v450_v49 }
 0x2e9   :  { %v4821_v53 = vpop.eup %4820 }
 0x2ea   :  { %v451_v54 = vmul.f32 %v4821_v53, %v445_v51  ;;  %v466_v55 = vadd.f32 %v3844_v50, %v458_v52 }
 0x2ec   :  { %v459_v58 = vmul.f32 %v3843_v48, %v451_v54  ;;  %4193 = vmatprep.mubr.msk.f32.mxu0 %vm420_vm2, %v466_v55  ;;  %4215 = vmatprep.mubr.msk.f32.mxu1 %vm420_vm2, %v466_v55 }
 0x2ee   :  { %v467_v59 = vadd.f32 %v3844_v50, %v459_v58 }
 0x2f0   :  { %4194 = vmatmul.mubr.msk.f32.vlgmr.msra.gmra.mrb[2].mxu0 %vm420_vm2, %v467_v59  ;;  %4216 = vmatmul.mubr.msk.f32.vlgmr.msra.gmra.mrb[0].mxu1 %vm420_vm2, %v467_v59 }
 0x2f1   :  { %4543 = vmatpush3.bf16.msra.mxu0 %v4540_v28  ;;  %4204 = vmatprep.mubr.msk.f32.mxu0 %vm420_vm2, %v466_v55 }
 0x2f2   :  { %4545 = vmatprep.subr.bf16.mxu0 %v4544_v60  ;;  %4567 = vmatpush3.bf16.msra.mxu1 %v5805_v31 }
 0x2f3   :  { %4569 = vmatprep.subr.bf16.mxu1 %v5834_v63 }
 0x2f5   :  { %4547 = vmatpush3.bf16.msra.mxu0 %v4544_v60 }
 0x2f6   :  { %4557 = vmatprep.subr.bf16.mxu0 %v5805_v31  ;;  %4571 = vmatpush3.bf16.msra.mxu1 %v5834_v63 }
 0x2f8   :  { %4205 = vmatmul.mubr.msk.f32.vlgmr.msra.gmra.mrb[4].mxu0 %vm420_vm2, %v467_v59 }
 0x2f9   :  { %4559 = vmatpush3.bf16.msra.mxu0 %v5805_v31 }
 0x2fa   :  { %4561 = vmatprep.subr.bf16.mxu0 %v5834_v63 }
 0x2fd   :  { %4563 = vmatpush3.bf16.msra.mxu0 %v5834_v63 }
 0x3c3   :  { %v4195_v3 = vpop.f32.mrb[2].mxu0  ;;  %v4217_v4 = vpop.f32.mrb[0].mxu1 }
 0x3c4   :  { %v729_v9 = vadd.f32 %v4217_v4, %v3851_v0  ;;  %v551_v10 = vpop.f32.mrb[3].mxu0  ;;  %v723_v11 = vpop.f32.mrb[1].mxu1  ;;  %v557_v15 = vadd.f32 %v4195_v3, %v3845_v1 }
 0x3c5   :  { %v552_v12 = vadd.f32 %v3845_v1, %v551_v10  ;;  %v724_v13 = vadd.f32 %v3851_v0, %v723_v11  ;;  %v5920_v10 = vld [vmem:[%s6438_s26] sm:$0xff] }
 0x3c6   :  { %v1119_v16 = vmul.f32 %v5840_v2, %v729_v9  ;;  %v916_v17 = vmul.f32 %v5842_v5, %v729_v9  ;;  %v1317_v18 = vmul.f32 %v5844_v8, %v729_v9  ;;  %v1515_v23 = vmul.f32 %v5846_v14, %v729_v9  ;;  %v5915_v9 = vld [vmem:[%s6438_s26 + $0x8] sm:$0xff] }
 0x3c7   :  { %4226 = vmatprep.mubr.msk.f32.mxu0 %vm420_vm2, %v552_v12  ;;  %v1118_v19 = vmul.f32 %v5840_v2, %v724_v13  ;;  %v915_v20 = vmul.f32 %v5842_v5, %v724_v13  ;;  %v1316_v21 = vmul.f32 %v5844_v8, %v724_v13  ;;  %v1514_v22 = vmul.f32 %v5846_v14, %v724_v13 }
 0x3c8   :  { %4227 = vmatmul.mubr.msk.f32.vlgmr.msra.gmra.mrb[6].mxu0 %vm420_vm2, %v557_v15  ;;  %v733_v39 = vmul.f32 %v557_v15, %v5864_v34  ;;  %v732_v42 = vmul.f32 %v552_v12, %v5868_v36 }
 0x3c9   :  { %v4588_v24 = vpack.c.bf16 %v1119_v16, %v1118_v19  ;;  %v4578_v25 = vpack.c.bf16 %v916_v17, %v915_v20  ;;  %v5858_v26 = vpack.c.bf16 %v1317_v18, %v1316_v21  ;;  %v5860_v28 = vpack.c.bf16 %v1515_v23, %v1514_v22 }
 0x3cb   :  { %v4206_v29 = vpop.f32.mrb[4].mxu0  ;;  %4589 = vmatprep.subr.bf16.mxu1 %v4588_v24 }
 0x3cc   :  { %v637_v30 = vpop.f32.mrb[5].mxu0  ;;  %v643_v33 = vadd.f32 %v4206_v29, %v3848_v27 }
 0x3cd   :  { %v638_v32 = vadd.f32 %v3848_v27, %v637_v30 }
 0x3ce   :  { %v820_v47 = vmul.f32 %v643_v33, %v5864_v34 }
 0x3cf   :  { %4237 = vmatprep.mubr.msk.f32.mxu1 %vm420_vm2, %v638_v32  ;;  %v819_v50 = vmul.f32 %v638_v32, %v5868_v36 }
 0x3d0   :  { %4238 = vmatmul.mubr.msk.f32.vlgmr.msra.gmra.mrb[2].mxu1 %vm420_vm2, %v643_v33 }
 0x3d1   :  { %4591 = vmatpush3.bf16.msra.mxu1 %v4588_v24 }
 0x49b   :  { %v4228_v38 = vpop.f32.mrb[6].mxu0 }
 0x49c   :  { %v816_v40 = vmul.f32 %v4228_v38, %v5866_v35  ;;  %v806_v41 = vpop.f32.mrb[7].mxu0 }
 0x49d   :  { %v815_v43 = vmul.f32 %v806_v41, %v5870_v37 }
 0x49e   :  { %v5876_v44 = vadd.f32 %v816_v40, %v733_v39 }
 0x49f   :  { %v5878_v45 = vadd.f32 %v815_v43, %v732_v42 }
 0x4a1   :  { %4244 = vmatprep.mubr.msk.f32.mxu0 %vm420_vm2, %v5878_v45 }
 0x4a3   :  { %v4239_v46 = vpop.f32.mrb[2].mxu1 }
 0x4a4   :  { %v903_v48 = vmul.f32 %v4239_v46, %v5866_v35  ;;  %v893_v49 = vpop.f32.mrb[3].mxu1 }
 0x4a5   :  { %v902_v51 = vmul.f32 %v893_v49, %v5870_v37 }
 0x4a6   :  { %v905_v52 = vadd.f32 %v903_v48, %v820_v47 }
 0x4a7   :  { %v904_v53 = vadd.f32 %v902_v51, %v819_v50 }
 0x4a8   :  { %v914_v54 = vmul.f32 %v5842_v5, %v905_v52  ;;  %v1315_v55 = vmul.f32 %v5844_v8, %v905_v52  ;;  %v1117_v56 = vmul.f32 %v5840_v2, %v905_v52  ;;  %v1513_v57 = vmul.f32 %v5846_v14, %v905_v52 }
 0x4a9   :  { %v913_v58 = vmul.f32 %v5842_v5, %v904_v53  ;;  %v1314_v59 = vmul.f32 %v5844_v8, %v904_v53  ;;  %v1116_v60 = vmul.f32 %v5840_v2, %v904_v53  ;;  %v1512_v61 = vmul.f32 %v5846_v14, %v904_v53 }
 0x4ab   :  { %v4572_v0 = vpack.c.bf16 %v914_v54, %v913_v58  ;;  %v4592_v1 = vpack.c.bf16 %v1315_v55, %v1314_v59  ;;  %v4582_v3 = vpack.c.bf16 %v1117_v56, %v1116_v60  ;;  %v5900_v4 = vpack.c.bf16 %v1513_v57, %v1512_v61 }
 0x4ad   :  { %4574 = vmatprep.subr.msk.bf16.mxu0 %vm5896_vm3, %v4572_v0  ;;  %4594 = vmatprep.subr.msk.bf16.mxu1 %vm5896_vm3, %v4592_v1 }
 0x4ae   :  { %4577 = vmatpush3.bf16.xpose.msk.msra.mxu0 %vm5896_vm3, %v4572_v0 }
 0x4af   :  { %4579 = vmatprep.subr.bf16.mxu0 %v4578_v25 }
 0x4b5   :  { %4245 = vmatmul.mubr.msk.f32.vlgmr.msra.gmra.mrb[8].mxu0 %vm420_vm2, %v5876_v44 }
 0x4b6   :  { %4581 = vmatpush3.bf16.msra.mxu0 %v4578_v25 }
 0x4b7   :  { %4584 = vmatprep.subr.msk.bf16.mxu0 %vm5896_vm3, %v4582_v3 }
 0x588   :  { %v4246_v11 = vpop.f32.mrb[8].mxu0 }
 0x589   :  { %v1001_v12 = vadd.f32 %v4246_v11, %v5915_v9  ;;  %v995_v13 = vpop.f32.mrb[9].mxu0 }
 0x58a   :  { %v996_v15 = vadd.f32 %v995_v13, %v5920_v10 }
 0x58b   :  { %v1008_v16 = vsel %vm1004_vm4, %v1001_v12, -inf }
 0x58c   :  { %1009 = vmax.xlane.f32.xlu1 %v1008_v16  ;;  %v1005_v17 = vsel %vm1004_vm4, %v996_v15, -inf }
 0x58d   :  { %1006 = vmax.xlane.f32.xlu0 %v1005_v17 }
 0x619   :  { %v1010_v18 = vpop.xlane.xlu1 %1009 }
 0x61a   :  { %v1012_v19 = vsub.f32 %v1001_v12, %v1010_v18  ;;  %v1007_v20 = vpop.xlane.xlu0 %1006 }
 0x61b   :  { %v1011_v21 = vsub.f32 %v996_v15, %v1007_v20 }
 0x61c   :  { %v1015_v22 = vmul.f32 1.442695, %v1012_v19 }
 0x61d   :  { %v1013_v23 = vmul.f32 1.442695, %v1011_v21 }
 0x61f   :  { %4822 = vpow2.f32 %v1013_v23 }
 0x620   :  { %4824 = vpow2.f32 %v1015_v22 }
 0x629   :  { %v5926_v24 = vpop.eup %4822 }
 0x62a   :  { %v5928_v25 = vpop.eup %4824  ;;  %4251 = vmatprep.mubr.msk.f32.mxu0 %vm1004_vm4, %v5926_v24 }
 0x62b   :  { %4252 = vmatmul.mubr.msk.f32.vlgmr.msra.gmra.mrb[10].mxu0 %vm1004_vm4, %v5928_v25  ;;  %v1020_v20 = vsel %vm1004_vm4, %v5928_v25, 0.0 }
 0x62c   :  { %4587 = vmatpush3.bf16.xpose.msk.msra.mxu0 %vm5896_vm3, %v4582_v3  ;;  %4258 = vmatprep.mubr.msk.f32.mxu0 %vm420_vm2, %v5878_v45 }
 0x62d   :  { %4599 = vmatprep.subr.bf16.mxu0 %v5858_v26 }
 0x633   :  { %4259 = vmatmul.mubr.msk.f32.vlgmr.msra.gmra.mrb[12].mxu0 %vm420_vm2, %v5876_v44 }
 0x634   :  { %4601 = vmatpush3.bf16.msra.mxu0 %v5858_v26 }
 0x635   :  { %4604 = vmatprep.subr.msk.bf16.mxu0 %vm5896_vm3, %v5900_v4 }
 0x6fe   :  { %v5945_v27 = vpop.f32.mrb[10].mxu0 }
 0x6ff   :  { %v5947_v29 = vpop.f32.mrb[11].mxu0 }
 0x706   :  { %v4260_v30 = vpop.f32.mrb[12].mxu0 }
 0x707   :  { %v1198_v32 = vadd.f32 %v4260_v30, %v5915_v9  ;;  %v1192_v33 = vpop.f32.mrb[13].mxu0 }
 0x708   :  { %v1193_v38 = vadd.f32 %v1192_v33, %v5920_v10 }
 0x709   :  { %v1204_v39 = vsel %vm1004_vm4, %v1198_v32, -inf }
 0x70a   :  { %1205 = vmax.xlane.f32.xlu1 %v1204_v39  ;;  %v1201_v40 = vsel %vm1004_vm4, %v1193_v38, -inf }
 0x70b   :  { %1202 = vmax.xlane.f32.xlu0 %v1201_v40 }
 0x797   :  { %v1206_v26 = vpop.xlane.xlu1 %1205 }
 0x798   :  { %v1208_v41 = vsub.f32 %v1198_v32, %v1206_v26  ;;  %v1203_v42 = vpop.xlane.xlu0 %1202 }
 0x799   :  { %v1207_v43 = vsub.f32 %v1193_v38, %v1203_v42 }
 0x79a   :  { %v1211_v46 = vmul.f32 1.442695, %v1208_v41 }
 0x79b   :  { %v1209_v47 = vmul.f32 1.442695, %v1207_v43 }
 0x79d   :  { %4826 = vpow2.f32 %v1209_v47 }
 0x79e   :  { %4828 = vpow2.f32 %v1211_v46 }
 0x7a7   :  { %v4827_v48 = vpop.eup %4826 }
 0x7a8   :  { %v4829_v49 = vpop.eup %4828  ;;  %4265 = vmatprep.mubr.msk.f32.mxu1 %vm1004_vm4, %v4827_v48 }
 0x7a9   :  { %4266 = vmatmul.mubr.msk.f32.vlgmr.msra.gmra.mrb[4].mxu1 %vm1004_vm4, %v4829_v49 }
 0x7aa   :  { %4597 = vmatpush3.bf16.xpose.msk.msra.mxu1 %vm5896_vm3, %v4592_v1  ;;  %4272 = vmatprep.mubr.msk.f32.mxu1 %vm420_vm2, %v5878_v45 }
 0x7ab   :  { %4609 = vmatprep.subr.bf16.mxu1 %v5860_v28 }
 0x7b1   :  { %4273 = vmatmul.mubr.msk.f32.vlgmr.msra.gmra.mrb[6].mxu1 %vm420_vm2, %v5876_v44 }
 0x7b2   :  { %4611 = vmatpush3.bf16.msra.mxu1 %v5860_v28 }
 0x87c   :  { %v5963_v50 = vpop.f32.mrb[4].mxu1 }
 0x87d   :  { %v5965_v51 = vpop.f32.mrb[5].mxu1 }
 0x884   :  { %v4274_v52 = vpop.f32.mrb[6].mxu1 }
 0x885   :  { %v1396_v53 = vadd.f32 %v4274_v52, %v5915_v9  ;;  %v1390_v54 = vpop.f32.mrb[7].mxu1 }
 0x886   :  { %v1391_v55 = vadd.f32 %v1390_v54, %v5920_v10 }
 0x887   :  { %v1402_v56 = vsel %vm1004_vm4, %v1396_v53, -inf }
 0x888   :  { %1403 = vmax.xlane.f32.xlu1 %v1402_v56  ;;  %v1399_v57 = vsel %vm1004_vm4, %v1391_v55, -inf }
 0x889   :  { %1400 = vmax.xlane.f32.xlu0 %v1399_v57 }
 0x915   :  { %v1404_v58 = vpop.xlane.xlu1 %1403 }
 0x916   :  { %v1406_v59 = vsub.f32 %v1396_v53, %v1404_v58  ;;  %v1401_v60 = vpop.xlane.xlu0 %1400 }
 0x917   :  { %v1405_v28 = vsub.f32 %v1391_v55, %v1401_v60 }
 0x918   :  { %v1409_v61 = vmul.f32 1.442695, %v1406_v59 }
 0x919   :  { %v1407_v0 = vmul.f32 1.442695, %v1405_v28 }
 0x91b   :  { %4830 = vpow2.f32 %v1407_v0 }
 0x91c   :  { %4832 = vpow2.f32 %v1409_v61 }
 0x925   :  { %v4831_v1 = vpop.eup %4830 }
 0x926   :  { %v4833_v3 = vpop.eup %4832  ;;  %4279 = vmatprep.mubr.msk.f32.mxu0 %vm1004_vm4, %v4831_v1  ;;  %v1411_v22 = vsel %vm1004_vm4, %v4831_v1, 0.0 }
 0x927   :  { %4280 = vmatmul.mubr.msk.f32.vlgmr.msra.gmra.mrb[14].mxu0 %vm1004_vm4, %v4833_v3  ;;  %v1414_v21 = vsel %vm1004_vm4, %v4833_v3, 0.0 }
 0x928   :  { %4607 = vmatpush3.bf16.xpose.msk.msra.mxu0 %vm5896_vm3, %v5900_v4  ;;  %4286 = vmatprep.mubr.msk.f32.mxu0 %vm420_vm2, %v5878_v45  ;;  %v1213_v4 = vsel %vm1004_vm4, %v4827_v48, 0.0  ;;  %v1216_v45 = vsel %vm1004_vm4, %v4829_v49, 0.0 }
 0x92f   :  { %4287 = vmatmul.mubr.msk.f32.vlgmr.msra.gmra.mrb[16].mxu0 %vm420_vm2, %v5876_v44  ;;  %v1017_v44 = vsel %vm1004_vm4, %v5926_v24, 0.0 }
 0x9fa   :  { %v4281_v11 = vpop.f32.mrb[14].mxu0 }
 0x9fb   :  { %v1489_v12 = vpop.f32.mrb[15].mxu0 }
 0xa02   :  { %v4288_v13 = vpop.f32.mrb[16].mxu0 }
 0xa03   :  { %v1594_v15 = vadd.f32 %v4288_v13, %v5915_v9  ;;  %v1588_v16 = vpop.f32.mrb[17].mxu0 }
 0xa04   :  { %v1589_v17 = vadd.f32 %v1588_v16, %v5920_v10 }
 0xa05   :  { %v1600_v18 = vsel %vm1004_vm4, %v1594_v15, -inf }
 0xa06   :  { %1601 = vmax.xlane.f32.xlu1 %v1600_v18  ;;  %v1597_v19 = vsel %vm1004_vm4, %v1589_v17, -inf }
 0xa07   :  { %1598 = vmax.xlane.f32.xlu0 %v1597_v19 }
 0xa0a   :  { %1214 = vadd.xlane.f32.xlu1 %v1213_v4 }
 0xa0b   :  { %1018 = vadd.xlane.f32.xlu0 %v1017_v44 }
 0xa0e   :  { %1217 = vadd.xlane.f32.xlu1 %v1216_v45 }
 0xa0f   :  { %1021 = vadd.xlane.f32.xlu0 %v1020_v20 }
 0xa12   :  { %1415 = vadd.xlane.f32.xlu1 %v1414_v21 }
 0xa13   :  { %1412 = vadd.xlane.f32.xlu0 %v1411_v22  ;;  %v3886_v22 = vld [vmem:[#allocation11] ss:$0 sm:$0xff] }
 0xa93   :  { %v1602_v23 = vpop.xlane.xlu1 %1601 }
 0xa94   :  { %v1604_v30 = vsub.f32 %v1594_v15, %v1602_v23  ;;  %v1599_v32 = vpop.xlane.xlu0 %1598 }
 0xa95   :  { %v1603_v33 = vsub.f32 %v1589_v17, %v1599_v32 }
 0xa96   :  { %v1607_v38 = vmul.f32 1.442695, %v1604_v30 }
 0xa97   :  { %v1605_v24 = vmul.f32 1.442695, %v1603_v33  ;;  %v1215_v39 = vpop.xlane.xlu1 %1214 }
 0xa98   :  { %4834 = vpow2.f32 %v1607_v38  ;;  %v1019_v40 = vpop.xlane.xlu0 %1018 }
 0xa99   :  { %4836 = vpow2.f32 %v1605_v24 }
 0xa9a   :  { %4838 = vrcp.f32 %v1215_v39 }
 0xa9b   :  { %4840 = vrcp.f32 %v1019_v40  ;;  %v1218_v25 = vpop.xlane.xlu1 %1217 }
 0xa9c   :  { %4842 = vrcp.f32 %v1218_v25  ;;  %v1022_v26 = vpop.xlane.xlu0 %1021 }
 0xa9d   :  { %4844 = vrcp.f32 %v1022_v26 }
 0xa9f   :  { %v1416_v41 = vpop.xlane.xlu1 %1415 }
 0xaa0   :  { %4846 = vrcp.f32 %v1416_v41  ;;  %v1413_v42 = vpop.xlane.xlu0 %1412  ;;  %v1844_v41 = vld [vmem:[%s6487_s29] sm:$0xff] }
 0xaa1   :  { %4848 = vrcp.f32 %v1413_v42  ;;  %v1845_v42 = vld [vmem:[%s6487_s29 + $0x8] sm:$0xff] }
 0xaa2   :  { %v4835_v43 = vpop.eup %4834 }
 0xaa3   :  { %v4837_v46 = vpop.eup %4836  ;;  %v1612_v47 = vsel %vm1004_vm4, %v4835_v43, 0.0 }
 0xaa4   :  { %v4839_v48 = vpop.eup %4838  ;;  %4293 = vmatprep.mubr.msk.f32.mxu1 %vm1004_vm4, %v4837_v46  ;;  %1613 = vadd.xlane.f32.xlu1 %v1612_v47  ;;  %v1609_v49 = vsel %vm1004_vm4, %v4837_v46, 0.0  ;;  %v4620_v46 = vpack.c.bf16 %v1845_v42, %v1844_v41  ;;  %v1847_v47 = vld [vmem:[%s6487_s29 + $0x18] sm:$0xff]  ;;  %v1958_v42 = vld [vmem:[%s6488_s25 + $0x60] sm:$0xff] }
 0xaa5   :  { %v4841_v52 = vpop.eup %4840  ;;  %4294 = vmatmul.mubr.msk.f32.vlgmr.msra.gmra.mrb[8].mxu1 %vm1004_vm4, %v4835_v43  ;;  %1610 = vadd.xlane.f32.xlu0 %v1609_v49  ;;  %v1302_v53 = vmul.f32 %v4839_v48, %v5965_v51  ;;  %v1702_v51 = vld [vmem:[%s6486_s15] sm:$0xff]  ;;  %v1846_v43 = vld [vmem:[%s6487_s29 + $0x10] sm:$0xff] }
 0xaa6   :  { %v4843_v54 = vpop.eup %4842  ;;  %v1106_v55 = vmul.f32 %v4841_v52, %v5947_v29  ;;  %v1703_v29 = vld [vmem:[%s6486_s15 + $0x8] sm:$0xff]  ;;  %v4624_v48 = vpack.c.bf16 %v1847_v47, %v1846_v43  ;;  %4621 = vmatprep.subr.bf16.mxu0 %v4620_v46  ;;  %v1946_v49 = vld [vmem:[%s6488_s25] sm:$0xff]  ;;  %v1960_v47 = vld [vmem:[%s6488_s25 + $0x70] sm:$0xff] }
 0xaa7   :  { %v4845_v56 = vpop.eup %4844  ;;  %v1303_v57 = vmul.f32 %v4843_v54, %v5963_v50  ;;  %v4612_v15 = vpack.c.bf16 %v1703_v29, %v1702_v51  ;;  %v1705_v50 = vld [vmem:[%s6486_s15 + $0x18] sm:$0xff]  ;;  %4623 = vmatpush3.bf16.msra.mxu0 %v4620_v46  ;;  %v1947_v52 = vld [vmem:[%s6488_s25 + $0x8] sm:$0xff] }
 0xaa8   :  { %v1107_v58 = vmul.f32 %v4845_v56, %v5945_v27  ;;  %v1304_v59 = vadd.f32 %v1302_v53, %v1106_v55  ;;  %v1704_v27 = vld [vmem:[%s6486_s15 + $0x10] sm:$0xff]  ;;  %4625 = vmatprep.subr.bf16.mxu0 %v4624_v48  ;;  %v4628_v54 = vpack.c.bf16 %v1947_v52, %v1946_v49  ;;  %v1949_v55 = vld [vmem:[%s6488_s25 + $0x18] sm:$0xff]  ;;  %v1959_v43 = vld [vmem:[%s6488_s25 + $0x68] sm:$0xff] }
 0xaa9   :  { %4613 = vmatprep.subr.bf16.mxu1 %v4612_v15  ;;  %v1948_v53 = vld [vmem:[%s6488_s25 + $0x10] sm:$0xff]  ;;  %v4652_v46 = vpack.c.bf16 %v1959_v43, %v1958_v42  ;;  %v3891_v52 = vld [vmem:[#allocation16] ss:$0 sm:$0xff] }
 0xaaa   :  { %v4847_v60 = vpop.eup %4846  ;;  %v1305_v28 = vadd.f32 %v1303_v57, %v1107_v58  ;;  %4615 = vmatpush3.bf16.msra.mxu1 %v4612_v15  ;;  %v4632_v56 = vpack.c.bf16 %v1949_v55, %v1948_v53  ;;  %v1950_v57 = vld [vmem:[%s6488_s25 + $0x20] sm:$0xff]  ;;  %v1951_v58 = vld [vmem:[%s6488_s25 + $0x28] sm:$0xff] }
 0xaab   :  { %v4849_v61 = vpop.eup %4848  ;;  %v1501_v0 = vmul.f32 %v4847_v60, %v4281_v11  ;;  %v4616_v11 = vpack.c.bf16 %v1705_v50, %v1704_v27  ;;  %4627 = vmatpush3.bf16.msra.mxu0 %v4624_v48  ;;  %v1961_v48 = vld [vmem:[%s6488_s25 + $0x78] sm:$0xff] }
 0xaac   :  { %v1500_v1 = vmul.f32 %v4849_v61, %v1489_v12  ;;  %v4656_v49 = vpack.c.bf16 %v1961_v48, %v1960_v47 }
 0xaad   :  { %v1503_v3 = vadd.f32 %v1501_v0, %v1305_v28  ;;  %4617 = vmatprep.subr.bf16.mxu1 %v4616_v11 }
 0xaae   :  { %v1502_v13 = vadd.f32 %v1500_v1, %v1304_v59  ;;  %4619 = vmatpush3.bf16.msra.mxu1 %v4616_v11  ;;  %v4636_v59 = vpack.c.bf16 %v1951_v58, %v1950_v57 }
 0xaaf   :  { %4629 = vmatprep.subr.bf16.mxu1 %v4628_v54 }
 0xb31   :  { %v1614_v12 = vpop.xlane.xlu1 %1613 }
 0xb32   :  { %v1611_v16 = vpop.xlane.xlu0 %1610  ;;  %4850 = vrcp.f32 %v1614_v12 }
 0xb33   :  { %4852 = vrcp.f32 %v1611_v16 }
 0xb3c   :  { %v4851_v17 = vpop.eup %4850 }
 0xb3d   :  { %v4853_v19 = vpop.eup %4852 }
 0xb78   :  { %v4295_v18 = vpop.f32.mrb[8].mxu1 }
 0xb79   :  { %v1699_v4 = vmul.f32 %v4851_v17, %v4295_v18  ;;  %v1687_v44 = vpop.f32.mrb[9].mxu1 }
 0xb7a   :  { %v1698_v45 = vmul.f32 %v4853_v19, %v1687_v44  ;;  %v3889_v19 = vld [vmem:[#allocation13] ss:$0 sm:$0xff] }
 0xb7b   :  { %v1701_v20 = vadd.f32 %v1699_v4, %v1503_v3 }
 0xb7c   :  { %v1700_v21 = vadd.f32 %v1698_v45, %v1502_v13 }
 0xb7e   :  { %4304 = vmatprep.mubr.msk.f32.mxu1 %vm420_vm2, %v1700_v21 }
 0xb7f   :  { %4305 = vmatmul.mubr.msk.f32.vlgmr.msra.gmra.mrb[10].mxu1 %vm420_vm2, %v1701_v20  ;;  %v3890_v20 = vld [vmem:[#allocation14] ss:$0 sm:$0xff] }
 0xb80   :  { %4631 = vmatpush3.bf16.msra.mxu1 %v4628_v54 }
 0xb81   :  { %4633 = vmatprep.subr.bf16.mxu1 %v4632_v56 }
 0xb84   :  { %4635 = vmatpush3.bf16.msra.mxu1 %v4632_v56 }
 0xb85   :  { %4637 = vmatprep.subr.bf16.mxu1 %v4636_v59 }
 0xb88   :  { %4639 = vmatpush3.bf16.msra.mxu1 %v4636_v59 }
 0xc52   :  { %v4306_v23 = vpop.f32.mrb[10].mxu1 }
 0xc53   :  { %v1791_v30 = vadd.f32 %v4306_v23, %v3886_v22  ;;  %v1785_v32 = vpop.f32.mrb[11].mxu1 }
 0xc54   :  { %v1786_v33 = vadd.f32 %v3886_v22, %v1785_v32  ;;  %v1952_v32 = vld [vmem:[%s6488_s25 + $0x30] sm:$0xff] }
 0xc55   :  { %v6015_v38 = vadd.f32 %v1791_v30, %v5755_v6 }
 0xc56   :  { %v6018_v24 = vadd.f32 %v1786_v33, %v5757_v7  ;;  %v1953_v33 = vld [vmem:[%s6488_s25 + $0x38] sm:$0xff] }
 0xc57   :  { %v1801_v39 = vsel %vm420_vm2, %v6015_v38, 0.0  ;;  %v1807_v40 = vmul.f32 %v6015_v38, %v6015_v38 }
 0xc58   :  { %1802 = vadd.xlane.f32.xlu1 %v1801_v39  ;;  %v1798_v25 = vsel %vm420_vm2, %v6018_v24, 0.0  ;;  %v1806_v26 = vmul.f32 %v6018_v24, %v6018_v24  ;;  %v4640_v39 = vpack.c.bf16 %v1953_v33, %v1952_v32 }
 0xc59   :  { %1799 = vadd.xlane.f32.xlu0 %v1798_v25  ;;  %v1811_v6 = vsel %vm420_vm2, %v1807_v40, 0.0  ;;  %v1954_v40 = vld [vmem:[%s6488_s25 + $0x40] sm:$0xff]  ;;  %v1955_v25 = vld [vmem:[%s6488_s25 + $0x48] sm:$0xff] }
 0xc5a   :  { %v1808_v7 = vsel %vm420_vm2, %v1806_v26, 0.0  ;;  %4641 = vmatprep.subr.bf16.mxu1 %v4640_v39  ;;  %v4644_v26 = vpack.c.bf16 %v1955_v25, %v1954_v40 }
 0xc5b   :  { %4643 = vmatpush3.bf16.msra.mxu1 %v4640_v39 }
 0xc5c   :  { %1812 = vadd.xlane.f32.xlu1 %v1811_v6  ;;  %4645 = vmatprep.subr.bf16.mxu1 %v4644_v26  ;;  %v1956_v6 = vld [vmem:[%s6488_s25 + $0x50] sm:$0xff] }
 0xc5d   :  { %1809 = vadd.xlane.f32.xlu0 %v1808_v7  ;;  %v1957_v7 = vld [vmem:[%s6488_s25 + $0x58] sm:$0xff] }
 0xc5e   :  { %v4648_v41 = vpack.c.bf16 %v1957_v7, %v1956_v6 }
 0xc5f   :  { %4647 = vmatpush3.bf16.msra.mxu1 %v4644_v26 }
 0xc60   :  { %4649 = vmatprep.subr.bf16.mxu1 %v4648_v41 }
 0xc63   :  { %4651 = vmatpush3.bf16.msra.mxu1 %v4648_v41 }
 0xc64   :  { %4653 = vmatprep.subr.bf16.mxu1 %v4652_v46 }
 0xc67   :  { %4655 = vmatpush3.bf16.msra.mxu1 %v4652_v46 }
 0xc68   :  { %4657 = vmatprep.subr.bf16.mxu1 %v4656_v49 }
 0xc6b   :  { %4659 = vmatpush3.bf16.msra.mxu1 %v4656_v49 }
 0xc6c   :  { %4693 = vmatprep.subr.bf16.mxu1 %v5805_v31 }
 0xce5   :  { %v1803_v60 = vpop.xlane.xlu1 %1802 }
 0xce6   :  { %v1805_v28 = vmul.f32 0.03125, %v1803_v60  ;;  %v1800_v61 = vpop.xlane.xlu0 %1799 }
 0xce7   :  { %v1804_v0 = vmul.f32 0.03125, %v1800_v61 }
 0xce8   :  { %v1817_v3 = vmul.f32 %v1805_v28, %v1805_v28  ;;  %v1821_v16 = vsub.f32 %v6015_v38, %v1805_v28 }
 0xce9   :  { %v1813_v1 = vpop.xlane.xlu1 %1812  ;;  %v1816_v29 = vmul.f32 %v1804_v0, %v1804_v0  ;;  %v1820_v18 = vsub.f32 %v6018_v24, %v1804_v0 }
 0xcea   :  { %v1815_v13 = vmul.f32 0.03125, %v1813_v1  ;;  %v1810_v51 = vpop.xlane.xlu0 %1809 }
 0xceb   :  { %v1814_v15 = vmul.f32 0.03125, %v1810_v51 }
 0xcec   :  { %v1819_v27 = vsub.f32 %v1815_v13, %v1817_v3 }
 0xced   :  { %v1818_v50 = vsub.f32 %v1814_v15, %v1816_v29  ;;  %v3894_v29 = vld [vmem:[#allocation17] ss:$0 sm:$0xff] }
 0xcee   :  { %v1823_v11 = vadd.f32 1e-05, %v1819_v27 }
 0xcef   :  { %v1822_v12 = vadd.f32 1e-05, %v1818_v50 }
 0xcf0   :  { %4854 = vrsqrt.f32 %v1823_v11 }
 0xcf1   :  { %4856 = vrsqrt.f32 %v1822_v12 }
 0xcfa   :  { %v4855_v17 = vpop.eup %4854 }
 0xcfb   :  { %v4857_v4 = vpop.eup %4856  ;;  %v1827_v44 = vmul.f32 %v4855_v17, %v1821_v16 }
 0xcfc   :  { %v1826_v45 = vmul.f32 %v4857_v4, %v1820_v18  ;;  %v3898_v4 = vld [vmem:[%s6480_s16 + $0x20] sm:$0xff] }
 0xcfd   :  { %v1835_v21 = vmul.f32 %v3889_v19, %v1827_v44  ;;  %v3899_v44 = vld [vmem:[%s6480_s16 + $0x28] sm:$0xff] }
 0xcfe   :  { %v1834_v22 = vmul.f32 %v3889_v19, %v1826_v45  ;;  %v3900_v45 = vld [vmem:[%s6480_s16 + $0x30] sm:$0xff] }
 0xcff   :  { %v1843_v30 = vadd.f32 %v3890_v20, %v1835_v21  ;;  %v3901_v21 = vld [vmem:[%s6480_s16 + $0x38] sm:$0xff] }
 0xd00   :  { %v1842_v23 = vadd.f32 %v3890_v20, %v1834_v22  ;;  %v4660_v20 = vpack.c.bf16 %v3899_v44, %v3898_v4  ;;  %v4664_v22 = vpack.c.bf16 %v3901_v21, %v3900_v45  ;;  %v3909_v4 = vld [vmem:[#allocation8 + $0x1] ss:$0 sm:$0xff] }
 0xd02   :  { %4315 = vmatprep.mubr.msk.f32.mxu0 %vm420_vm2, %v1842_v23  ;;  %4661 = vmatprep.subr.bf16.mxu0 %v4660_v20  ;;  %v3905_v23 = vld [vmem:[%s6482_s7 + $0x20] sm:$0xff] }
 0xd03   :  { %4316 = vmatmul.mubr.msk.f32.vlgmr.msra.gmra.mrb[18].mxu0 %vm420_vm2, %v1843_v30  ;;  %v3906_v30 = vld [vmem:[%s6482_s7 + $0x28] sm:$0xff] }
 0xd04   :  { %4663 = vmatpush3.bf16.msra.mxu0 %v4660_v20  ;;  %v4668_v32 = vpack.c.bf16 %v3906_v30, %v3905_v23 }
 0xd05   :  { %4665 = vmatprep.subr.bf16.mxu0 %v4664_v22 }
 0xd08   :  { %4667 = vmatpush3.bf16.msra.mxu0 %v4664_v22 }
 0xd09   :  { %4669 = vmatprep.subr.bf16.mxu0 %v4668_v32 }
 0xdd6   :  { %v4317_v53 = vpop.f32.mrb[18].mxu0 }
 0xdd7   :  { %v1933_v54 = vadd.f32 %v4317_v53, %v3891_v52  ;;  %v1927_v55 = vpop.f32.mrb[19].mxu0 }
 0xdd8   :  { %v1928_v56 = vadd.f32 %v3891_v52, %v1927_v55  ;;  %v3896_v55 = vld [vmem:[%s6483_s1 + $0x1] ss:$0 sm:$0xff] }
 0xdd9   :  { %v1939_v57 = vmul.f32 0.70710677, %v1933_v54  ;;  %v1937_v1 = vmul.f32 0.5, %v1933_v54 }
 0xdda   :  { %v1938_v58 = vmul.f32 0.70710677, %v1928_v56  ;;  %v1936_v61 = vmul.f32 0.5, %v1928_v56 }
 0xddb   :  { %4858 = verf.f32 %v1939_v57 }
 0xddc   :  { %4860 = verf.f32 %v1938_v58 }
 0xde5   :  { %v4859_v59 = vpop.eup %4858 }
 0xde6   :  { %v4861_v60 = vpop.eup %4860  ;;  %v1943_v28 = vadd.f32 1.0, %v4859_v59  ;;  %v3897_v59 = vld [vmem:[#allocation5 + $0x1] ss:$0 sm:$0xff] }
 0xde7   :  { %v1942_v0 = vadd.f32 1.0, %v4861_v60 }
 0xde8   :  { %v1945_v13 = vmul.f32 %v1943_v28, %v1937_v1 }
 0xde9   :  { %v1944_v3 = vmul.f32 %v1942_v0, %v1936_v61  ;;  %v3907_v61 = vld [vmem:[%s6482_s7 + $0x30] sm:$0xff]  ;;  %v3908_v0 = vld [vmem:[%s6482_s7 + $0x38] sm:$0xff] }
 0xdeb   :  { %4350 = vmatprep.mubr.f32.mxu1 %v1944_v3 }
 0xdec   :  { %4351 = vmatmul.mubr.f32.vlgmr.msra.gmra.mrb[12].mxu1 %v1945_v13  ;;  %v4672_v13 = vpack.c.bf16 %v3908_v0, %v3907_v61 }
 0xded   :  { %4695 = vmatpush3.bf16.msra.mxu1 %v5805_v31 }
 0xdee   :  { %4697 = vmatprep.subr.bf16.mxu1 %v5834_v63 }
 0xdf1   :  { %4699 = vmatpush3.bf16.msra.mxu1 %v5834_v63 }
 0xebf   :  { %v4352_v51 = vpop.f32.mrb[12].mxu1 }
 0xec0   :  { %v2038_v15 = vadd.f32 %v4352_v51, %v6015_v38  ;;  %v2028_v27 = vpop.f32.mrb[13].mxu1  ;;  %v3912_v51 = vld [vmem:[%s6481_s8 + $0x20] sm:$0xff] }
 0xec1   :  { %v2037_v50 = vadd.f32 %v2028_v27, %v6018_v24  ;;  %v3914_v27 = vld [vmem:[%s6481_s8 + $0x30] sm:$0xff] }
 0xec2   :  { %v6100_v11 = vadd.f32 %v3894_v29, %v2038_v15 }
 0xec3   :  { %v6102_v12 = vadd.f32 %v3894_v29, %v2037_v50  ;;  %v3913_v29 = vld [vmem:[%s6481_s8 + $0x28] sm:$0xff]  ;;  %v3915_v50 = vld [vmem:[%s6481_s8 + $0x38] sm:$0xff] }
 0xec4   :  { %v2055_v16 = vsel %vm420_vm2, %v6100_v11, 0.0  ;;  %v2061_v17 = vmul.f32 %v6100_v11, %v6100_v11  ;;  %v4676_v15 = vpack.c.bf16 %v3913_v29, %v3912_v51 }
 0xec5   :  { %2056 = vadd.xlane.f32.xlu1 %v2055_v16  ;;  %v2052_v18 = vsel %vm420_vm2, %v6102_v12, 0.0  ;;  %v2060_v38 = vmul.f32 %v6102_v12, %v6102_v12  ;;  %v4680_v16 = vpack.c.bf16 %v3915_v50, %v3914_v27 }
 0xec6   :  { %2053 = vadd.xlane.f32.xlu0 %v2052_v18  ;;  %v2065_v24 = vsel %vm420_vm2, %v2061_v17, 0.0  ;;  %v3902_v17 = vld [vmem:[#allocation7 + $0x1] ss:$0 sm:$0xff] }
 0xec7   :  { %v2062_v19 = vsel %vm420_vm2, %v2060_v38, 0.0 }
 0xec9   :  { %2066 = vadd.xlane.f32.xlu1 %v2065_v24 }
 0xeca   :  { %2063 = vadd.xlane.f32.xlu0 %v2062_v19 }
 0xf52   :  { %v2057_v33 = vpop.xlane.xlu1 %2056 }
 0xf53   :  { %v2059_v39 = vmul.f32 0.03125, %v2057_v33  ;;  %v2054_v40 = vpop.xlane.xlu0 %2053 }
 0xf54   :  { %v2058_v25 = vmul.f32 0.03125, %v2054_v40 }
 0xf55   :  { %v2071_v6 = vmul.f32 %v2059_v39, %v2059_v39  ;;  %v2075_v52 = vsub.f32 %v6100_v11, %v2059_v39 }
 0xf56   :  { %v2067_v26 = vpop.xlane.xlu1 %2066  ;;  %v2070_v42 = vmul.f32 %v2058_v25, %v2058_v25  ;;  %v2074_v54 = vsub.f32 %v6102_v12, %v2058_v25 }
 0xf57   :  { %v2069_v7 = vmul.f32 0.03125, %v2067_v26  ;;  %v2064_v41 = vpop.xlane.xlu0 %2063 }
 0xf58   :  { %v2068_v43 = vmul.f32 0.03125, %v2064_v41 }
 0xf59   :  { %v2073_v46 = vsub.f32 %v2069_v7, %v2071_v6 }
 0xf5a   :  { %v2072_v47 = vsub.f32 %v2068_v43, %v2070_v42 }
 0xf5b   :  { %v2077_v48 = vadd.f32 1e-05, %v2073_v46 }
 0xf5c   :  { %v2076_v49 = vadd.f32 1e-05, %v2072_v47 }
 0xf5d   :  { %4862 = vrsqrt.f32 %v2077_v48 }
 0xf5e   :  { %4864 = vrsqrt.f32 %v2076_v49 }
 0xf67   :  { %v4863_v53 = vpop.eup %4862 }
 0xf68   :  { %v4865_v56 = vpop.eup %4864  ;;  %v2081_v57 = vmul.f32 %v4863_v53, %v2075_v52 }
 0xf69   :  { %v2080_v58 = vmul.f32 %v4865_v56, %v2074_v54 }
 0xf6a   :  { %v2089_v60 = vmul.f32 %v3896_v55, %v2081_v57 }
 0xf6b   :  { %v2088_v28 = vmul.f32 %v3896_v55, %v2080_v58 }
 0xf6c   :  { %v2097_v3 = vadd.f32 %v3897_v59, %v2089_v60 }
 0xf6d   :  { %v2096_v1 = vadd.f32 %v3897_v59, %v2088_v28 }
 0xf6f   :  { %4361 = vmatprep.mubr.msk.f32.mxu0 %vm420_vm2, %v2096_v1 }
 0xf70   :  { %4362 = vmatmul.mubr.msk.f32.vlgmr.msra.gmra.mrb[20].mxu0 %vm420_vm2, %v2097_v3 }
 0xf71   :  { %4671 = vmatpush3.bf16.msra.mxu0 %v4668_v32  ;;  %4372 = vmatprep.mubr.msk.f32.mxu0 %vm420_vm2, %v2096_v1 }
 0xf72   :  { %4673 = vmatprep.subr.bf16.mxu0 %v4672_v13 }
 0xf75   :  { %4675 = vmatpush3.bf16.msra.mxu0 %v4672_v13 }
 0xf76   :  { %4677 = vmatprep.subr.bf16.mxu0 %v4676_v15 }
 0xf78   :  { %4373 = vmatmul.mubr.msk.f32.vlgmr.msra.gmra.mrb[22].mxu0 %vm420_vm2, %v2097_v3 }
 0xf79   :  { %4679 = vmatpush3.bf16.msra.mxu0 %v4676_v15  ;;  %4383 = vmatprep.mubr.msk.f32.mxu0 %vm420_vm2, %v2096_v1 }
 0xf7a   :  { %4681 = vmatprep.subr.bf16.mxu0 %v4680_v16 }
 0xf7d   :  { %4683 = vmatpush3.bf16.msra.mxu0 %v4680_v16 }
 0xf7e   :  { %4685 = vmatprep.subr.bf16.mxu0 %v5805_v31 }
 0xf80   :  { %4384 = vmatmul.mubr.msk.f32.vlgmr.msra.gmra.mrb[24].mxu0 %vm420_vm2, %v2097_v3 }
 0xf81   :  { %4687 = vmatpush3.bf16.msra.mxu0 %v5805_v31  ;;  %v3916_v31 = vld [vmem:[#allocation10 + $0x1] ss:$0 sm:$0xff] }
 0xf82   :  { %4689 = vmatprep.subr.bf16.mxu0 %v5834_v63 }
 0xf85   :  { %4691 = vmatpush3.bf16.msra.mxu0 %v5834_v63 }
0x1043   :  { %v4363_v18 = vpop.f32.mrb[20].mxu0 }
0x1044   :  { %v2183_v38 = vpop.f32.mrb[21].mxu0  ;;  %v2189_v19 = vadd.f32 %v4363_v18, %v3902_v17 }
0x1045   :  { %v2184_v24 = vadd.f32 %v3902_v17, %v2183_v38 }
0x1046   :  { %v2369_v48 = vmul.f32 %v2189_v19, %v5864_v34 }
0x1047   :  { %4394 = vmatprep.mubr.msk.f32.mxu0 %vm420_vm2, %v2184_v24  ;;  %v2368_v53 = vmul.f32 %v2184_v24, %v5868_v36 }
0x1048   :  { %4395 = vmatmul.mubr.msk.f32.vlgmr.msra.gmra.mrb[26].mxu0 %vm420_vm2, %v2189_v19 }
0x104b   :  { %v4374_v44 = vpop.f32.mrb[22].mxu0 }
0x104c   :  { %v2271_v45 = vpop.f32.mrb[23].mxu0  ;;  %v2277_v21 = vadd.f32 %v4374_v44, %v3909_v4 }
0x104d   :  { %v2272_v20 = vadd.f32 %v3909_v4, %v2271_v45 }
0x104e   :  { %v2456_v58 = vmul.f32 %v2277_v21, %v5864_v34 }
0x104f   :  { %4405 = vmatprep.mubr.msk.f32.mxu1 %vm420_vm2, %v2272_v20  ;;  %v2455_v28 = vmul.f32 %v2272_v20, %v5868_v36 }
0x1050   :  { %4406 = vmatmul.mubr.msk.f32.vlgmr.msra.gmra.mrb[14].mxu1 %vm420_vm2, %v2277_v21 }
0x1053   :  { %v4385_v63 = vpop.f32.mrb[24].mxu0 }
0x1054   :  { %v2365_v22 = vadd.f32 %v4385_v63, %v3916_v31  ;;  %v2359_v23 = vpop.f32.mrb[25].mxu0 }
0x1055   :  { %v2360_v30 = vadd.f32 %v3916_v31, %v2359_v23 }
0x1056   :  { %v2545_v32 = vmul.f32 %v5842_v5, %v2365_v22  ;;  %v2739_v33 = vmul.f32 %v5840_v2, %v2365_v22  ;;  %v2929_v39 = vmul.f32 %v5844_v8, %v2365_v22  ;;  %v3119_v40 = vmul.f32 %v5846_v14, %v2365_v22 }
0x1057   :  { %v2544_v25 = vmul.f32 %v5842_v5, %v2360_v30  ;;  %v2738_v26 = vmul.f32 %v5840_v2, %v2360_v30  ;;  %v2928_v6 = vmul.f32 %v5844_v8, %v2360_v30  ;;  %v3118_v7 = vmul.f32 %v5846_v14, %v2360_v30 }
0x1059   :  { %v4706_v41 = vpack.c.bf16 %v2545_v32, %v2544_v25  ;;  %v6177_v42 = vpack.c.bf16 %v2739_v33, %v2738_v26  ;;  %v4726_v43 = vpack.c.bf16 %v2929_v39, %v2928_v6  ;;  %v6179_v46 = vpack.c.bf16 %v3119_v40, %v3118_v7 }
0x105b   :  { %4707 = vmatprep.subr.bf16.mxu1 %v4706_v41 }
0x105c   :  { %4709 = vmatpush3.bf16.msra.mxu1 %v4706_v41 }
0x105d   :  { %4717 = vmatprep.subr.bf16.mxu1 %v6177_v42 }
0x111b   :  { %v4396_v47 = vpop.f32.mrb[26].mxu0 }
0x111c   :  { %v2452_v49 = vmul.f32 %v4396_v47, %v5866_v35  ;;  %v2442_v52 = vpop.f32.mrb[27].mxu0 }
0x111d   :  { %v2451_v54 = vmul.f32 %v2442_v52, %v5870_v37 }
0x111e   :  { %v6186_v55 = vadd.f32 %v2452_v49, %v2369_v48 }
0x111f   :  { %v6188_v56 = vadd.f32 %v2451_v54, %v2368_v53 }
0x1121   :  { %4412 = vmatprep.mubr.msk.f32.mxu0 %vm420_vm2, %v6188_v56 }
0x1123   :  { %v4407_v57 = vpop.f32.mrb[14].mxu1 }
0x1124   :  { %v2539_v59 = vmul.f32 %v4407_v57, %v5866_v35  ;;  %v2529_v60 = vpop.f32.mrb[15].mxu1 }
0x1125   :  { %v2538_v61 = vmul.f32 %v2529_v60, %v5870_v37 }
0x1126   :  { %v2541_v0 = vadd.f32 %v2539_v59, %v2456_v58 }
0x1127   :  { %v2540_v1 = vadd.f32 %v2538_v61, %v2455_v28 }
0x1128   :  { %v2543_v3 = vmul.f32 %v5842_v5, %v2541_v0  ;;  %v2737_v13 = vmul.f32 %v5840_v2, %v2541_v0  ;;  %v3117_v51 = vmul.f32 %v5846_v14, %v2541_v0  ;;  %v2927_v29 = vmul.f32 %v5844_v8, %v2541_v0 }
0x1129   :  { %v2542_v15 = vmul.f32 %v5842_v5, %v2540_v1  ;;  %v2736_v34 = vmul.f32 %v5840_v2, %v2540_v1  ;;  %v3116_v35 = vmul.f32 %v5846_v14, %v2540_v1  ;;  %v2926_v36 = vmul.f32 %v5844_v8, %v2540_v1 }
0x112b   :  { %v4700_v27 = vpack.c.bf16 %v2543_v3, %v2542_v15  ;;  %v4710_v37 = vpack.c.bf16 %v2737_v13, %v2736_v34  ;;  %v6204_v50 = vpack.c.bf16 %v3117_v51, %v3116_v35  ;;  %v4720_v16 = vpack.c.bf16 %v2927_v29, %v2926_v36  ;;  %v4918_v51 = vld [vmem:[%s6438_s26 + $0x8] sm:$0xff] }
0x112d   :  { %4702 = vmatprep.subr.msk.bf16.mxu0 %vm5896_vm3, %v4700_v27 }
0x112e   :  { %4705 = vmatpush3.bf16.xpose.msk.msra.mxu0 %vm5896_vm3, %v4700_v27 }
0x112f   :  { %4712 = vmatprep.subr.msk.bf16.mxu0 %vm5896_vm3, %v4710_v37 }
0x1135   :  { %4413 = vmatmul.mubr.msk.f32.vlgmr.msra.gmra.mrb[28].mxu0 %vm420_vm2, %v6186_v55 }
0x1136   :  { %4715 = vmatpush3.bf16.xpose.msk.msra.mxu0 %vm5896_vm3, %v4710_v37  ;;  %4426 = vmatprep.mubr.msk.f32.mxu0 %vm420_vm2, %v6188_v56 }
0x1137   :  { %4727 = vmatprep.subr.bf16.mxu0 %v4726_v43 }
0x113d   :  { %4427 = vmatmul.mubr.msk.f32.vlgmr.msra.gmra.mrb[30].mxu0 %vm420_vm2, %v6186_v55 }
0x113e   :  { %4729 = vmatpush3.bf16.msra.mxu0 %v4726_v43 }
0x113f   :  { %4732 = vmatprep.subr.msk.bf16.mxu0 %vm5896_vm3, %v6204_v50 }
0x1208   :  { %v4414_v2 = vpop.f32.mrb[28].mxu0 }
0x1209   :  { %v2630_v5 = vadd.f32 %v4414_v2, %v5915_v9  ;;  %v2624_v8 = vpop.f32.mrb[29].mxu0 }
0x120a   :  { %v2625_v14 = vadd.f32 %v2624_v8, %v5920_v10 }
0x120b   :  { %v2636_v17 = vsel %vm1004_vm4, %v2630_v5, -inf }
0x120c   :  { %2637 = vmax.xlane.f32.xlu1 %v2636_v17  ;;  %v2633_v18 = vsel %vm1004_vm4, %v2625_v14, -inf }
0x120d   :  { %2634 = vmax.xlane.f32.xlu0 %v2633_v18 }
0x1210   :  { %v4428_v38 = vpop.f32.mrb[30].mxu0 }
0x1211   :  { %v2818_v24 = vadd.f32 %v4428_v38, %v5915_v9  ;;  %v2812_v19 = vpop.f32.mrb[31].mxu0 }
0x1212   :  { %v2813_v4 = vadd.f32 %v2812_v19, %v5920_v10 }
0x1213   :  { %v2824_v44 = vsel %vm1004_vm4, %v2818_v24, -inf }
0x1214   :  { %2825 = vmax.xlane.f32.xlu1 %v2824_v44  ;;  %v2821_v45 = vsel %vm1004_vm4, %v2813_v4, -inf }
0x1215   :  { %2822 = vmax.xlane.f32.xlu0 %v2821_v45 }
0x1299   :  { %v2638_v20 = vpop.xlane.xlu1 %2637 }
0x129a   :  { %v2640_v21 = vsub.f32 %v2630_v5, %v2638_v20  ;;  %v2635_v31 = vpop.xlane.xlu0 %2634 }
0x129b   :  { %v2639_v63 = vsub.f32 %v2625_v14, %v2635_v31 }
0x129c   :  { %v2643_v22 = vmul.f32 1.442695, %v2640_v21 }
0x129d   :  { %v2641_v23 = vmul.f32 1.442695, %v2639_v63 }
0x129f   :  { %4866 = vpow2.f32 %v2641_v23 }
0x12a0   :  { %4868 = vpow2.f32 %v2643_v22 }
0x12a1   :  { %v2826_v30 = vpop.xlane.xlu1 %2825 }
0x12a2   :  { %v2828_v32 = vsub.f32 %v2818_v24, %v2826_v30  ;;  %v2823_v33 = vpop.xlane.xlu0 %2822 }
0x12a3   :  { %v2827_v39 = vsub.f32 %v2813_v4, %v2823_v33 }
0x12a4   :  { %v2831_v40 = vmul.f32 1.442695, %v2828_v32 }
0x12a5   :  { %v2829_v25 = vmul.f32 1.442695, %v2827_v39 }
0x12a7   :  { %4870 = vpow2.f32 %v2829_v25 }
0x12a8   :  { %4872 = vpow2.f32 %v2831_v40 }
0x12a9   :  { %v4867_v26 = vpop.eup %4866 }
0x12aa   :  { %v4869_v6 = vpop.eup %4868  ;;  %4419 = vmatprep.mubr.msk.f32.mxu1 %vm1004_vm4, %v4867_v26  ;;  %v2645_v36 = vsel %vm1004_vm4, %v4867_v26, 0.0 }
0x12ab   :  { %4420 = vmatmul.mubr.msk.f32.vlgmr.msra.gmra.mrb[16].mxu1 %vm1004_vm4, %v4869_v6  ;;  %v2648_v37 = vsel %vm1004_vm4, %v4869_v6, 0.0 }
0x12ac   :  { %4719 = vmatpush3.bf16.msra.mxu1 %v6177_v42 }
0x12ad   :  { %4722 = vmatprep.subr.msk.bf16.mxu1 %vm5896_vm3, %v4720_v16 }
0x12b1   :  { %v4871_v7 = vpop.eup %4870 }
0x12b2   :  { %v4873_v41 = vpop.eup %4872  ;;  %4433 = vmatprep.mubr.msk.f32.mxu1 %vm1004_vm4, %v4871_v7  ;;  %v2833_v35 = vsel %vm1004_vm4, %v4871_v7, 0.0 }
0x12b3   :  { %4434 = vmatmul.mubr.msk.f32.vlgmr.msra.gmra.mrb[18].mxu1 %vm1004_vm4, %v4873_v41  ;;  %v2836_v27 = vsel %vm1004_vm4, %v4873_v41, 0.0 }
0x12b4   :  { %4440 = vmatprep.mubr.msk.f32.mxu1 %vm420_vm2, %v6188_v56 }
0x12b5   :  { %4725 = vmatpush3.bf16.xpose.msk.msra.mxu1 %vm5896_vm3, %v4720_v16 }
0x12b6   :  { %4737 = vmatprep.subr.bf16.mxu1 %v6179_v46 }
0x12bc   :  { %4441 = vmatmul.mubr.msk.f32.vlgmr.msra.gmra.mrb[20].mxu1 %vm420_vm2, %v6186_v55 }
0x12bd   :  { %4739 = vmatpush3.bf16.msra.mxu1 %v6179_v46 }
0x137e   :  { %v6246_v42 = vpop.f32.mrb[16].mxu1 }
0x137f   :  { %v6248_v43 = vpop.f32.mrb[17].mxu1 }
0x1386   :  { %v6250_v47 = vpop.f32.mrb[18].mxu1 }
0x1387   :  { %v6252_v48 = vpop.f32.mrb[19].mxu1 }
0x138f   :  { %v4442_v49 = vpop.f32.mrb[20].mxu1 }
0x1390   :  { %v3008_v52 = vadd.f32 %v4442_v49, %v5915_v9  ;;  %v3002_v53 = vpop.f32.mrb[21].mxu1 }
0x1391   :  { %v3003_v54 = vadd.f32 %v3002_v53, %v5920_v10 }
0x1392   :  { %v3014_v57 = vsel %vm1004_vm4, %v3008_v52, -inf }
0x1393   :  { %3015 = vmax.xlane.f32.xlu1 %v3014_v57  ;;  %v3011_v58 = vsel %vm1004_vm4, %v3003_v54, -inf  ;;  %v3950_v57 = vld [vmem:[%s6486_s15 + $0x38] sm:$0xff] }
0x1394   :  { %3012 = vmax.xlane.f32.xlu0 %v3011_v58 }
0x1420   :  { %v3016_v46 = vpop.xlane.xlu1 %3015 }
0x1421   :  { %v3018_v59 = vsub.f32 %v3008_v52, %v3016_v46  ;;  %v3013_v60 = vpop.xlane.xlu0 %3012 }
0x1422   :  { %v3017_v28 = vsub.f32 %v3003_v54, %v3013_v60 }
0x1423   :  { %v3021_v61 = vmul.f32 1.442695, %v3018_v59 }
0x1424   :  { %v3019_v0 = vmul.f32 1.442695, %v3017_v28 }
0x1426   :  { %4874 = vpow2.f32 %v3019_v0 }
0x1427   :  { %4876 = vpow2.f32 %v3021_v61 }
0x1430   :  { %v4875_v1 = vpop.eup %4874 }
0x1431   :  { %v4877_v3 = vpop.eup %4876  ;;  %4447 = vmatprep.mubr.msk.f32.mxu0 %vm1004_vm4, %v4875_v1  ;;  %v3023_v16 = vsel %vm1004_vm4, %v4875_v1, 0.0 }
0x1432   :  { %4448 = vmatmul.mubr.msk.f32.vlgmr.msra.gmra.mrb[32].mxu0 %vm1004_vm4, %v4877_v3 }
0x1433   :  { %4735 = vmatpush3.bf16.xpose.msk.msra.mxu0 %vm5896_vm3, %v6204_v50  ;;  %4454 = vmatprep.mubr.msk.f32.mxu0 %vm420_vm2, %v6188_v56  ;;  %v3026_v50 = vsel %vm1004_vm4, %v4877_v3, 0.0 }
0x143a   :  { %4455 = vmatmul.mubr.msk.f32.vlgmr.msra.gmra.mrb[34].mxu0 %vm420_vm2, %v6186_v55 }
0x1505   :  { %v6267_v9 = vpop.f32.mrb[32].mxu0 }
0x1506   :  { %v6269_v10 = vpop.f32.mrb[33].mxu0 }
0x150d   :  { %v4456_v13 = vpop.f32.mrb[34].mxu0 }
0x150e   :  { %v3198_v29 = vadd.f32 %v4918_v51, %v4456_v13  ;;  %v3192_v15 = vpop.f32.mrb[35].mxu0  ;;  %v3951_v13 = vld [vmem:[#allocation11 + $0x1] ss:$0 sm:$0xff] }
0x150f   :  { %v3193_v34 = vadd.f32 %v4919_v62, %v3192_v15 }
0x1510   :  { %v3204_v56 = vsel %vm1004_vm4, %v3198_v29, -inf }
0x1511   :  { %3205 = vmax.xlane.f32.xlu1 %v3204_v56  ;;  %v3201_v55 = vsel %vm1004_vm4, %v3193_v34, -inf }
0x1512   :  { %3202 = vmax.xlane.f32.xlu0 %v3201_v55 }
0x1515   :  { %2834 = vadd.xlane.f32.xlu1 %v2833_v35 }
0x1516   :  { %2646 = vadd.xlane.f32.xlu0 %v2645_v36 }
0x1519   :  { %2837 = vadd.xlane.f32.xlu1 %v2836_v27 }
0x151a   :  { %2649 = vadd.xlane.f32.xlu0 %v2648_v37  ;;  %v3956_v37 = vld [vmem:[%s6487_s29 + $0x20] sm:$0xff] }
0x151d   :  { %3027 = vadd.xlane.f32.xlu1 %v3026_v50  ;;  %v3957_v50 = vld [vmem:[%s6487_s29 + $0x28] sm:$0xff] }
0x151e   :  { %3024 = vadd.xlane.f32.xlu0 %v3023_v16  ;;  %v3958_v16 = vld [vmem:[%s6487_s29 + $0x30] sm:$0xff] }
0x159e   :  { %v3206_v2 = vpop.xlane.xlu1 %3205 }
0x159f   :  { %v3208_v5 = vsub.f32 %v3198_v29, %v3206_v2  ;;  %v3203_v8 = vpop.xlane.xlu0 %3202  ;;  %v4748_v2 = vpack.c.bf16 %v3957_v50, %v3956_v37 }
0x15a0   :  { %v3207_v14 = vsub.f32 %v3193_v34, %v3203_v8 }
0x15a1   :  { %v3211_v17 = vmul.f32 1.442695, %v3208_v5  ;;  %v3959_v5 = vld [vmem:[%s6487_s29 + $0x38] sm:$0xff]  ;;  %4749 = vmatprep.subr.bf16.mxu0 %v4748_v2 }
0x15a2   :  { %v3209_v18 = vmul.f32 1.442695, %v3207_v14  ;;  %v2835_v38 = vpop.xlane.xlu1 %2834  ;;  %v4752_v8 = vpack.c.bf16 %v3959_v5, %v3958_v16  ;;  %4751 = vmatpush3.bf16.msra.mxu0 %v4748_v2  ;;  %v3963_v14 = vld [vmem:[%s6488_s25 + $0x80] sm:$0xff] }
0x15a3   :  { %4878 = vpow2.f32 %v3211_v17  ;;  %v2647_v24 = vpop.xlane.xlu0 %2646  ;;  %v3964_v17 = vld [vmem:[%s6488_s25 + $0x88] sm:$0xff] }
0x15a4   :  { %4880 = vpow2.f32 %v3209_v18  ;;  %4753 = vmatprep.subr.bf16.mxu0 %v4752_v8  ;;  %v3965_v18 = vld [vmem:[%s6488_s25 + $0x90] sm:$0xff] }
0x15a5   :  { %4882 = vrcp.f32 %v2835_v38  ;;  %v4756_v38 = vpack.c.bf16 %v3964_v17, %v3963_v14 }
0x15a6   :  { %4884 = vrcp.f32 %v2647_v24  ;;  %v2838_v19 = vpop.xlane.xlu1 %2837  ;;  %4755 = vmatpush3.bf16.msra.mxu0 %v4752_v8  ;;  %v3966_v24 = vld [vmem:[%s6488_s25 + $0x98] sm:$0xff] }
0x15a7   :  { %4886 = vrcp.f32 %v2838_v19  ;;  %v2650_v4 = vpop.xlane.xlu0 %2649  ;;  %v4760_v19 = vpack.c.bf16 %v3966_v24, %v3965_v18  ;;  %v3979_v24 = vld [vmem:[#allocation17 + $0x1] ss:$0 sm:$0xff] }
0x15a8   :  { %4888 = vrcp.f32 %v2650_v4  ;;  %v3967_v4 = vld [vmem:[%s6488_s25 + $0xa0] sm:$0xff] }
0x15aa   :  { %v3028_v44 = vpop.xlane.xlu1 %3027 }
0x15ab   :  { %4890 = vrcp.f32 %v3028_v44  ;;  %v3025_v45 = vpop.xlane.xlu0 %3024  ;;  %v3968_v44 = vld [vmem:[%s6488_s25 + $0xa8] sm:$0xff] }
0x15ac   :  { %4892 = vrcp.f32 %v3025_v45  ;;  %v4764_v45 = vpack.c.bf16 %v3968_v44, %v3967_v4 }
0x15ad   :  { %v4879_v20 = vpop.eup %4878 }
0x15ae   :  { %v4881_v21 = vpop.eup %4880  ;;  %v3216_v31 = vsel %vm1004_vm4, %v4879_v20, 0.0 }
0x15af   :  { %v4883_v63 = vpop.eup %4882  ;;  %4461 = vmatprep.mubr.msk.f32.mxu1 %vm1004_vm4, %v4881_v21  ;;  %3217 = vadd.xlane.f32.xlu1 %v3216_v31  ;;  %v3213_v22 = vsel %vm1004_vm4, %v4881_v21, 0.0 }
0x15b0   :  { %v4885_v23 = vpop.eup %4884  ;;  %4462 = vmatmul.mubr.msk.f32.vlgmr.msra.gmra.mrb[22].mxu1 %vm1004_vm4, %v4879_v20  ;;  %3214 = vadd.xlane.f32.xlu0 %v3213_v22  ;;  %v2922_v30 = vmul.f32 %v4883_v63, %v6252_v48  ;;  %v3947_v48 = vld [vmem:[%s6486_s15 + $0x20] sm:$0xff] }
0x15b1   :  { %v4887_v32 = vpop.eup %4886  ;;  %v2734_v33 = vmul.f32 %v4885_v23, %v6248_v43  ;;  %v3948_v43 = vld [vmem:[%s6486_s15 + $0x28] sm:$0xff] }
0x15b2   :  { %v4889_v39 = vpop.eup %4888  ;;  %v2923_v40 = vmul.f32 %v4887_v32, %v6250_v47  ;;  %v4740_v47 = vpack.c.bf16 %v3948_v43, %v3947_v48  ;;  %v3955_v43 = vld [vmem:[#allocation14 + $0x1] ss:$0 sm:$0xff] }
0x15b3   :  { %v2735_v25 = vmul.f32 %v4889_v39, %v6246_v42  ;;  %v2924_v26 = vadd.f32 %v2922_v30, %v2734_v33  ;;  %v3949_v42 = vld [vmem:[%s6486_s15 + $0x30] sm:$0xff] }
0x15b4   :  { %4741 = vmatprep.subr.bf16.mxu1 %v4740_v47  ;;  %v4744_v58 = vpack.c.bf16 %v3950_v57, %v3949_v42 }
0x15b5   :  { %v4891_v6 = vpop.eup %4890  ;;  %v2925_v7 = vadd.f32 %v2923_v40, %v2735_v25  ;;  %4743 = vmatpush3.bf16.msra.mxu1 %v4740_v47 }
0x15b6   :  { %v4893_v41 = vpop.eup %4892  ;;  %v3113_v49 = vmul.f32 %v4891_v6, %v6267_v9  ;;  %4745 = vmatprep.subr.bf16.mxu1 %v4744_v58 }
0x15b7   :  { %v3112_v52 = vmul.f32 %v4893_v41, %v6269_v10 }
0x15b8   :  { %v3115_v53 = vadd.f32 %v3113_v49, %v2925_v7 }
0x15b9   :  { %v3114_v54 = vadd.f32 %v3112_v52, %v2924_v26  ;;  %4747 = vmatpush3.bf16.msra.mxu1 %v4744_v58  ;;  %v3954_v52 = vld [vmem:[#allocation13 + $0x1] ss:$0 sm:$0xff] }
0x15ba   :  { %4757 = vmatprep.subr.bf16.mxu1 %v4756_v38 }
0x163c   :  { %v3218_v46 = vpop.xlane.xlu1 %3217 }
0x163d   :  { %v3215_v59 = vpop.xlane.xlu0 %3214  ;;  %4894 = vrcp.f32 %v3218_v46  ;;  %v3969_v46 = vld [vmem:[%s6488_s25 + $0xb0] sm:$0xff] }
0x163e   :  { %4896 = vrcp.f32 %v3215_v59  ;;  %v3970_v59 = vld [vmem:[%s6488_s25 + $0xb8] sm:$0xff] }
0x1647   :  { %v4895_v60 = vpop.eup %4894 }
0x1648   :  { %v4897_v61 = vpop.eup %4896 }
0x1683   :  { %v4463_v28 = vpop.f32.mrb[22].mxu1 }
0x1684   :  { %v3303_v0 = vmul.f32 %v4895_v60, %v4463_v28  ;;  %v3291_v1 = vpop.f32.mrb[23].mxu1  ;;  %v4768_v60 = vpack.c.bf16 %v3970_v59, %v3969_v46  ;;  %v3971_v28 = vld [vmem:[%s6488_s25 + $0xc0] sm:$0xff] }
0x1685   :  { %v3302_v3 = vmul.f32 %v4897_v61, %v3291_v1  ;;  %v3972_v61 = vld [vmem:[%s6488_s25 + $0xc8] sm:$0xff]  ;;  %v3973_v1 = vld [vmem:[%s6488_s25 + $0xd0] sm:$0xff] }
0x1686   :  { %v3305_v9 = vadd.f32 %v3303_v0, %v3115_v53  ;;  %v4772_v0 = vpack.c.bf16 %v3972_v61, %v3971_v28 }
0x1687   :  { %v3304_v10 = vadd.f32 %v3302_v3, %v3114_v54  ;;  %v3974_v3 = vld [vmem:[%s6488_s25 + $0xd8] sm:$0xff] }
0x1689   :  { %4472 = vmatprep.mubr.msk.f32.mxu1 %vm420_vm2, %v3304_v10  ;;  %v3975_v10 = vld [vmem:[%s6488_s25 + $0xe0] sm:$0xff] }
0x168a   :  { %4473 = vmatmul.mubr.msk.f32.vlgmr.msra.gmra.mrb[24].mxu1 %vm420_vm2, %v3305_v9  ;;  %v4776_v9 = vpack.c.bf16 %v3974_v3, %v3973_v1  ;;  %v3981_v1 = vld [vmem:[#allocation20] ss:$0 sm:$0xff] }
0x168b   :  { %4759 = vmatpush3.bf16.msra.mxu1 %v4756_v38 }
0x168c   :  { %4761 = vmatprep.subr.bf16.mxu1 %v4760_v19 }
0x168f   :  { %4763 = vmatpush3.bf16.msra.mxu1 %v4760_v19 }
0x1690   :  { %4765 = vmatprep.subr.bf16.mxu1 %v4764_v45 }
0x1693   :  { %4767 = vmatpush3.bf16.msra.mxu1 %v4764_v45 }
0x1694   :  { %4769 = vmatprep.subr.bf16.mxu1 %v4768_v60 }
0x1697   :  { %4771 = vmatpush3.bf16.msra.mxu1 %v4768_v60  ;;  %v3980_v60 = vld [vmem:[#allocation19] ss:$0 sm:$0xff] }
0x1698   :  { %4773 = vmatprep.subr.bf16.mxu1 %v4772_v0 }
0x169b   :  { %4775 = vmatpush3.bf16.msra.mxu1 %v4772_v0 }
0x169c   :  { %4777 = vmatprep.subr.bf16.mxu1 %v4776_v9 }
0x169f   :  { %4779 = vmatpush3.bf16.msra.mxu1 %v4776_v9 }
0x175d   :  { %v4474_v51 = vpop.f32.mrb[24].mxu1 }
0x175e   :  { %v3397_v29 = vadd.f32 %v4474_v51, %v3951_v13  ;;  %v3391_v15 = vpop.f32.mrb[25].mxu1 }
0x175f   :  { %v3392_v62 = vadd.f32 %v3951_v13, %v3391_v15  ;;  %v3976_v13 = vld [vmem:[%s6488_s25 + $0xe8] sm:$0xff]  ;;  %v3978_v15 = vld [vmem:[%s6488_s25 + $0xf8] sm:$0xff] }
0x1760   :  { %v6310_v34 = vadd.f32 %v3397_v29, %v6100_v11  ;;  %v4780_v51 = vpack.c.bf16 %v3976_v13, %v3975_v10  ;;  %v3977_v29 = vld [vmem:[%s6488_s25 + $0xf0] sm:$0xff]  ;;  %s5357_s25 = smov [#allocation29]  }
0x1761   :  { %v6313_v56 = vadd.f32 %v3392_v62, %v6102_v12  ;;  %v4784_v62 = vpack.c.bf16 %v3978_v15, %v3977_v29  ;;  %s3819_s14 = sshll.u32 %s5357_s25, 4  ;;  %s3820_s14 = int_to_ptr.vmem [resolvable:$true] %s3819_s14 }
0x1762   :  { %v3409_v55 = vsel %vm420_vm2, %v6310_v34, 0.0  ;;  %v3415_v35 = vmul.f32 %v6310_v34, %v6310_v34  ;;  %4781 = vmatprep.subr.bf16.mxu1 %v4780_v51  ;;  %s5294_s22 = scalar_lea.vmem %s3820_s14, 256  ;;  %p5299_p11 = scmp.lt.s32.totalorder %s3820_s14, %s3820_s14 }
0x1763   :  { %3410 = vadd.xlane.f32.xlu1 %v3409_v55  ;;  %v3406_v36 = vsel %vm420_vm2, %v6313_v56, 0.0  ;;  %v3414_v27 = vmul.f32 %v6313_v56, %v6313_v56  ;;  %4783 = vmatpush3.bf16.msra.mxu1 %v4780_v51  ;;  %v3960_v55 = vld [vmem:[#allocation16 + $0x1] ss:$0 sm:$0xff]  ;;  %v3982_v51 = vld [vmem:[#allocation23] ss:$0 sm:$0xff]  ;;  %p5295_p10 = scmp.ne.s32.totalorder %s3820_s14, %s5294_s22  ;;  %p5300_p12 = scmp.lt.s32.totalorder %s5294_s22, %s5294_s22 }
0x1764   :  { %3407 = vadd.xlane.f32.xlu0 %v3406_v36  ;;  %v3419_v11 = vsel %vm420_vm2, %v3415_v35, 0.0  ;;  %4785 = vmatprep.subr.bf16.mxu1 %v4784_v62 }
0x1765   :  { %v3416_v12 = vsel %vm420_vm2, %v3414_v27, 0.0  ;;  %p5301_p13 = por %p5300_p12, %p5299_p11 }
0x1767   :  { %3420 = vadd.xlane.f32.xlu1 %v3419_v11  ;;  %4787 = vmatpush3.bf16.msra.mxu1 %v4784_v62  ;;  %p5302_p0 = pnand %p5301_p13, %p5295_p10 }
0x1768   :  { %3417 = vadd.xlane.f32.xlu0 %v3416_v12 }
0x17f0   :  { %v3411_v20 = vpop.xlane.xlu1 %3410 }
0x17f1   :  { %v3413_v21 = vmul.f32 0.03125, %v3411_v20  ;;  %v3408_v31 = vpop.xlane.xlu0 %3407 }
0x17f2   :  { %v3412_v63 = vmul.f32 0.03125, %v3408_v31 }
0x17f3   :  { %v3425_v23 = vmul.f32 %v3413_v21, %v3413_v21  ;;  %v3429_v7 = vsub.f32 %v6310_v34, %v3413_v21 }
0x17f4   :  { %v3421_v22 = vpop.xlane.xlu1 %3420  ;;  %v3424_v33 = vmul.f32 %v3412_v63, %v3412_v63  ;;  %v3428_v49 = vsub.f32 %v6313_v56, %v3412_v63 }
0x17f5   :  { %v3423_v30 = vmul.f32 0.03125, %v3421_v22  ;;  %v3418_v32 = vpop.xlane.xlu0 %3417 }
0x17f6   :  { %v3422_v39 = vmul.f32 0.03125, %v3418_v32  ;;  %v3709_v32 = vld [vmem:[#allocation22 + $0x8] sm:$0xff] }
0x17f7   :  { %v3427_v40 = vsub.f32 %v3423_v30, %v3425_v23 }
0x17f8   :  { %v3426_v25 = vsub.f32 %v3422_v39, %v3424_v33  ;;  %v3710_v33 = vld [vmem:[#allocation22 + $0x10] sm:$0xff]  ;;  %v3711_v39 = vld [vmem:[#allocation22 + $0x18] sm:$0xff] }
0x17f9   :  { %v3431_v26 = vadd.f32 1e-05, %v3427_v40  ;;  %v4792_v40 = vpack.c.bf16 %v3711_v39, %v3710_v33 }
0x17fa   :  { %v3430_v6 = vadd.f32 1e-05, %v3426_v25 }
0x17fb   :  { %4898 = vrsqrt.f32 %v3431_v26 }
0x17fc   :  { %4900 = vrsqrt.f32 %v3430_v6 }
0x1805   :  { %v4899_v41 = vpop.eup %4898 }
0x1806   :  { %v4901_v53 = vpop.eup %4900  ;;  %v3435_v54 = vmul.f32 %v4899_v41, %v3429_v7 }
0x1807   :  { %v3434_v48 = vmul.f32 %v4901_v53, %v3428_v49 }
0x1808   :  { %v3443_v47 = vmul.f32 %v3954_v52, %v3435_v54 }
0x1809   :  { %v3442_v42 = vmul.f32 %v3954_v52, %v3434_v48 }
0x180a   :  { %v3451_v58 = vadd.f32 %v3955_v43, %v3443_v47 }
0x180b   :  { %v3450_v57 = vadd.f32 %v3955_v43, %v3442_v42 }
0x180d   :  { %4483 = vmatprep.mubr.msk.f32.mxu0 %vm420_vm2, %v3450_v57 }
0x180e   :  { %4484 = vmatmul.mubr.msk.f32.vlgmr.msra.gmra.mrb[36].mxu0 %vm420_vm2, %v3451_v58 }
0x18e1   :  { %v4485_v35 = vpop.f32.mrb[36].mxu0 }
0x18e2   :  { %v3543_v36 = vadd.f32 %v4485_v35, %v3960_v55  ;;  %v3537_v27 = vpop.f32.mrb[37].mxu0 }
0x18e3   :  { %v3538_v11 = vadd.f32 %v3960_v55, %v3537_v27 }
0x18e4   :  { %v3549_v12 = vmul.f32 0.70710677, %v3543_v36  ;;  %v3547_v14 = vmul.f32 0.5, %v3543_v36 }
0x18e5   :  { %v3548_v37 = vmul.f32 0.70710677, %v3538_v11  ;;  %v3546_v5 = vmul.f32 0.5, %v3538_v11 }
0x18e6   :  { %4902 = verf.f32 %v3549_v12 }
0x18e7   :  { %4904 = verf.f32 %v3548_v37 }
0x18f0   :  { %v4903_v50 = vpop.eup %4902 }
0x18f1   :  { %v4905_v16 = vpop.eup %4904  ;;  %v3553_v2 = vadd.f32 1.0, %v4903_v50 }
0x18f2   :  { %v3552_v8 = vadd.f32 1.0, %v4905_v16 }
0x18f3   :  { %v3555_v18 = vmul.f32 %v3553_v2, %v3547_v14 }
0x18f4   :  { %v3554_v17 = vmul.f32 %v3552_v8, %v3546_v5 }
0x18f6   :  { %4518 = vmatprep.mubr.f32.mxu1 %v3554_v17 }
0x18f7   :  { %4519 = vmatmul.mubr.f32.vlgmr.msra.gmra.mrb[26].mxu1 %v3555_v18 }
0x19ca   :  { %v4520_v38 = vpop.f32.mrb[26].mxu1 }
0x19cb   :  { %v3649_v19 = vadd.f32 %v4520_v38, %v6310_v34  ;;  %v3639_v4 = vpop.f32.mrb[27].mxu1  ;;  %v3708_v34 = vld [vmem:[#allocation22] sm:$0xff] }
0x19cc   :  { %v3648_v44 = vadd.f32 %v3639_v4, %v6313_v56  ;;  %v4788_v56 = vpack.c.bf16 %v3709_v32, %v3708_v34 }
0x19cd   :  { %v3659_v45 = vadd.f32 %v3979_v24, %v3649_v19 }
0x19ce   :  { %v3658_v20 = vadd.f32 %v3979_v24, %v3648_v44  ;;  %4789 = vmatprep.subr.bf16.mxu0 %v4788_v56 }
0x19cf   :  { %v3665_v21 = vsel %vm420_vm2, %v3659_v45, 0.0  ;;  %v3671_v31 = vmul.f32 %v3659_v45, %v3659_v45  ;;  %4791 = vmatpush3.bf16.msra.mxu0 %v4788_v56 }
0x19d0   :  { %3666 = vadd.xlane.f32.xlu1 %v3665_v21  ;;  %v3662_v63 = vsel %vm420_vm2, %v3658_v20, 0.0  ;;  %v3670_v22 = vmul.f32 %v3658_v20, %v3658_v20  ;;  %4793 = vmatprep.subr.bf16.mxu0 %v4792_v40 }
0x19d1   :  { %3663 = vadd.xlane.f32.xlu0 %v3662_v63  ;;  %v3675_v23 = vsel %vm420_vm2, %v3671_v31, 0.0 }
0x19d2   :  { %v3672_v30 = vsel %vm420_vm2, %v3670_v22, 0.0 }
0x19d3   :  { %4795 = vmatpush3.bf16.msra.mxu0 %v4792_v40 }
0x19d4   :  { %3676 = vadd.xlane.f32.xlu1 %v3675_v23 }
0x19d5   :  { %3673 = vadd.xlane.f32.xlu0 %v3672_v30 }
0x1a5d   :  { %v3667_v25 = vpop.xlane.xlu1 %3666 }
0x1a5e   :  { %v3669_v26 = vmul.f32 0.03125, %v3667_v25  ;;  %v3664_v6 = vpop.xlane.xlu0 %3663 }
0x1a5f   :  { %v3668_v7 = vmul.f32 0.03125, %v3664_v6 }
0x1a60   :  { %v3681_v49 = vmul.f32 %v3669_v26, %v3669_v26  ;;  %v3685_v58 = vsub.f32 %v3659_v45, %v3669_v26 }
0x1a61   :  { %v3677_v41 = vpop.xlane.xlu1 %3676  ;;  %v3680_v54 = vmul.f32 %v3668_v7, %v3668_v7  ;;  %v3684_v59 = vsub.f32 %v3658_v20, %v3668_v7 }
0x1a62   :  { %v3679_v52 = vmul.f32 0.03125, %v3677_v41  ;;  %v3674_v53 = vpop.xlane.xlu0 %3673 }
0x1a63   :  { %v3678_v48 = vmul.f32 0.03125, %v3674_v53 }
0x1a64   :  { %v3683_v43 = vsub.f32 %v3679_v52, %v3681_v49 }
0x1a65   :  { %v3682_v47 = vsub.f32 %v3678_v48, %v3680_v54 }
0x1a66   :  { %v3687_v42 = vadd.f32 1e-05, %v3683_v43 }
0x1a67   :  { %v3686_v57 = vadd.f32 1e-05, %v3682_v47 }
0x1a68   :  { %4906 = vrsqrt.f32 %v3687_v42 }
0x1a69   :  { %4908 = vrsqrt.f32 %v3686_v57 }
0x1a72   :  { %v4907_v46 = vpop.eup %4906 }
0x1a73   :  { %v4909_v28 = vpop.eup %4908  ;;  %v3691_v61 = vmul.f32 %v4907_v46, %v3685_v58 }
0x1a74   :  { %v3690_v0 = vmul.f32 %v4909_v28, %v3684_v59 }
0x1a75   :  { %v3699_v3 = vmul.f32 %v3980_v60, %v3691_v61 }
0x1a76   :  { %v3698_v9 = vmul.f32 %v3980_v60, %v3690_v0 }
0x1a77   :  { %v3707_v13 = vadd.f32 %v3981_v1, %v3699_v3 }
0x1a78   :  { %v3706_v10 = vadd.f32 %v3981_v1, %v3698_v9 }
0x1a7a   :  { %4529 = vmatprep.mubr.msk.f32.mxu0 %vm420_vm2, %v3706_v10 }
0x1a7b   :  { %4530 = vmatmul.mubr.msk.f32.vlgmr.msra.gmra.mrb[38].mxu0 %vm420_vm2, %v3707_v13 }
0x1b4e   :  { %v4531_v29 = vpop.f32.mrb[38].mxu0 }
0x1b4f   :  { %v3797_v15 = vadd.f32 %v4531_v29, %v3982_v51  ;;  %v3791_v62 = vpop.f32.mrb[39].mxu0 }
0x1b50   :  { %v3792_v55 = vadd.f32 %v3982_v51, %v3791_v62 }
0x1b51   :  { %v3986_v35 = vmul.f32 -1.442695, %v3797_v15 }
0x1b52   :  { %v3985_v36 = vmul.f32 -1.442695, %v3792_v55 }
0x1b53   :  { %4910 = vpow2.f32 %v3986_v35 }
0x1b54   :  { %4912 = vpow2.f32 %v3985_v36 }
0x1b5d   :  { %v4911_v27 = vpop.eup %4910 }
0x1b5e   :  { %v4913_v11 = vpop.eup %4912  ;;  %v3807_v12 = vadd.f32 1.0, %v4911_v27 }
0x1b5f   :  { %v3806_v37 = vadd.f32 1.0, %v4913_v11 }
0x1b60   :  { %4914 = vrcp.f32 %v3807_v12 }
0x1b61   :  { %4916 = vrcp.f32 %v3806_v37 }
0x1b6a   :  { %v4915_v50 = vpop.eup %4914 }
0x1b6b   :  { %v4917_v16 = vpop.eup %4916  ;;  %3813 = vst [vmem:[#allocation29 + $0x8] sm:$0xff] %v4915_v50 }
0x1b6c   :  { %3812 = vst [vmem:[#allocation29] sm:$0xff] %v4917_v16 }
0x1b6d   :  { %5305 = shalt.err (!%p5302_p0)
}
0x1b6e   :  { %s6489_s8 = sld [smem:[#allocation55_spill]] }
0x1b74   :  { %s5306_s30 = scalar_lea.hbm %s6489_s8, 256 }
0x1b75   :  { %p5307_p1 = scmp.ne.s32.totalorder %s6489_s8, %s5306_s30  ;;  %p5310_p2 = scmp.lt.u32.totalorder %s5306_s30, %s6489_s8 }
0x1b77   :  { %p5312_p3 = pnand %p5310_p2, %p5307_p1 }
0x1b79   :  { %5315 = shalt.err (!%p5312_p3)
}
0x1b7a   :  { %3825 = dma.vmem_to_hbm [thread:$0]  %s3820_s14, 256, %s6489_s8, [#allocation4], %s5347_s6, %s5347_s6, %s5348_s0  }
0x1b7b   :  { %5334 = dma.done.wait [#allocation4], 256  }
0x1b7c   :  { %5335 = vsyncadd [#allocation4], 4294967040 }
0x1b7d   :  { %3829 = vsyncpa [#allocation3], 1 }
0x1b7e   :  { %3830 = vsyncpa [#allocation6], 1 }
0x1b7f   :  { %3831 = vsyncpa [#allocation9], 1 }
0x1b80   :  { %3832 = vsyncpa [#allocation12], 1 }
0x1b81   :  { %3833 = vsyncpa [#allocation15], 1 }
0x1b82   :  { %3834 = vsyncpa [#allocation18], 1 }
0x1b83   :  { %3835 = vsyncpa [#allocation21], 1 }
0x1b84   :  { %3836 = vsyncpa [#allocation24], 1 }
0x1b85   :  { %3837 = vsyncpa [#allocation27], 1 }
0x1b86   :  { %3838 = vsyncpa [#allocation4], 1 }

</bundles_post_ra>
